<compile_context>
chip_gen: v6e
topology: v6e:2x2x1
jax: 0.10.0
libtpu: 0.0.40
codegen_flags: <defaults>
</compile_context>

<pallas_src>
import functools
import math

import jax
import jax.numpy as jnp
from jax import lax
from jax.experimental import pallas as pl
from jax.experimental.pallas import tpu as pltpu

LANE = 128

_WEIGHT_ORDER = ('cg_w1', 'cg_b1', 'cg_w2', 'cg_b2',
                 'tch_w1', 'tch_b1', 'tch_w2', 'tch_b2',
                 'sg_w1', 'sg_spx', 'sg_spe', 'sg_bias',
                 'rw1', 'rs1', 'rw2', 'rs2', 'rw3', 'rs3',
                 'hd_w', 'hd_b')


# ----------------------------------------------------------------------------- utils
def _ceil_to(x, m):
    return ((x + m - 1) // m) * m


def _pad2(a, rows, cols):
    return jnp.pad(a, ((0, rows - a.shape[0]), (0, cols - a.shape[1])))


def _bn_fold(gamma, beta, mean, var, eps=1e-5):
    scale = gamma / jnp.sqrt(var + eps)
    return scale, beta - mean * scale


def _sigmoid(v):
    # exact form keeps the tight f32 parity check; pl.reciprocal(..., approx=True)
    # would move the divide to the EUP at the cost of a relaxed tolerance.
    return 1.0 / (1.0 + jnp.exp(-v))


def _build_spatial_conv_matrix(conv_w, bn_scale, H, W):
    """Fold the 7x7 (3->1, pad=3) conv (BN scale included) into K (HW, 3*HW) with
       conv(comp)_flat == K @ [max_flat; mean_flat; emb_flat]. Runs ONCE at prepare time."""
    _, Cin, KH, KW = conv_w.shape
    P = (KH - 1) // 2
    HW = H * W
    w = (conv_w[0] * bn_scale).astype(jnp.float32)           # (Cin, KH, KW)
    out_idx = jnp.arange(HW)
    h_out, w_out = out_idx // W, out_idx % W
    in_idx = jnp.arange(Cin * HW)
    c_in = in_idx // HW
    rem = in_idx % HW
    h_in, w_in = rem // W, rem % W
    dh = h_in[None, :] - h_out[:, None] + P                  # (HW, Cin*HW)
    dw = w_in[None, :] - w_out[:, None] + P
    valid = (dh >= 0) & (dh < KH) & (dw >= 0) & (dw < KW)
    taps = w[jnp.broadcast_to(c_in[None, :], dh.shape),
             jnp.clip(dh, 0, KH - 1),
             jnp.clip(dw, 0, KW - 1)]
    return jnp.where(valid, taps, 0.0)                       # (HW, 3*HW)


# ------------------------------------------------------- one-time weight preparation
def _prepare_params(p, *, C, H, W, tab_dim, num_classes, eps=1e-5):
    """Padding / transposes / BN folding / spatial-conv matrix fold, hoisted out of the
    forward path (runs once)."""
    f32, bf16 = jnp.float32, jnp.bfloat16
    HW = H * W
    R = p['cg_fc1_w'].shape[0]
    HW2 = p['sg_tab_fc1_w'].shape[0]
    C4 = p['res_conv1_w'].shape[0]
    C_p = _ceil_to(C, LANE)
    R_p = _ceil_to(R, LANE)
    TD_p = _ceil_to(tab_dim + 1, LANE)     # +1 slot carries the folded SpatialGate fc1 bias
    C4_p = _ceil_to(C4, LANE)
    NC_p = _ceil_to(num_classes, LANE)

    prep = {}
    # ChannelGate shared MLP + tab embedding (PyTorch Linear is (out,in); math is x @ W.T + b)
    prep['cg_w1'] = _pad2(p['cg_fc1_w'].T, C_p, R_p).astype(f32)
    prep['cg_b1'] = _pad2(p['cg_fc1_b'][None, :], 1, R_p).astype(f32)
    prep['cg_w2'] = _pad2(p['cg_fc2_w'].T, R_p, C_p).astype(f32)
    prep['cg_b2'] = _pad2(p['cg_fc2_b'][None, :], 1, C_p).astype(f32)
    prep['tch_w1'] = _pad2(p['cg_tab_fc1_w'].T, TD_p, R_p).astype(f32)
    prep['tch_b1'] = _pad2(p['cg_tab_fc1_b'][None, :], 1, R_p).astype(f32)
    prep['tch_w2'] = _pad2(p['cg_tab_fc2_w'].T, R_p, C_p).astype(f32)
    prep['tch_b2'] = _pad2(p['cg_tab_fc2_b'][None, :], 1, C_p).astype(f32)

    # SpatialGate fc1 with bias folded into column `tab_dim` (input carries a trailing 1)
    sg_w1 = jnp.zeros((HW2, TD_p), f32)
    sg_w1 = sg_w1.at[:, :tab_dim].set(p['sg_tab_fc1_w'].astype(f32))
    sg_w1 = sg_w1.at[:, tab_dim].set(p['sg_tab_fc1_b'].astype(f32))
    prep['sg_w1'] = sg_w1
    # 7x7 conv + BN folded into a dense matrix over the flattened spatial map; the
    # tab-embedding fc2 (+ bias) is absorbed into it:
    #   sp = [K_max|K_mean] @ [cmax;cmean] + (K_emb @ W2) @ relu(fc1) + (K_emb @ b2 + bn_shift)
    sc, sh = _bn_fold(p['sg_bn_gamma'], p['sg_bn_beta'], p['sg_bn_mean'], p['sg_bn_var'], eps)
    K = _build_spatial_conv_matrix(p['sg_conv_w'], sc[0], H, W)        # (HW, 3*HW)
    K_emb = K[:, 2 * HW:]
    prep['sg_spx'] = K[:, :2 * HW].astype(f32)                         # (HW, 2*HW)
    prep['sg_spe'] = (K_emb @ p['sg_tab_fc2_w'].astype(f32)).astype(f32)          # (HW, HW2)
    prep['sg_bias'] = (K_emb @ p['sg_tab_fc2_b'].astype(f32)[:, None] + sh[0]).astype(f32)

    # residual bottleneck convs with BN folded; bf16 weights for the MXU
    def fold(w, pre):
        s, b = _bn_fold(p[pre + '_gamma'], p[pre + '_beta'], p[pre + '_mean'], p[pre + '_var'], eps)
        return w * s[:, None, None, None], b
    w1, b1 = fold(p['res_conv1_w'], 'res_bn1')
    w2, b2 = fold(p['res_conv2_w'], 'res_bn2')
    w3, b3 = fold(p['res_conv3_w'], 'res_bn3')
    prep['rw1'] = _pad2(w1[:, :, 0, 0].T, C_p, C4_p).astype(bf16)
    prep['rs1'] = _pad2(b1[None, :], 1, C4_p).astype(f32)
    prep['rw2'] = jnp.stack([_pad2(w2[:, :, kh, kw].T, C4_p, C4_p)
                             for kh in range(3) for kw in range(3)]).astype(bf16)  # (9,C4_p,C4_p)
    prep['rs2'] = _pad2(b2[None, :], 1, C4_p).astype(f32)
    prep['rw3'] = _pad2(w3[:, :, 0, 0].T, C4_p, C_p).astype(bf16)
    prep['rs3'] = _pad2(b3[None, :], 1, C_p).astype(f32)

    # head
    prep['hd_w'] = _pad2(p['head_w'].T, C_p, NC_p).astype(f32)
    prep['hd_b'] = _pad2(p['head_b'][None, :], 1, NC_p).astype(f32)
    return prep


# ----------------------------------------------------------------- fused Pallas kernel
def _fused_kernel(x_ref, tab_row_ref, tab_col_ref,
                  cg_w1_ref, cg_b1_ref, cg_w2_ref, cg_b2_ref,
                  tch_w1_ref, tch_b1_ref, tch_w2_ref, tch_b2_ref,
                  sg_w1_ref, sg_spx_ref, sg_spe_ref, sg_bias_ref,
                  rw1_ref, rs1_ref, rw2_ref, rs2_ref, rw3_ref, rs3_ref,
                  hd_w_ref, hd_b_ref,
                  logits_ref, x2_ref,
                  pad_scr,
                  *, C, H, W):
    f32, bf16 = jnp.float32, jnp.bfloat16
    HW = H * W
    x = x_ref[0]                                              # (HW, C_p) f32 (also the skip)

    # ---------------- ChannelGate ----------------
    avg = jnp.mean(x, axis=0, keepdims=True)                  # (1, C_p)
    mx = jnp.max(x, axis=0, keepdims=True)                    # (1, C_p)
    tab_r = tab_row_ref[0]                                    # (1, TD_p)
    emb = jnp.dot(tab_r, tch_w1_ref[...], preferred_element_type=f32) + tch_b1_ref[...]
    emb = jnp.maximum(emb, 0.0)
    emb = jnp.dot(emb, tch_w2_ref[...], preferred_element_type=f32) + tch_b2_ref[...]
    # shared MLP applied to the three pooled vectors in one matmul, then summed
    pooled = jnp.concatenate([avg, mx, emb], axis=0)          # (3, C_p)
    hid = jnp.dot(pooled, cg_w1_ref[...], preferred_element_type=f32) + cg_b1_ref[...]
    hid = jnp.maximum(hid, 0.0)
    att = jnp.dot(hid, cg_w2_ref[...], preferred_element_type=f32) + cg_b2_ref[...]
    att = jnp.sum(att, axis=0, keepdims=True)                 # (1, C_p)
    x1 = x * _sigmoid(att)                                    # (HW, C_p)

    # ---------------- SpatialGate ----------------
    lane = lax.broadcasted_iota(jnp.int32, x1.shape, 1)
    cmax = jnp.max(jnp.where(lane < C, x1, -1e30), axis=1, keepdims=True)   # (HW, 1)
    cmean = jnp.sum(x1, axis=1, keepdims=True) * (1.0 / C)                  # (HW, 1)
    e = jnp.maximum(jnp.dot(sg_w1_ref[...], tab_col_ref[0],
                            preferred_element_type=f32), 0.0)               # (HW2, 1), bias folded
    cm = jnp.concatenate([cmax, cmean], axis=0)                             # (2*HW, 1)
    sp = (jnp.dot(sg_spx_ref[...], cm, preferred_element_type=f32)
          + jnp.dot(sg_spe_ref[...], e, preferred_element_type=f32)
          + sg_bias_ref[...])                                               # (HW, 1)
    x2 = x1 * _sigmoid(sp)                                    # (HW, C_p)
    x2_ref[0] = x2                                            # block output (for parity check)

    # ---------------- residual bottleneck (bf16 MXU, f32 acc) ----------------
    C4_p = rs1_ref.shape[-1]
    r1 = jnp.dot(x2.astype(bf16), rw1_ref[...], preferred_element_type=f32) + rs1_ref[...]
    r1 = jnp.maximum(r1, 0.0)                                 # (HW, C4_p)

    # 3x3 conv as 9 per-tap matmuls over a zero-padded VMEM image (no im2col slab).
    pad_scr[...] = jnp.zeros_like(pad_scr)
    pad_scr[1:H + 1, 1:W + 1, :] = r1.reshape(H, W, C4_p)
    acc = jnp.zeros((HW, C4_p), f32)
    for t in range(9):
        kh, kw = t // 3, t % 3
        tap = pad_scr[kh:kh + H, kw:kw + W, :].reshape(HW, C4_p).astype(bf16)
        acc = acc + jnp.dot(tap, rw2_ref[t], preferred_element_type=f32)
    r2 = acc + rs2_ref[...]                                   # (HW, C4_p)

    r3 = jnp.dot(r2.astype(bf16), rw3_ref[...], preferred_element_type=f32) + rs3_ref[...]

    # ---------------- shortcut + ReLU + global avg pool + head ----------------
    y = jnp.maximum(r3 + x, 0.0)                              # (HW, C_p)
    pooled_y = jnp.mean(y, axis=0, keepdims=True)             # (1, C_p)
    logits_ref[0] = (jnp.dot(pooled_y, hd_w_ref[...], preferred_element_type=f32)
                     + hd_b_ref[...])                         # (1, NC_p)


def _fused_forward(x_flat, tab_row, tab_col, wargs, *, C, H, W):
    B, HW, C_p = x_flat.shape
    TD_p = tab_row.shape[-1]
    rs1, hd_b = wargs[13], wargs[19]
    C4_p = rs1.shape[1]
    NC_p = hd_b.shape[1]

    def wspec(arr):
        # invariant (grid-independent) weight block == full array
        return pl.BlockSpec(arr.shape, lambda n, _r=arr.ndim: (0,) * _r)

    kernel = functools.partial(_fused_kernel, C=C, H=H, W=W)
    return pl.pallas_call(
        kernel,
        out_shape=(jax.ShapeDtypeStruct((B, 1, NC_p), jnp.float32),
                   jax.ShapeDtypeStruct((B, HW, C_p), jnp.float32)),
        grid_spec=pltpu.PrefetchScalarGridSpec(
            num_scalar_prefetch=0,
            grid=(B,),
            in_specs=[
                pl.BlockSpec((1, HW, C_p), lambda n: (n, 0, 0)),
                pl.BlockSpec((1, 1, TD_p), lambda n: (n, 0, 0)),
                pl.BlockSpec((1, TD_p, 1), lambda n: (n, 0, 0)),
            ] + [wspec(a) for a in wargs],
            out_specs=[
                pl.BlockSpec((1, 1, NC_p), lambda n: (n, 0, 0)),
                pl.BlockSpec((1, HW, C_p), lambda n: (n, 0, 0)),
            ],
            scratch_shapes=[pltpu.VMEM((H + 2, W + 2, C4_p), jnp.float32)],
        ),
        compiler_params=pltpu.CompilerParams(dimension_semantics=("parallel",)),
    )(x_flat, tab_row, tab_col, *wargs)


def make_tab_attention(params, *, C, H, W, tab_dim, num_classes):
    """Prepares all weights ONCE and returns a jittable forward closure.
    forward(x_im (B,C,H,W), tab (B,1,tab_dim)) -> (logits (B,num_classes),
                                                    block_out (B,C,H,W))."""
    prep = _prepare_params(params, C=C, H=H, W=W, tab_dim=tab_dim, num_classes=num_classes)
    wargs = tuple(prep[k] for k in _WEIGHT_ORDER)
    HW = H * W
    C_p = prep['cg_w1'].shape[0]
    TD_p = prep['tch_w1'].shape[0]

    def forward(x_im, tab):
        B = x_im.shape[0]
        f32 = jnp.float32
        # single NCHW -> lane-dense (B, HW, C_p) layout pass; only wrapper-side work
        x_flat = jnp.transpose(x_im, (0, 2, 3, 1)).reshape(B, HW, C).astype(f32)
        x_flat = jnp.pad(x_flat, ((0, 0), (0, 0), (0, C_p - C)))
        tab2 = tab.reshape(B, tab_dim).astype(f32)
        tab_pad = jnp.pad(tab2, ((0, 0), (0, TD_p - tab_dim)))
        tab_row = tab_pad.reshape(B, 1, TD_p)
        # column form with a trailing 1 so the SpatialGate fc1 bias is folded into its weight
        one = (jnp.arange(TD_p) == tab_dim).astype(f32)
        tab_col = (tab_pad + one[None, :]).reshape(B, TD_p, 1)

        logits_p, x2_p = _fused_forward(x_flat, tab_row, tab_col, wargs, C=C, H=H, W=W)
        logits = logits_p.reshape(B, -1)[:, :num_classes]
        block = jnp.transpose(x2_p[:, :, :C].reshape(B, H, W, C), (0, 3, 1, 2))
        return logits, block

    return forward


# ----------------------------------------------------------------- pure-JAX reference
def reference_forward(x_im, tab, p, eps=1e-5):
    B, C, H, W = x_im.shape
    x = x_im.astype(jnp.float32)
    tab2 = tab.reshape(B, -1).astype(jnp.float32)

    def mlp(z):
        h = jnp.maximum(z @ p['cg_fc1_w'].T + p['cg_fc1_b'], 0.0)
        return h @ p['cg_fc2_w'].T + p['cg_fc2_b']

    avg = jnp.mean(x, axis=(2, 3))
    mx = jnp.max(x, axis=(2, 3))
    emb_ch = jnp.maximum(tab2 @ p['cg_tab_fc1_w'].T + p['cg_tab_fc1_b'], 0.0)
    emb_ch = emb_ch @ p['cg_tab_fc2_w'].T + p['cg_tab_fc2_b']
    att = mlp(avg) + mlp(mx) + mlp(emb_ch)
    x1 = x * jax.nn.sigmoid(att)[:, :, None, None]

    cmax = jnp.max(x1, axis=1, keepdims=True)
    cmean = jnp.mean(x1, axis=1, keepdims=True)
    emb_sp = jnp.maximum(tab2 @ p['sg_tab_fc1_w'].T + p['sg_tab_fc1_b'], 0.0)
    emb_sp = (emb_sp @ p['sg_tab_fc2_w'].T + p['sg_tab_fc2_b']).reshape(B, 1, H, W)
    comp = jnp.concatenate([cmax, cmean, emb_sp], axis=1)

    def conv_bn(z, w, g, b_, m, v, pad, relu):
        y = lax.conv_general_dilated(z, w, (1, 1), [(pad, pad), (pad, pad)],
                                     dimension_numbers=("NCHW", "OIHW", "NCHW"))
        s = g / jnp.sqrt(v + eps)
        y = y * s.reshape(1, -1, 1, 1) + (b_ - m * s).reshape(1, -1, 1, 1)
        return jnp.maximum(y, 0.0) if relu else y

    sp = conv_bn(comp, p['sg_conv_w'], p['sg_bn_gamma'], p['sg_bn_beta'],
                 p['sg_bn_mean'], p['sg_bn_var'], pad=3, relu=False)
    x2 = x1 * jax.nn.sigmoid(sp)

    r = conv_bn(x2, p['res_conv1_w'], p['res_bn1_gamma'], p['res_bn1_beta'],
                p['res_bn1_mean'], p['res_bn1_var'], pad=0, relu=True)
    r = conv_bn(r, p['res_conv2_w'], p['res_bn2_gamma'], p['res_bn2_beta'],
                p['res_bn2_mean'], p['res_bn2_var'], pad=1, relu=False)
    r = conv_bn(r, p['res_conv3_w'], p['res_bn3_gamma'], p['res_bn3_beta'],
                p['res_bn3_mean'], p['res_bn3_var'], pad=0, relu=False)
    y = jnp.maximum(r + x, 0.0)
    pooled = jnp.mean(y, axis=(2, 3))
    logits = pooled @ p['head_w'].T + p['head_b']
    return logits, x2


# --------------------------------------------------------------------------- params
def init_params(key, *, C, H, W, tab_dim, num_classes, reduction_ratio=16):
    R = max(C // reduction_ratio, 1)
    HW = H * W
    C4 = C // 4
    ks = iter(jax.random.split(key, 48))

    def lin_w(o, i):
        return jax.random.normal(next(ks), (o, i), jnp.float32) * (0.5 / math.sqrt(i))

    def vec(o, s=0.1):
        return jax.random.normal(next(ks), (o,), jnp.float32) * s

    def conv_w(o, i, k):
        return jax.random.normal(next(ks), (o, i, k, k), jnp.float32) * (0.5 / math.sqrt(i * k * k))

    def bn(o):
        return dict(gamma=jax.random.uniform(next(ks), (o,), jnp.float32, 0.5, 1.5),
                    beta=vec(o), mean=vec(o),
                    var=jax.random.uniform(next(ks), (o,), jnp.float32, 0.5, 1.5))

    p = {}
    p['cg_fc1_w'], p['cg_fc1_b'] = lin_w(R, C), vec(R)
    p['cg_fc2_w'], p['cg_fc2_b'] = lin_w(C, R), vec(C)
    p['cg_tab_fc1_w'], p['cg_tab_fc1_b'] = lin_w(R, tab_dim), vec(R)
    p['cg_tab_fc2_w'], p['cg_tab_fc2_b'] = lin_w(C, R), vec(C)
    p['sg_tab_fc1_w'], p['sg_tab_fc1_b'] = lin_w(HW // 2, tab_dim), vec(HW // 2)
    p['sg_tab_fc2_w'], p['sg_tab_fc2_b'] = lin_w(HW, HW // 2), vec(HW)
    p['sg_conv_w'] = conv_w(1, 3, 7)
    for k_, v_ in bn(1).items():
        p['sg_bn_' + k_] = v_
    p['res_conv1_w'] = conv_w(C4, C, 1)
    for k_, v_ in bn(C4).items():
        p['res_bn1_' + k_] = v_
    p['res_conv2_w'] = conv_w(C4, C4, 3)
    for k_, v_ in bn(C4).items():
        p['res_bn2_' + k_] = v_
    p['res_conv3_w'] = conv_w(C, C4, 1)
    for k_, v_ in bn(C).items():
        p['res_bn3_' + k_] = v_
    p['head_w'], p['head_b'] = lin_w(num_classes, C), vec(num_classes)
    return p


# ----------------------------------------------------------------------------- main
if __name__ == "__main__":
    key = jax.random.PRNGKey(0)
    k_x, k_t, k_p = jax.random.split(key, 3)

    # TabAttention_block(input_dim=(C, H, W, F=1), tab_dim) + residual bottleneck + head.
    B, C, H, W = 2, 32, 8, 8
    TAB_DIM, NUM_CLASSES, RED = 6, 4, 16

    x_im = jax.random.normal(k_x, (B, C, H, W), jnp.float32)   # post-encoder feature map
    tab = jax.random.normal(k_t, (B, 1, TAB_DIM), jnp.float32)
    params = init_params(k_p, C=C, H=H, W=W, tab_dim=TAB_DIM,
                         num_classes=NUM_CLASSES, reduction_ratio=RED)

    # one-time weight prep happens here (outside the measured forward path)
    forward = jax.jit(make_tab_attention(params, C=C, H=H, W=W,
                                         tab_dim=TAB_DIM, num_classes=NUM_CLASSES))
    logits, block_out = jax.block_until_ready(forward(x_im, tab))

    ref_logits, ref_block = reference_forward(x_im, tab, params)

    assert logits.shape == (B, NUM_CLASSES)
    assert block_out.shape == (B, C, H, W)
    # gating path runs fully in f32 -> tight check on the attention block output
    assert jnp.allclose(block_out, ref_block, atol=1e-3, rtol=1e-3), "TabAttention block mismatch"
    # residual convs use bf16 MXU operands (f32 accumulation) -> looser tolerance on logits
    assert jnp.allclose(logits, ref_logits, atol=3e-2, rtol=3e-2), "logits mismatch"

    print("KERNEL_OK")
</pallas_src>

<mosaic_0001>
module attributes {stable_mosaic.version = 11 : i64} {
  func.func @_fused_kernel(%arg0: i32, %arg1: memref<1x64x128xf32, #tpu.memory_space<vmem>>, %arg2: memref<1x1x128xf32, #tpu.memory_space<vmem>>, %arg3: memref<1x128x1xf32, #tpu.memory_space<vmem>>, %arg4: memref<128x128xf32, #tpu.memory_space<vmem>>, %arg5: memref<1x128xf32, #tpu.memory_space<vmem>>, %arg6: memref<128x128xf32, #tpu.memory_space<vmem>>, %arg7: memref<1x128xf32, #tpu.memory_space<vmem>>, %arg8: memref<128x128xf32, #tpu.memory_space<vmem>>, %arg9: memref<1x128xf32, #tpu.memory_space<vmem>>, %arg10: memref<128x128xf32, #tpu.memory_space<vmem>>, %arg11: memref<1x128xf32, #tpu.memory_space<vmem>>, %arg12: memref<32x128xf32, #tpu.memory_space<vmem>>, %arg13: memref<64x128xf32, #tpu.memory_space<vmem>>, %arg14: memref<64x32xf32, #tpu.memory_space<vmem>>, %arg15: memref<64x1xf32, #tpu.memory_space<vmem>>, %arg16: memref<128x128xbf16, #tpu.memory_space<vmem>>, %arg17: memref<1x128xf32, #tpu.memory_space<vmem>>, %arg18: memref<9x128x128xbf16, #tpu.memory_space<vmem>>, %arg19: memref<1x128xf32, #tpu.memory_space<vmem>>, %arg20: memref<128x128xbf16, #tpu.memory_space<vmem>>, %arg21: memref<1x128xf32, #tpu.memory_space<vmem>>, %arg22: memref<128x128xf32, #tpu.memory_space<vmem>>, %arg23: memref<1x128xf32, #tpu.memory_space<vmem>>, %arg24: memref<1x1x128xf32, #tpu.memory_space<vmem>>, %arg25: memref<1x64x128xf32, #tpu.memory_space<vmem>>, %arg26: memref<10x10x128xf32, #tpu.memory_space<vmem>>) attributes {dimension_semantics = [#tpu.dimension_semantics<parallel>], iteration_bounds = array<i64: 2>, scalar_prefetch = 0 : i64, scratch_operands = 1 : i64, tpu.core_type = #tpu.core_type<tc>, window_params = [{transform_indices = @transform_0, window_bounds = array<i64: 1, 64, 128>}, {transform_indices = @transform_1, window_bounds = array<i64: 1, 1, 128>}, {transform_indices = @transform_2, window_bounds = array<i64: 1, 128, 1>}, {pipeline_mode = #tpu.pipeline_mode<synchronous>, transform_indices = @transform_3, window_bounds = array<i64: 128, 128>}, {pipeline_mode = #tpu.pipeline_mode<synchronous>, transform_indices = @transform_4, window_bounds = array<i64: 1, 128>}, {pipeline_mode = #tpu.pipeline_mode<synchronous>, transform_indices = @transform_5, window_bounds = array<i64: 128, 128>}, {pipeline_mode = #tpu.pipeline_mode<synchronous>, transform_indices = @transform_6, window_bounds = array<i64: 1, 128>}, {pipeline_mode = #tpu.pipeline_mode<synchronous>, transform_indices = @transform_7, window_bounds = array<i64: 128, 128>}, {pipeline_mode = #tpu.pipeline_mode<synchronous>, transform_indices = @transform_8, window_bounds = array<i64: 1, 128>}, {pipeline_mode = #tpu.pipeline_mode<synchronous>, transform_indices = @transform_9, window_bounds = array<i64: 128, 128>}, {pipeline_mode = #tpu.pipeline_mode<synchronous>, transform_indices = @transform_10, window_bounds = array<i64: 1, 128>}, {pipeline_mode = #tpu.pipeline_mode<synchronous>, transform_indices = @transform_11, window_bounds = array<i64: 32, 128>}, {pipeline_mode = #tpu.pipeline_mode<synchronous>, transform_indices = @transform_12, window_bounds = array<i64: 64, 128>}, {pipeline_mode = #tpu.pipeline_mode<synchronous>, transform_indices = @transform_13, window_bounds = array<i64: 64, 32>}, {pipeline_mode = #tpu.pipeline_mode<synchronous>, transform_indices = @transform_14, window_bounds = array<i64: 64, 1>}, {pipeline_mode = #tpu.pipeline_mode<synchronous>, transform_indices = @transform_15, window_bounds = array<i64: 128, 128>}, {pipeline_mode = #tpu.pipeline_mode<synchronous>, transform_indices = @transform_16, window_bounds = array<i64: 1, 128>}, {pipeline_mode = #tpu.pipeline_mode<synchronous>, transform_indices = @transform_17, window_bounds = array<i64: 9, 128, 128>}, {pipeline_mode = #tpu.pipeline_mode<synchronous>, transform_indices = @transform_18, window_bounds = array<i64: 1, 128>}, {pipeline_mode = #tpu.pipeline_mode<synchronous>, transform_indices = @transform_19, window_bounds = array<i64: 128, 128>}, {pipeline_mode = #tpu.pipeline_mode<synchronous>, transform_indices = @transform_20, window_bounds = array<i64: 1, 128>}, {pipeline_mode = #tpu.pipeline_mode<synchronous>, transform_indices = @transform_21, window_bounds = array<i64: 128, 128>}, {pipeline_mode = #tpu.pipeline_mode<synchronous>, transform_indices = @transform_22, window_bounds = array<i64: 1, 128>}, {transform_indices = @transform_23, window_bounds = array<i64: 1, 1, 128>}, {transform_indices = @transform_24, window_bounds = array<i64: 1, 64, 128>}]} {
    %c0 = arith.constant 0 : index
    %c0_0 = arith.constant 0 : index
    %c0_1 = arith.constant 0 : index
    %0 = vector.load %arg1[%c0, %c0_0, %c0_1] : memref<1x64x128xf32, #tpu.memory_space<vmem>>, vector<1x64x128xf32>
    %1 = vector.shape_cast %0 : vector<1x64x128xf32> to vector<64x128xf32>
    %cst = arith.constant dense<0.000000e+00> : vector<128xf32>
    %2 = vector.multi_reduction <add>, %1, %cst [0] : vector<64x128xf32> to vector<128xf32>
    %3 = vector.shape_cast %2 : vector<128xf32> to vector<1x128xf32>
    %cst_2 = arith.constant 6.400000e+01 : f32
    %4 = vector.broadcast %cst_2 : f32 to vector<1x128xf32>
    %5 = arith.divf %3, %4 : vector<1x128xf32>
    %cst_3 = arith.constant dense<0xFF800000> : vector<128xf32>
    %6 = vector.multi_reduction <maximumf>, %1, %cst_3 [0] : vector<64x128xf32> to vector<128xf32>
    %7 = vector.shape_cast %6 : vector<128xf32> to vector<1x128xf32>
    %c0_4 = arith.constant 0 : index
    %c0_5 = arith.constant 0 : index
    %c0_6 = arith.constant 0 : index
    %8 = vector.load %arg2[%c0_4, %c0_5, %c0_6] : memref<1x1x128xf32, #tpu.memory_space<vmem>>, vector<1x1x128xf32>
    %9 = vector.shape_cast %8 : vector<1x1x128xf32> to vector<1x128xf32>
    %c0_7 = arith.constant 0 : index
    %c0_8 = arith.constant 0 : index
    %10 = vector.load %arg8[%c0_7, %c0_8] : memref<128x128xf32, #tpu.memory_space<vmem>>, vector<128x128xf32>
    %cst_9 = arith.constant dense<0.000000e+00> : vector<1x128xf32>
    %11 = tpu.matmul %9, %10, %cst_9 {dimension_numbers = #tpu.dot_dimension_numbers<[1], [0], [0], [1], [0, 0, 1, 1], [], []>} : vector<1x128xf32>, vector<128x128xf32>, vector<1x128xf32> -> vector<1x128xf32>
    %c0_10 = arith.constant 0 : index
    %c0_11 = arith.constant 0 : index
    %12 = vector.load %arg9[%c0_10, %c0_11] : memref<1x128xf32, #tpu.memory_space<vmem>>, vector<1x128xf32>
    %13 = arith.addf %11, %12 : vector<1x128xf32>
    %cst_12 = arith.constant 0.000000e+00 : f32
    %14 = vector.broadcast %cst_12 : f32 to vector<1x128xf32>
    %15 = arith.maximumf %13, %14 : vector<1x128xf32>
    %c0_13 = arith.constant 0 : index
    %c0_14 = arith.constant 0 : index
    %16 = vector.load %arg10[%c0_13, %c0_14] : memref<128x128xf32, #tpu.memory_space<vmem>>, vector<128x128xf32>
    %cst_15 = arith.constant dense<0.000000e+00> : vector<1x128xf32>
    %17 = tpu.matmul %15, %16, %cst_15 {dimension_numbers = #tpu.dot_dimension_numbers<[1], [0], [0], [1], [0, 0, 1, 1], [], []>} : vector<1x128xf32>, vector<128x128xf32>, vector<1x128xf32> -> vector<1x128xf32>
    %c0_16 = arith.constant 0 : index
    %c0_17 = arith.constant 0 : index
    %18 = vector.load %arg11[%c0_16, %c0_17] : memref<1x128xf32, #tpu.memory_space<vmem>>, vector<1x128xf32>
    %19 = arith.addf %17, %18 : vector<1x128xf32>
    %20 = tpu.concatenate %5, %7, %19 in 0 : vector<1x128xf32>, vector<1x128xf32>, vector<1x128xf32> -> vector<3x128xf32>
    %c0_18 = arith.constant 0 : index
    %c0_19 = arith.constant 0 : index
    %21 = vector.load %arg4[%c0_18, %c0_19] : memref<128x128xf32, #tpu.memory_space<vmem>>, vector<128x128xf32>
    %cst_20 = arith.constant dense<0.000000e+00> : vector<3x128xf32>
    %22 = tpu.matmul %20, %21, %cst_20 {dimension_numbers = #tpu.dot_dimension_numbers<[1], [0], [0], [1], [0, 0, 1, 1], [], []>} : vector<3x128xf32>, vector<128x128xf32>, vector<3x128xf32> -> vector<3x128xf32>
    %c0_21 = arith.constant 0 : index
    %c0_22 = arith.constant 0 : index
    %23 = vector.load %arg5[%c0_21, %c0_22] : memref<1x128xf32, #tpu.memory_space<vmem>>, vector<1x128xf32>
    %24 = vector.broadcast %23 : vector<1x128xf32> to vector<3x128xf32>
    %25 = arith.addf %22, %24 : vector<3x128xf32>
    %cst_23 = arith.constant 0.000000e+00 : f32
    %26 = vector.broadcast %cst_23 : f32 to vector<3x128xf32>
    %27 = arith.maximumf %25, %26 : vector<3x128xf32>
    %c0_24 = arith.constant 0 : index
    %c0_25 = arith.constant 0 : index
    %28 = vector.load %arg6[%c0_24, %c0_25] : memref<128x128xf32, #tpu.memory_space<vmem>>, vector<128x128xf32>
    %cst_26 = arith.constant dense<0.000000e+00> : vector<3x128xf32>
    %29 = tpu.matmul %27, %28, %cst_26 {dimension_numbers = #tpu.dot_dimension_numbers<[1], [0], [0], [1], [0, 0, 1, 1], [], []>} : vector<3x128xf32>, vector<128x128xf32>, vector<3x128xf32> -> vector<3x128xf32>
    %c0_27 = arith.constant 0 : index
    %c0_28 = arith.constant 0 : index
    %30 = vector.load %arg7[%c0_27, %c0_28] : memref<1x128xf32, #tpu.memory_space<vmem>>, vector<1x128xf32>
    %31 = vector.broadcast %30 : vector<1x128xf32> to vector<3x128xf32>
    %32 = arith.addf %29, %31 : vector<3x128xf32>
    %cst_29 = arith.constant dense<0.000000e+00> : vector<128xf32>
    %33 = vector.multi_reduction <add>, %32, %cst_29 [0] : vector<3x128xf32> to vector<128xf32>
    %34 = vector.shape_cast %33 : vector<128xf32> to vector<1x128xf32>
    %cst_30 = arith.constant 0.000000e+00 : f32
    %35 = vector.broadcast %cst_30 : f32 to vector<1x128xf32>
    %36 = arith.subf %35, %34 : vector<1x128xf32>
    %37 = math.exp %36 : vector<1x128xf32>
    %cst_31 = arith.constant 1.000000e+00 : f32
    %38 = vector.broadcast %cst_31 : f32 to vector<1x128xf32>
    %39 = arith.addf %38, %37 : vector<1x128xf32>
    %cst_32 = arith.constant 1.000000e+00 : f32
    %40 = vector.broadcast %cst_32 : f32 to vector<1x128xf32>
    %41 = arith.divf %40, %39 : vector<1x128xf32>
    %42 = vector.broadcast %41 : vector<1x128xf32> to vector<64x128xf32>
    %43 = arith.mulf %1, %42 : vector<64x128xf32>
    %44 = tpu.iota {dimensions = array<i32: 1>} : vector<64x128xi32>
    %c32_i32 = arith.constant 32 : i32
    %45 = vector.broadcast %c32_i32 : i32 to vector<64x128xi32>
    %46 = arith.cmpi slt, %44, %45 : vector<64x128xi32>
    %cst_33 = arith.constant -1.000000e+30 : f32
    %47 = vector.broadcast %cst_33 : f32 to vector<64x128xf32>
    %48 = arith.select %46, %43, %47 : vector<64x128xi1>, vector<64x128xf32>
    %cst_34 = arith.constant dense<0xFF800000> : vector<64xf32>
    %49 = vector.multi_reduction <maximumf>, %48, %cst_34 [1] : vector<64x128xf32> to vector<64xf32>
    %50 = vector.shape_cast %49 : vector<64xf32> to vector<64x1xf32>
    %cst_35 = arith.constant dense<0.000000e+00> : vector<64xf32>
    %51 = vector.multi_reduction <add>, %43, %cst_35 [1] : vector<64x128xf32> to vector<64xf32>
    %52 = vector.shape_cast %51 : vector<64xf32> to vector<64x1xf32>
    %cst_36 = arith.constant 3.125000e-02 : f32
    %53 = vector.broadcast %cst_36 : f32 to vector<64x1xf32>
    %54 = arith.mulf %52, %53 : vector<64x1xf32>
    %c0_37 = arith.constant 0 : index
    %c0_38 = arith.constant 0 : index
    %55 = vector.load %arg12[%c0_37, %c0_38] : memref<32x128xf32, #tpu.memory_space<vmem>>, vector<32x128xf32>
    %c0_39 = arith.constant 0 : index
    %c0_40 = arith.constant 0 : index
    %c0_41 = arith.constant 0 : index
    %56 = vector.load %arg3[%c0_39, %c0_40, %c0_41] : memref<1x128x1xf32, #tpu.memory_space<vmem>>, vector<1x128x1xf32>
    %57 = vector.shape_cast %56 : vector<1x128x1xf32> to vector<128x1xf32>
    %cst_42 = arith.constant dense<0.000000e+00> : vector<32x1xf32>
    %58 = tpu.matmul %55, %57, %cst_42 {dimension_numbers = #tpu.dot_dimension_numbers<[1], [0], [0], [1], [0, 0, 1, 1], [], []>} : vector<32x128xf32>, vector<128x1xf32>, vector<32x1xf32> -> vector<32x1xf32>
    %cst_43 = arith.constant 0.000000e+00 : f32
    %59 = vector.broadcast %cst_43 : f32 to vector<32x1xf32>
    %60 = arith.maximumf %58, %59 : vector<32x1xf32>
    %61 = tpu.concatenate %50, %54 in 0 : vector<64x1xf32>, vector<64x1xf32> -> vector<128x1xf32>
    %c0_44 = arith.constant 0 : index
    %c0_45 = arith.constant 0 : index
    %62 = vector.load %arg13[%c0_44, %c0_45] : memref<64x128xf32, #tpu.memory_space<vmem>>, vector<64x128xf32>
    %cst_46 = arith.constant dense<0.000000e+00> : vector<64x1xf32>
    %63 = tpu.matmul %62, %61, %cst_46 {dimension_numbers = #tpu.dot_dimension_numbers<[1], [0], [0], [1], [0, 0, 1, 1], [], []>} : vector<64x128xf32>, vector<128x1xf32>, vector<64x1xf32> -> vector<64x1xf32>
    %c0_47 = arith.constant 0 : index
    %c0_48 = arith.constant 0 : index
    %64 = vector.load %arg14[%c0_47, %c0_48] : memref<64x32xf32, #tpu.memory_space<vmem>>, vector<64x32xf32>
    %cst_49 = arith.constant dense<0.000000e+00> : vector<64x1xf32>
    %65 = tpu.matmul %64, %60, %cst_49 {dimension_numbers = #tpu.dot_dimension_numbers<[1], [0], [0], [1], [0, 0, 1, 1], [], []>} : vector<64x32xf32>, vector<32x1xf32>, vector<64x1xf32> -> vector<64x1xf32>
    %66 = arith.addf %63, %65 : vector<64x1xf32>
    %c0_50 = arith.constant 0 : index
    %c0_51 = arith.constant 0 : index
    %67 = vector.load %arg15[%c0_50, %c0_51] : memref<64x1xf32, #tpu.memory_space<vmem>>, vector<64x1xf32>
    %68 = arith.addf %66, %67 : vector<64x1xf32>
    %cst_52 = arith.constant 0.000000e+00 : f32
    %69 = vector.broadcast %cst_52 : f32 to vector<64x1xf32>
    %70 = arith.subf %69, %68 : vector<64x1xf32>
    %71 = math.exp %70 : vector<64x1xf32>
    %cst_53 = arith.constant 1.000000e+00 : f32
    %72 = vector.broadcast %cst_53 : f32 to vector<64x1xf32>
    %73 = arith.addf %72, %71 : vector<64x1xf32>
    %cst_54 = arith.constant 1.000000e+00 : f32
    %74 = vector.broadcast %cst_54 : f32 to vector<64x1xf32>
    %75 = arith.divf %74, %73 : vector<64x1xf32>
    %76 = vector.broadcast %75 : vector<64x1xf32> to vector<64x128xf32>
    %77 = arith.mulf %43, %76 : vector<64x128xf32>
    %c0_55 = arith.constant 0 : index
    %c0_56 = arith.constant 0 : index
    %c0_57 = arith.constant 0 : index
    %78 = vector.load %arg25[%c0_55, %c0_56, %c0_57] : memref<1x64x128xf32, #tpu.memory_space<vmem>>, vector<1x64x128xf32>
    %79 = vector.shape_cast %78 : vector<1x64x128xf32> to vector<64x128xf32>
    %80 = vector.shape_cast %77 : vector<64x128xf32> to vector<1x64x128xf32>
    tpu.vector_store %arg25[%c0_55, %c0_56, %c0_57], %80 {strides = array<i32>} : memref<1x64x128xf32, #tpu.memory_space<vmem>>, vector<1x64x128xf32>,
    %81 = arith.truncf %77 : vector<64x128xf32> to vector<64x128xbf16>
    %c0_58 = arith.constant 0 : index
    %c0_59 = arith.constant 0 : index
    %82 = vector.load %arg16[%c0_58, %c0_59] : memref<128x128xbf16, #tpu.memory_space<vmem>>, vector<128x128xbf16>
    %cst_60 = arith.constant dense<0.000000e+00> : vector<64x128xf32>
    %83 = tpu.matmul %81, %82, %cst_60 {dimension_numbers = #tpu.dot_dimension_numbers<[1], [0], [0], [1], [0, 0, 1, 1], [], []>} : vector<64x128xbf16>, vector<128x128xbf16>, vector<64x128xf32> -> vector<64x128xf32>
    %c0_61 = arith.constant 0 : index
    %c0_62 = arith.constant 0 : index
    %84 = vector.load %arg17[%c0_61, %c0_62] : memref<1x128xf32, #tpu.memory_space<vmem>>, vector<1x128xf32>
    %85 = vector.broadcast %84 : vector<1x128xf32> to vector<64x128xf32>
    %86 = arith.addf %83, %85 : vector<64x128xf32>
    %cst_63 = arith.constant 0.000000e+00 : f32
    %87 = vector.broadcast %cst_63 : f32 to vector<64x128xf32>
    %88 = arith.maximumf %86, %87 : vector<64x128xf32>
    %cst_64 = arith.constant 0.000000e+00 : f32
    %89 = vector.broadcast %cst_64 : f32 to vector<10x10x128xf32>
    %c0_65 = arith.constant 0 : index
    %c0_66 = arith.constant 0 : index
    %c0_67 = arith.constant 0 : index
    %90 = vector.load %arg26[%c0_65, %c0_66, %c0_67] : memref<10x10x128xf32, #tpu.memory_space<vmem>>, vector<10x10x128xf32>
    tpu.vector_store %arg26[%c0_65, %c0_66, %c0_67], %89 {strides = array<i32>} : memref<10x10x128xf32, #tpu.memory_space<vmem>>, vector<10x10x128xf32>,
    %91 = vector.shape_cast %88 : vector<64x128xf32> to vector<8x8x128xf32>
    %c1 = arith.constant 1 : index
    %c1_68 = arith.constant 1 : index
    %c0_69 = arith.constant 0 : index
    %92 = vector.load %arg26[%c1, %c1_68, %c0_69] : memref<10x10x128xf32, #tpu.memory_space<vmem>>, vector<8x8x128xf32>
    tpu.vector_store %arg26[%c1, %c1_68, %c0_69], %91 {strides = array<i32>} : memref<10x10x128xf32, #tpu.memory_space<vmem>>, vector<8x8x128xf32>,
    %cst_70 = arith.constant 0.000000e+00 : f32
    %93 = vector.broadcast %cst_70 : f32 to vector<64x128xf32>
    %c0_71 = arith.constant 0 : index
    %c0_72 = arith.constant 0 : index
    %c0_73 = arith.constant 0 : index
    %94 = vector.load %arg26[%c0_71, %c0_72, %c0_73] : memref<10x10x128xf32, #tpu.memory_space<vmem>>, vector<8x8x128xf32>
    %95 = vector.shape_cast %94 : vector<8x8x128xf32> to vector<64x128xf32>
    %96 = arith.truncf %95 : vector<64x128xf32> to vector<64x128xbf16>
    %c0_74 = arith.constant 0 : index
    %c0_75 = arith.constant 0 : index
    %c0_76 = arith.constant 0 : index
    %97 = vector.load %arg18[%c0_74, %c0_75, %c0_76] : memref<9x128x128xbf16, #tpu.memory_space<vmem>>, vector<1x128x128xbf16>
    %98 = vector.shape_cast %97 : vector<1x128x128xbf16> to vector<128x128xbf16>
    %cst_77 = arith.constant dense<0.000000e+00> : vector<64x128xf32>
    %99 = tpu.matmul %96, %98, %cst_77 {dimension_numbers = #tpu.dot_dimension_numbers<[1], [0], [0], [1], [0, 0, 1, 1], [], []>} : vector<64x128xbf16>, vector<128x128xbf16>, vector<64x128xf32> -> vector<64x128xf32>
    %100 = arith.addf %93, %99 : vector<64x128xf32>
    %c0_78 = arith.constant 0 : index
    %c1_79 = arith.constant 1 : index
    %c0_80 = arith.constant 0 : index
    %101 = vector.load %arg26[%c0_78, %c1_79, %c0_80] : memref<10x10x128xf32, #tpu.memory_space<vmem>>, vector<8x8x128xf32>
    %102 = vector.shape_cast %101 : vector<8x8x128xf32> to vector<64x128xf32>
    %103 = arith.truncf %102 : vector<64x128xf32> to vector<64x128xbf16>
    %c1_81 = arith.constant 1 : index
    %c0_82 = arith.constant 0 : index
    %c0_83 = arith.constant 0 : index
    %104 = vector.load %arg18[%c1_81, %c0_82, %c0_83] : memref<9x128x128xbf16, #tpu.memory_space<vmem>>, vector<1x128x128xbf16>
    %105 = vector.shape_cast %104 : vector<1x128x128xbf16> to vector<128x128xbf16>
    %cst_84 = arith.constant dense<0.000000e+00> : vector<64x128xf32>
    %106 = tpu.matmul %103, %105, %cst_84 {dimension_numbers = #tpu.dot_dimension_numbers<[1], [0], [0], [1], [0, 0, 1, 1], [], []>} : vector<64x128xbf16>, vector<128x128xbf16>, vector<64x128xf32> -> vector<64x128xf32>
    %107 = arith.addf %100, %106 : vector<64x128xf32>
    %c0_85 = arith.constant 0 : index
    %c2 = arith.constant 2 : index
    %c0_86 = arith.constant 0 : index
    %108 = vector.load %arg26[%c0_85, %c2, %c0_86] : memref<10x10x128xf32, #tpu.memory_space<vmem>>, vector<8x8x128xf32>
    %109 = vector.shape_cast %108 : vector<8x8x128xf32> to vector<64x128xf32>
    %110 = arith.truncf %109 : vector<64x128xf32> to vector<64x128xbf16>
    %c2_87 = arith.constant 2 : index
    %c0_88 = arith.constant 0 : index
    %c0_89 = arith.constant 0 : index
    %111 = vector.load %arg18[%c2_87, %c0_88, %c0_89] : memref<9x128x128xbf16, #tpu.memory_space<vmem>>, vector<1x128x128xbf16>
    %112 = vector.shape_cast %111 : vector<1x128x128xbf16> to vector<128x128xbf16>
    %cst_90 = arith.constant dense<0.000000e+00> : vector<64x128xf32>
    %113 = tpu.matmul %110, %112, %cst_90 {dimension_numbers = #tpu.dot_dimension_numbers<[1], [0], [0], [1], [0, 0, 1, 1], [], []>} : vector<64x128xbf16>, vector<128x128xbf16>, vector<64x128xf32> -> vector<64x128xf32>
    %114 = arith.addf %107, %113 : vector<64x128xf32>
    %c1_91 = arith.constant 1 : index
    %c0_92 = arith.constant 0 : index
    %c0_93 = arith.constant 0 : index
    %115 = vector.load %arg26[%c1_91, %c0_92, %c0_93] : memref<10x10x128xf32, #tpu.memory_space<vmem>>, vector<8x8x128xf32>
    %116 = vector.shape_cast %115 : vector<8x8x128xf32> to vector<64x128xf32>
    %117 = arith.truncf %116 : vector<64x128xf32> to vector<64x128xbf16>
    %c3 = arith.constant 3 : index
    %c0_94 = arith.constant 0 : index
    %c0_95 = arith.constant 0 : index
    %118 = vector.load %arg18[%c3, %c0_94, %c0_95] : memref<9x128x128xbf16, #tpu.memory_space<vmem>>, vector<1x128x128xbf16>
    %119 = vector.shape_cast %118 : vector<1x128x128xbf16> to vector<128x128xbf16>
    %cst_96 = arith.constant dense<0.000000e+00> : vector<64x128xf32>
    %120 = tpu.matmul %117, %119, %cst_96 {dimension_numbers = #tpu.dot_dimension_numbers<[1], [0], [0], [1], [0, 0, 1, 1], [], []>} : vector<64x128xbf16>, vector<128x128xbf16>, vector<64x128xf32> -> vector<64x128xf32>
    %121 = arith.addf %114, %120 : vector<64x128xf32>
    %c1_97 = arith.constant 1 : index
    %c1_98 = arith.constant 1 : index
    %c0_99 = arith.constant 0 : index
    %122 = vector.load %arg26[%c1_97, %c1_98, %c0_99] : memref<10x10x128xf32, #tpu.memory_space<vmem>>, vector<8x8x128xf32>
    %123 = vector.shape_cast %122 : vector<8x8x128xf32> to vector<64x128xf32>
    %124 = arith.truncf %123 : vector<64x128xf32> to vector<64x128xbf16>
    %c4 = arith.constant 4 : index
    %c0_100 = arith.constant 0 : index
    %c0_101 = arith.constant 0 : index
    %125 = vector.load %arg18[%c4, %c0_100, %c0_101] : memref<9x128x128xbf16, #tpu.memory_space<vmem>>, vector<1x128x128xbf16>
    %126 = vector.shape_cast %125 : vector<1x128x128xbf16> to vector<128x128xbf16>
    %cst_102 = arith.constant dense<0.000000e+00> : vector<64x128xf32>
    %127 = tpu.matmul %124, %126, %cst_102 {dimension_numbers = #tpu.dot_dimension_numbers<[1], [0], [0], [1], [0, 0, 1, 1], [], []>} : vector<64x128xbf16>, vector<128x128xbf16>, vector<64x128xf32> -> vector<64x128xf32>
    %128 = arith.addf %121, %127 : vector<64x128xf32>
    %c1_103 = arith.constant 1 : index
    %c2_104 = arith.constant 2 : index
    %c0_105 = arith.constant 0 : index
    %129 = vector.load %arg26[%c1_103, %c2_104, %c0_105] : memref<10x10x128xf32, #tpu.memory_space<vmem>>, vector<8x8x128xf32>
    %130 = vector.shape_cast %129 : vector<8x8x128xf32> to vector<64x128xf32>
    %131 = arith.truncf %130 : vector<64x128xf32> to vector<64x128xbf16>
    %c5 = arith.constant 5 : index
    %c0_106 = arith.constant 0 : index
    %c0_107 = arith.constant 0 : index
    %132 = vector.load %arg18[%c5, %c0_106, %c0_107] : memref<9x128x128xbf16, #tpu.memory_space<vmem>>, vector<1x128x128xbf16>
    %133 = vector.shape_cast %132 : vector<1x128x128xbf16> to vector<128x128xbf16>
    %cst_108 = arith.constant dense<0.000000e+00> : vector<64x128xf32>
    %134 = tpu.matmul %131, %133, %cst_108 {dimension_numbers = #tpu.dot_dimension_numbers<[1], [0], [0], [1], [0, 0, 1, 1], [], []>} : vector<64x128xbf16>, vector<128x128xbf16>, vector<64x128xf32> -> vector<64x128xf32>
    %135 = arith.addf %128, %134 : vector<64x128xf32>
    %c2_109 = arith.constant 2 : index
    %c0_110 = arith.constant 0 : index
    %c0_111 = arith.constant 0 : index
    %136 = vector.load %arg26[%c2_109, %c0_110, %c0_111] : memref<10x10x128xf32, #tpu.memory_space<vmem>>, vector<8x8x128xf32>
    %137 = vector.shape_cast %136 : vector<8x8x128xf32> to vector<64x128xf32>
    %138 = arith.truncf %137 : vector<64x128xf32> to vector<64x128xbf16>
    %c6 = arith.constant 6 : index
    %c0_112 = arith.constant 0 : index
    %c0_113 = arith.constant 0 : index
    %139 = vector.load %arg18[%c6, %c0_112, %c0_113] : memref<9x128x128xbf16, #tpu.memory_space<vmem>>, vector<1x128x128xbf16>
    %140 = vector.shape_cast %139 : vector<1x128x128xbf16> to vector<128x128xbf16>
    %cst_114 = arith.constant dense<0.000000e+00> : vector<64x128xf32>
    %141 = tpu.matmul %138, %140, %cst_114 {dimension_numbers = #tpu.dot_dimension_numbers<[1], [0], [0], [1], [0, 0, 1, 1], [], []>} : vector<64x128xbf16>, vector<128x128xbf16>, vector<64x128xf32> -> vector<64x128xf32>
    %142 = arith.addf %135, %141 : vector<64x128xf32>
    %c2_115 = arith.constant 2 : index
    %c1_116 = arith.constant 1 : index
    %c0_117 = arith.constant 0 : index
    %143 = vector.load %arg26[%c2_115, %c1_116, %c0_117] : memref<10x10x128xf32, #tpu.memory_space<vmem>>, vector<8x8x128xf32>
    %144 = vector.shape_cast %143 : vector<8x8x128xf32> to vector<64x128xf32>
    %145 = arith.truncf %144 : vector<64x128xf32> to vector<64x128xbf16>
    %c7 = arith.constant 7 : index
    %c0_118 = arith.constant 0 : index
    %c0_119 = arith.constant 0 : index
    %146 = vector.load %arg18[%c7, %c0_118, %c0_119] : memref<9x128x128xbf16, #tpu.memory_space<vmem>>, vector<1x128x128xbf16>
    %147 = vector.shape_cast %146 : vector<1x128x128xbf16> to vector<128x128xbf16>
    %cst_120 = arith.constant dense<0.000000e+00> : vector<64x128xf32>
    %148 = tpu.matmul %145, %147, %cst_120 {dimension_numbers = #tpu.dot_dimension_numbers<[1], [0], [0], [1], [0, 0, 1, 1], [], []>} : vector<64x128xbf16>, vector<128x128xbf16>, vector<64x128xf32> -> vector<64x128xf32>
    %149 = arith.addf %142, %148 : vector<64x128xf32>
    %c2_121 = arith.constant 2 : index
    %c2_122 = arith.constant 2 : index
    %c0_123 = arith.constant 0 : index
    %150 = vector.load %arg26[%c2_121, %c2_122, %c0_123] : memref<10x10x128xf32, #tpu.memory_space<vmem>>, vector<8x8x128xf32>
    %151 = vector.shape_cast %150 : vector<8x8x128xf32> to vector<64x128xf32>
    %152 = arith.truncf %151 : vector<64x128xf32> to vector<64x128xbf16>
    %c8 = arith.constant 8 : index
    %c0_124 = arith.constant 0 : index
    %c0_125 = arith.constant 0 : index
    %153 = vector.load %arg18[%c8, %c0_124, %c0_125] : memref<9x128x128xbf16, #tpu.memory_space<vmem>>, vector<1x128x128xbf16>
    %154 = vector.shape_cast %153 : vector<1x128x128xbf16> to vector<128x128xbf16>
    %cst_126 = arith.constant dense<0.000000e+00> : vector<64x128xf32>
    %155 = tpu.matmul %152, %154, %cst_126 {dimension_numbers = #tpu.dot_dimension_numbers<[1], [0], [0], [1], [0, 0, 1, 1], [], []>} : vector<64x128xbf16>, vector<128x128xbf16>, vector<64x128xf32> -> vector<64x128xf32>
    %156 = arith.addf %149, %155 : vector<64x128xf32>
    %c0_127 = arith.constant 0 : index
    %c0_128 = arith.constant 0 : index
    %157 = vector.load %arg19[%c0_127, %c0_128] : memref<1x128xf32, #tpu.memory_space<vmem>>, vector<1x128xf32>
    %158 = vector.broadcast %157 : vector<1x128xf32> to vector<64x128xf32>
    %159 = arith.addf %156, %158 : vector<64x128xf32>
    %160 = arith.truncf %159 : vector<64x128xf32> to vector<64x128xbf16>
    %c0_129 = arith.constant 0 : index
    %c0_130 = arith.constant 0 : index
    %161 = vector.load %arg20[%c0_129, %c0_130] : memref<128x128xbf16, #tpu.memory_space<vmem>>, vector<128x128xbf16>
    %cst_131 = arith.constant dense<0.000000e+00> : vector<64x128xf32>
    %162 = tpu.matmul %160, %161, %cst_131 {dimension_numbers = #tpu.dot_dimension_numbers<[1], [0], [0], [1], [0, 0, 1, 1], [], []>} : vector<64x128xbf16>, vector<128x128xbf16>, vector<64x128xf32> -> vector<64x128xf32>
    %c0_132 = arith.constant 0 : index
    %c0_133 = arith.constant 0 : index
    %163 = vector.load %arg21[%c0_132, %c0_133] : memref<1x128xf32, #tpu.memory_space<vmem>>, vector<1x128xf32>
    %164 = vector.broadcast %163 : vector<1x128xf32> to vector<64x128xf32>
    %165 = arith.addf %162, %164 : vector<64x128xf32>
    %166 = arith.addf %165, %1 : vector<64x128xf32>
    %cst_134 = arith.constant 0.000000e+00 : f32
    %167 = vector.broadcast %cst_134 : f32 to vector<64x128xf32>
    %168 = arith.maximumf %166, %167 : vector<64x128xf32>
    %cst_135 = arith.constant dense<0.000000e+00> : vector<128xf32>
    %169 = vector.multi_reduction <add>, %168, %cst_135 [0] : vector<64x128xf32> to vector<128xf32>
    %170 = vector.shape_cast %169 : vector<128xf32> to vector<1x128xf32>
    %cst_136 = arith.constant 6.400000e+01 : f32
    %171 = vector.broadcast %cst_136 : f32 to vector<1x128xf32>
    %172 = arith.divf %170, %171 : vector<1x128xf32>
    %c0_137 = arith.constant 0 : index
    %c0_138 = arith.constant 0 : index
    %173 = vector.load %arg22[%c0_137, %c0_138] : memref<128x128xf32, #tpu.memory_space<vmem>>, vector<128x128xf32>
    %cst_139 = arith.constant dense<0.000000e+00> : vector<1x128xf32>
    %174 = tpu.matmul %172, %173, %cst_139 {dimension_numbers = #tpu.dot_dimension_numbers<[1], [0], [0], [1], [0, 0, 1, 1], [], []>} : vector<1x128xf32>, vector<128x128xf32>, vector<1x128xf32> -> vector<1x128xf32>
    %c0_140 = arith.constant 0 : index
    %c0_141 = arith.constant 0 : index
    %175 = vector.load %arg23[%c0_140, %c0_141] : memref<1x128xf32, #tpu.memory_space<vmem>>, vector<1x128xf32>
    %176 = arith.addf %174, %175 : vector<1x128xf32>
    %c0_142 = arith.constant 0 : index
    %c0_143 = arith.constant 0 : index
    %c0_144 = arith.constant 0 : index
    %177 = vector.load %arg24[%c0_142, %c0_143, %c0_144] : memref<1x1x128xf32, #tpu.memory_space<vmem>>, vector<1x1x128xf32>
    %178 = vector.shape_cast %177 : vector<1x1x128xf32> to vector<1x128xf32>
    %179 = vector.shape_cast %176 : vector<1x128xf32> to vector<1x1x128xf32>
    tpu.vector_store %arg24[%c0_142, %c0_143, %c0_144], %179 {strides = array<i32>} : memref<1x1x128xf32, #tpu.memory_space<vmem>>, vector<1x1x128xf32>,
    return
  }
  func.func @transform_0(%arg0: i32) -> (i32, i32, i32) {
    %c0_i32 = arith.constant 0 : i32
    %c0_i32_0 = arith.constant 0 : i32
    %c0_i32_1 = arith.constant 0 : i32
    return %arg0, %c0_i32, %c0_i32_0 : i32, i32, i32
  }
  func.func @transform_1(%arg0: i32) -> (i32, i32, i32) {
    %c0_i32 = arith.constant 0 : i32
    %c0_i32_0 = arith.constant 0 : i32
    %c0_i32_1 = arith.constant 0 : i32
    return %arg0, %c0_i32, %c0_i32_0 : i32, i32, i32
  }
  func.func @transform_2(%arg0: i32) -> (i32, i32, i32) {
    %c0_i32 = arith.constant 0 : i32
    %c0_i32_0 = arith.constant 0 : i32
    %c0_i32_1 = arith.constant 0 : i32
    return %arg0, %c0_i32, %c0_i32_0 : i32, i32, i32
  }
  func.func @transform_3(%arg0: i32) -> (i32, i32) {
    %c0_i32 = arith.constant 0 : i32
    %c0_i32_0 = arith.constant 0 : i32
    %c0_i32_1 = arith.constant 0 : i32
    return %c0_i32, %c0_i32_0 : i32, i32
  }
  func.func @transform_4(%arg0: i32) -> (i32, i32) {
    %c0_i32 = arith.constant 0 : i32
    %c0_i32_0 = arith.constant 0 : i32
    %c0_i32_1 = arith.constant 0 : i32
    return %c0_i32, %c0_i32_0 : i32, i32
  }
  func.func @transform_5(%arg0: i32) -> (i32, i32) {
    %c0_i32 = arith.constant 0 : i32
    %c0_i32_0 = arith.constant 0 : i32
    %c0_i32_1 = arith.constant 0 : i32
    return %c0_i32, %c0_i32_0 : i32, i32
  }
  func.func @transform_6(%arg0: i32) -> (i32, i32) {
    %c0_i32 = arith.constant 0 : i32
    %c0_i32_0 = arith.constant 0 : i32
    %c0_i32_1 = arith.constant 0 : i32
    return %c0_i32, %c0_i32_0 : i32, i32
  }
  func.func @transform_7(%arg0: i32) -> (i32, i32) {
    %c0_i32 = arith.constant 0 : i32
    %c0_i32_0 = arith.constant 0 : i32
    %c0_i32_1 = arith.constant 0 : i32
    return %c0_i32, %c0_i32_0 : i32, i32
  }
  func.func @transform_8(%arg0: i32) -> (i32, i32) {
    %c0_i32 = arith.constant 0 : i32
    %c0_i32_0 = arith.constant 0 : i32
    %c0_i32_1 = arith.constant 0 : i32
    return %c0_i32, %c0_i32_0 : i32, i32
  }
  func.func @transform_9(%arg0: i32) -> (i32, i32) {
    %c0_i32 = arith.constant 0 : i32
    %c0_i32_0 = arith.constant 0 : i32
    %c0_i32_1 = arith.constant 0 : i32
    return %c0_i32, %c0_i32_0 : i32, i32
  }
  func.func @transform_10(%arg0: i32) -> (i32, i32) {
    %c0_i32 = arith.constant 0 : i32
    %c0_i32_0 = arith.constant 0 : i32
    %c0_i32_1 = arith.constant 0 : i32
    return %c0_i32, %c0_i32_0 : i32, i32
  }
  func.func @transform_11(%arg0: i32) -> (i32, i32) {
    %c0_i32 = arith.constant 0 : i32
    %c0_i32_0 = arith.constant 0 : i32
    %c0_i32_1 = arith.constant 0 : i32
    return %c0_i32, %c0_i32_0 : i32, i32
  }
  func.func @transform_12(%arg0: i32) -> (i32, i32) {
    %c0_i32 = arith.constant 0 : i32
    %c0_i32_0 = arith.constant 0 : i32
    %c0_i32_1 = arith.constant 0 : i32
    return %c0_i32, %c0_i32_0 : i32, i32
  }
  func.func @transform_13(%arg0: i32) -> (i32, i32) {
    %c0_i32 = arith.constant 0 : i32
    %c0_i32_0 = arith.constant 0 : i32
    %c0_i32_1 = arith.constant 0 : i32
    return %c0_i32, %c0_i32_0 : i32, i32
  }
  func.func @transform_14(%arg0: i32) -> (i32, i32) {
    %c0_i32 = arith.constant 0 : i32
    %c0_i32_0 = arith.constant 0 : i32
    %c0_i32_1 = arith.constant 0 : i32
    return %c0_i32, %c0_i32_0 : i32, i32
  }
  func.func @transform_15(%arg0: i32) -> (i32, i32) {
    %c0_i32 = arith.constant 0 : i32
    %c0_i32_0 = arith.constant 0 : i32
    %c0_i32_1 = arith.constant 0 : i32
    return %c0_i32, %c0_i32_0 : i32, i32
  }
  func.func @transform_16(%arg0: i32) -> (i32, i32) {
    %c0_i32 = arith.constant 0 : i32
    %c0_i32_0 = arith.constant 0 : i32
    %c0_i32_1 = arith.constant 0 : i32
    return %c0_i32, %c0_i32_0 : i32, i32
  }
  func.func @transform_17(%arg0: i32) -> (i32, i32, i32) {
    %c0_i32 = arith.constant 0 : i32
    %c0_i32_0 = arith.constant 0 : i32
    %c0_i32_1 = arith.constant 0 : i32
    %c0_i32_2 = arith.constant 0 : i32
    return %c0_i32, %c0_i32_0, %c0_i32_1 : i32, i32, i32
  }
  func.func @transform_18(%arg0: i32) -> (i32, i32) {
    %c0_i32 = arith.constant 0 : i32
    %c0_i32_0 = arith.constant 0 : i32
    %c0_i32_1 = arith.constant 0 : i32
    return %c0_i32, %c0_i32_0 : i32, i32
  }
  func.func @transform_19(%arg0: i32) -> (i32, i32) {
    %c0_i32 = arith.constant 0 : i32
    %c0_i32_0 = arith.constant 0 : i32
    %c0_i32_1 = arith.constant 0 : i32
    return %c0_i32, %c0_i32_0 : i32, i32
  }
  func.func @transform_20(%arg0: i32) -> (i32, i32) {
    %c0_i32 = arith.constant 0 : i32
    %c0_i32_0 = arith.constant 0 : i32
    %c0_i32_1 = arith.constant 0 : i32
    return %c0_i32, %c0_i32_0 : i32, i32
  }
  func.func @transform_21(%arg0: i32) -> (i32, i32) {
    %c0_i32 = arith.constant 0 : i32
    %c0_i32_0 = arith.constant 0 : i32
    %c0_i32_1 = arith.constant 0 : i32
    return %c0_i32, %c0_i32_0 : i32, i32
  }
  func.func @transform_22(%arg0: i32) -> (i32, i32) {
    %c0_i32 = arith.constant 0 : i32
    %c0_i32_0 = arith.constant 0 : i32
    %c0_i32_1 = arith.constant 0 : i32
    return %c0_i32, %c0_i32_0 : i32, i32
  }
  func.func @transform_23(%arg0: i32) -> (i32, i32, i32) {
    %c0_i32 = arith.constant 0 : i32
    %c0_i32_0 = arith.constant 0 : i32
    %c0_i32_1 = arith.constant 0 : i32
    return %arg0, %c0_i32, %c0_i32_0 : i32, i32, i32
  }
  func.func @transform_24(%arg0: i32) -> (i32, i32, i32) {
    %c0_i32 = arith.constant 0 : i32
    %c0_i32_0 = arith.constant 0 : i32
    %c0_i32_1 = arith.constant 0 : i32
    return %arg0, %c0_i32, %c0_i32_0 : i32, i32, i32
  }
}

</mosaic_0001>

<bundles_post_ra>
// kernel: forward.1
= control target key start
LH: loop header
LB: loop body
LE: loop exit
PB: predicated region body
PF: predicated region fallthrough
CT: control target
= control target key end

     0   :  { %s6519_s0 = inlined_call_operand.vmem [shape: f32[2,64,128], index: 0, kind: input, shape index: {}]   ;;  %s6520_s1 = inlined_call_operand.vmem [shape: f32[2,1,128], index: 1, kind: input, shape index: {}]   ;;  %s6521_s2 = inlined_call_operand.vmem [shape: f32[2,128,1], index: 2, kind: input, shape index: {}]   ;;  %s6522_s3 = inlined_call_operand.hbm [shape: f32[128,128], index: 3, kind: input, shape index: {}]   ;;  %s6523_s4 = inlined_call_operand.hbm [shape: f32[1,128], index: 4, kind: input, shape index: {}]   ;;  %s6524_s5 = inlined_call_operand.vmem [shape: f32[128,128], index: 5, kind: input, shape index: {}]   ;;  %s6525_s6 = inlined_call_operand.hbm [shape: f32[1,128], index: 6, kind: input, shape index: {}]   ;;  %s6526_s7 = inlined_call_operand.vmem [shape: f32[128,128], index: 7, kind: input, shape index: {}]   ;;  %s6527_s8 = inlined_call_operand.hbm [shape: f32[1,128], index: 8, kind: input, shape index: {}]   ;;  %s6528_s9 = inlined_call_operand.vmem [shape: f32[128,128], index: 9, kind: input, shape index: {}]   ;;  %s6529_s10 = inlined_call_operand.vmem [shape: f32[1,128], index: 10, kind: input, shape index: {}]   ;;  %s6530_s11 = inlined_call_operand.vmem [shape: f32[32,128], index: 11, kind: input, shape index: {}]   ;;  %s6531_s12 = inlined_call_operand.hbm [shape: f32[64,128], index: 12, kind: input, shape index: {}]   ;;  %s6532_s13 = inlined_call_operand.hbm [shape: f32[64,32], index: 13, kind: input, shape index: {}]   ;;  %s6533_s14 = inlined_call_operand.hbm [shape: f32[64,1], index: 14, kind: input, shape index: {}]   ;;  %s6534_s15 = inlined_call_operand.hbm [shape: bf16[128,128], index: 15, kind: input, shape index: {}]   ;;  %s6535_s16 = inlined_call_operand.vmem [shape: f32[1,128], index: 16, kind: input, shape index: {}]   ;;  %s6536_s17 = inlined_call_operand.hbm [shape: bf16[9,128,128], index: 17, kind: input, shape index: {}]   ;;  %s6537_s18 = inlined_call_operand.vmem [shape: f32[1,128], index: 18, kind: input, shape index: {}]   ;;  %s6538_s19 = inlined_call_operand.hbm [shape: bf16[128,128], index: 19, kind: input, shape index: {}]   ;;  %s6539_s20 = inlined_call_operand.vmem [shape: f32[1,128], index: 20, kind: input, shape index: {}]   ;;  %s6540_s21 = inlined_call_operand.vmem [shape: f32[128,128], index: 21, kind: input, shape index: {}]   ;;  %s6541_s22 = inlined_call_operand.vmem [shape: f32[1,128], index: 22, kind: input, shape index: {}]   ;;  %s6542_s23 = inlined_call_operand.hbm [shape: f32[2,1,128], index: 23, kind: output, shape index: {0}]   ;;  %s6543_s24 = inlined_call_operand.vmem [shape: f32[2,64,128], index: 24, kind: output, shape index: {1}]  }
   0x1   :  { %6566 = sst [smem:[#allocation47_spill]] %s6519_s0 }
   0x2   :  { %6567 = sst [smem:[#allocation48_spill]] %s6520_s1 }
   0x3   :  { %6568 = sst [smem:[#allocation49_spill]] %s6521_s2 }
   0x4   :  { %6569 = sst [smem:[#allocation50_spill]] %s6522_s3 }
   0x5   :  { %6570 = sst [smem:[#allocation51_spill]] %s6523_s4 }
   0x6   :  { %6571 = sst [smem:[#allocation52_spill]] %s6524_s5 }
   0x7   :  { %6572 = sst [smem:[#allocation53_spill]] %s6525_s6 }
   0x8   :  { %6573 = sst [smem:[#allocation54_spill]] %s6526_s7 }
   0x9   :  { %6574 = sst [smem:[#allocation55_spill]] %s6527_s8 }
   0xa   :  { %6575 = sst [smem:[#allocation56_spill]] %s6532_s13 }
   0xb   :  { %6576 = sst [smem:[#allocation57_spill]] %s6541_s22 }
   0xc   :  { %6577 = sst [smem:[#allocation58_spill]] %s6542_s23 }
   0xd   :  { %30 = vsyncpa [#allocation4], 0 }
   0xe   :  { %31 = vsyncpa [#allocation7], 0 }
   0xf   :  { %32 = vsyncpa [#allocation10], 0 }
  0x10   :  { %33 = vsyncpa [#allocation13], 0 }
  0x11   :  { %34 = vsyncpa [#allocation16], 0 }
  0x12   :  { %35 = vsyncpa [#allocation19], 0 }
  0x13   :  { %36 = vsyncpa [#allocation5], 0 }
  0x14   :  { %38 = vsyncpa [#allocation5 + $0x1], 0  ;;  %s5608_s5 = smov 0   ;;  %s5610_s26 = smov 0  }
  0x15   :  { %s5612_s27 = smov 0   ;;  %s5614_s28 = smov 0  }
  0x16 LB: > { %6578 = sst [smem:[#allocation28_spill]] %s5451_s5  ;;  %s5629_s6 = sadd.s32 4294967295, %s5463_s28   ;;  %s5463_s28 = sphi %s5614_s28, %s6649_s28   ;;  %s5459_s27 = sphi %s5612_s27, %s6654_s27   ;;  %s5455_s26 = sphi %s5610_s26, %s6653_s26   ;;  %s5451_s5 = sphi %s5608_s5, %s6652_s5  }
  0x17   : > { %6579 = sst [smem:[#allocation29_spill]] %s5459_s27  ;;  %s3886_s2 = sadd.s32 4294967294, %s5463_s28  }
  0x18   : > { %6580 = sst [smem:[#allocation30_spill]] %s5463_s28  ;;  %s5633_s29 = sadd.s32 1, %s5463_s28  }
  0x19   : > { %6581 = sst [smem:[#allocation31_spill]] %s5633_s29  ;;  %s549_s0 = sadd.s32 1, %s5459_s27 }
  0x1a   : > { %s546_s7 = ssub.s32 %s5463_s28, %s5633_s29  ;;  %p559_p0 = scmp.ne.s32.totalorder %s5459_s27, %s5455_s26 }
  0x1b   : > { %p547_p1 = scmp.eq.s32.totalorder %s546_s7, 0  ;;  %p560_p2 = scmp.eq.s32.totalorder %s5629_s6, 1 }
  0x1c   : > { %p565_p3 = scmp.ne.s32.totalorder %s5455_s26, %s5451_s5  ;;  %p566_p4 = scmp.eq.s32.totalorder %s3886_s2, 1 }
  0x1d   : > { %s5644_s30 = scalar_select %p547_p1, %s5459_s27, %s549_s0  }
  0x1e   : > { %p5646_p5 = por %p560_p2, %p559_p0  ;;  %p5650_p6 = por %p566_p4, %p565_p3 }
  0x1f   : > { %6582 = sst [smem:[#allocation32_spill]] %s5644_s30  ;;  %p3887_p7 = scmp.ge.s32.totalorder %s5463_s28, 1 }
  0x20   : > { %s6583_s3 = scalar_select %p5646_p5, 1, 0 }
  0x21   : > { %s6584_s25 = scalar_select %p5650_p6, 1, 0 }
  0x22   : > { %p599_p8 = scmp.lt.s32.totalorder %s5463_s28, 3  ;;  %p6552_p9 = scmp.eq.s32.totalorder %s5629_s6, 0 }
  0x23   : > { %6585 = sst [smem:[#allocation33_spill]] %s6584_s25  ;;  %s5465_s4 = smov [#allocation6]  }
  0x24   : > { %p5657_p10 = pnand %p3887_p7, %p599_p8  ;;  %s625_s1 = sshll.u32 %s5465_s4, 4  ;;  %s626_s1 = int_to_ptr.vmem [resolvable:$true] %s625_s1 }
  0x25   : > { %s5466_s2 = smov [#allocation9]   ;;  %s5467_s30 = smov [#allocation12]  }
  0x26   : > { %s6586_s8 = scalar_select %p5657_p10, 1, 0 }
  0x27   : > { %p4879_p11 = pneg %p5657_p10  ;;  %s653_s0 = sshll.u32 %s5466_s2, 4  ;;  %s654_s0 = int_to_ptr.vmem [resolvable:$true] %s653_s0 }
  0x28   : > { %s685_s27 = sshll.u32 %s5467_s30, 4  ;;  %s5130_s4 = scalar_lea.vmem %s626_s1, 16  ;;  %s686_s27 = int_to_ptr.vmem [resolvable:$true] %s685_s27 }
  0x29   : > { %p5665_p12 = pnand %p6552_p9, %p4879_p11  ;;  %p5131_p0 = scmp.ne.s32.totalorder %s626_s1, %s5130_s4 }
  0x2a   : > { %s5137_s2 = scalar_lea.vmem %s626_s1, 32  ;;  %p5138_p3 = scmp.lt.s32.totalorder %s626_s1, %s626_s1 }
  0x2b   : > { %p5671_p13 = pneg %p5665_p12  ;;  %p5139_p4 = scmp.lt.s32.totalorder %s5137_s2, %s5130_s4 }
  0x2d   : > { %p5133_p1 = pnand %p5131_p0, %p5671_p13  ;;  %p5140_p7 = por %p5139_p4, %p5138_p3 }
  0x2f   : > { %p5134_p2 = pneg %p5133_p1 }
  0x31   : > { %p5141_p8 = pnand %p5140_p7, %p5134_p2 }
  0x33   : > { %5144 = shalt.err (!%p5141_p8)
}
  0x34   : > { %s6589_s5 = sld [smem:[#allocation51_spill]]  ;;  %s5156_s28 = scalar_lea.vmem %s654_s0, 16 }
  0x35   : > { %p5157_p11 = scmp.ne.s32.totalorder %s654_s0, %s5156_s28  ;;  %s5163_s23 = scalar_lea.vmem %s654_s0, 32 }
  0x36   : > { %p5164_p0 = scmp.lt.s32.totalorder %s654_s0, %s654_s0  ;;  %p5165_p1 = scmp.lt.s32.totalorder %s5163_s23, %s5156_s28 }
  0x37   : > { %p5159_p9 = pnand %p5157_p11, %p5671_p13 }
  0x38   : > { %p5166_p5 = por %p5165_p1, %p5164_p0 }
  0x39   : > { %p5160_p6 = pneg %p5159_p9 }
  0x3a   : > { %4885 = dma.hbm_to_vmem [thread:$0]  (!%p5665_p12), %s6589_s5, 16, %s626_s1, [#allocation7]  }
  0x3b   : > { %p5167_p10 = pnand %p5166_p5, %p5160_p6 }
  0x3d   : > { %5170 = shalt.err (!%p5167_p10)
}
  0x3e   : > { %s6590_s22 = sld [smem:[#allocation55_spill]]  ;;  %s5182_s5 = scalar_lea.vmem %s686_s27, 1024 }
  0x3f   : > { %p5183_p2 = scmp.ne.s32.totalorder %s686_s27, %s5182_s5  ;;  %p5190_p9 = scmp.lt.s32.totalorder %s686_s27, %s686_s27 }
  0x40   : > { %p5191_p7 = scmp.lt.s32.totalorder %s5182_s5, %s5182_s5 }
  0x41   : > { %p5185_p3 = pnand %p5183_p2, %p5671_p13 }
  0x42   : > { %p5192_p8 = por %p5191_p7, %p5190_p9 }
  0x43   : > { %p5186_p4 = pneg %p5185_p3 }
  0x44   : > { %4891 = dma.hbm_to_vmem [thread:$0]  (!%p5665_p12), %s6590_s22, 16, %s654_s0, [#allocation10]  }
  0x45   : > { %p5193_p11 = pnand %p5192_p8, %p5186_p4 }
  0x47   : > { %5196 = shalt.err (!%p5193_p11)
}
  0x48   : > { %s6556_s23 = smov 128   ;;  %s6562_s28 = smov 8  }
  0x49   : > { %s6591_s13 = sld [smem:[#allocation56_spill]]  ;;  %s5470_s1 = smov [#allocation15]  }
  0x4a   : > { %s711_s0 = sshll.u32 %s5470_s1, 4  ;;  %s712_s0 = int_to_ptr.vmem [resolvable:$true] %s711_s0 }
  0x4b   : > { %s5208_s30 = scalar_lea.vmem %s712_s0, 1024  ;;  %p5216_p0 = scmp.lt.s32.totalorder %s712_s0, %s712_s0 }
  0x4c   : > { %p5209_p5 = scmp.ne.s32.totalorder %s712_s0, %s5208_s30  ;;  %p5217_p1 = scmp.lt.s32.totalorder %s5208_s30, %s5208_s30 }
  0x4e   : > { %p5211_p6 = pnand %p5209_p5, %p5671_p13  ;;  %p5218_p2 = por %p5217_p1, %p5216_p0 }
  0x4f   : > { %4897 = dma.hbm_to_vmem [thread:$0]  (!%p5665_p12), %s6591_s13, 1024, %s686_s27, [#allocation13], %s6556_s23, %s6556_s23, %s6562_s28  }
  0x50   : > { %p5212_p10 = pneg %p5211_p6 }
  0x52   : > { %p5219_p3 = pnand %p5218_p2, %p5212_p10 }
  0x54   : > { %5222 = shalt.err (!%p5219_p3)
}
  0x55   : > { %s6558_s4 = smov 64   ;;  %s6560_s2 = smov 4  }
  0x56   : > { %4903 = dma.hbm_to_vmem [thread:$0]  (!%p5665_p12), %s6534_s15, 1024, %s712_s0, [#allocation16], %s6558_s4, %s6558_s4, %s6560_s2  }
  0x57   : > { %s5473_s22 = smov [#allocation3]   ;;  %s5474_s1 = smov [#allocation8]  }
  0x58   : > { %s611_s25 = sshll.u32 %s5473_s22, 4  ;;  %s639_s23 = sshll.u32 %s5474_s1, 4  ;;  %s612_s25 = int_to_ptr.vmem [resolvable:$true] %s611_s25  ;;  %s640_s23 = int_to_ptr.vmem [resolvable:$true] %s639_s23 }
  0x59   : > { %s5234_s30 = scalar_lea.vmem %s612_s25, 2048  ;;  %p5242_p8 = scmp.lt.s32.totalorder %s612_s25, %s612_s25 }
  0x5a   : > { %p5235_p4 = scmp.ne.s32.totalorder %s612_s25, %s5234_s30  ;;  %p5243_p11 = scmp.lt.s32.totalorder %s5234_s30, %s5234_s30 }
  0x5c   : > { %p5237_p9 = pnand %p5235_p4, %p5671_p13  ;;  %p5244_p5 = por %p5243_p11, %p5242_p8 }
  0x5e   : > { %p5238_p7 = pneg %p5237_p9 }
  0x60   : > { %p5245_p6 = pnand %p5244_p5, %p5238_p7 }
  0x62   : > { %5248 = shalt.err (!%p5245_p6)
}
  0x63   : > { %s6592_s0 = smov 128   ;;  %s6593_s22 = sld [smem:[#allocation50_spill]] }
  0x64   : > { %s5260_s1 = scalar_lea.vmem %s640_s23, 16  ;;  %s5267_s4 = scalar_lea.vmem %s640_s23, 32 }
  0x65   : > { %p5261_p10 = scmp.ne.s32.totalorder %s640_s23, %s5260_s1  ;;  %p5268_p2 = scmp.lt.s32.totalorder %s640_s23, %s640_s23 }
  0x66   : > { %p5269_p3 = scmp.lt.s32.totalorder %s5267_s4, %s5260_s1 }
  0x67   : > { %p5263_p0 = pnand %p5261_p10, %p5671_p13 }
  0x68   : > { %p5270_p4 = por %p5269_p3, %p5268_p2 }
  0x69   : > { %4882 = dma.hbm_to_vmem [thread:$0]  (!%p5665_p12), %s6593_s22, 2048, %s612_s25, [#allocation4], %s6592_s0, %s6592_s0, %s6562_s28  }
  0x6a   : > { %p5264_p1 = pneg %p5263_p0 }
  0x6c   : > { %p5271_p9 = pnand %p5270_p4, %p5264_p1 }
  0x6e   : > { %5274 = shalt.err (!%p5271_p9)
}
  0x6f   : > { %s6594_s13 = sld [smem:[#allocation53_spill]]  ;;  %s5475_s27 = smov [#allocation11]  }
  0x70   : > { %s672_s25 = sshll.u32 %s5475_s27, 4  ;;  %s5476_s5 = smov [#allocation14]   ;;  %s673_s25 = int_to_ptr.vmem [resolvable:$true] %s672_s25 }
  0x71   : > { %s698_s22 = sshll.u32 %s5476_s5, 4  ;;  %s5286_s28 = scalar_lea.vmem %s673_s25, 1024  ;;  %s699_s22 = int_to_ptr.vmem [resolvable:$true] %s698_s22 }
  0x72   : > { %p5287_p7 = scmp.ne.s32.totalorder %s673_s25, %s5286_s28  ;;  %p5294_p5 = scmp.lt.s32.totalorder %s673_s25, %s673_s25 }
  0x73   : > { %p5295_p6 = scmp.lt.s32.totalorder %s5286_s28, %s5286_s28 }
  0x74   : > { %p5289_p8 = pnand %p5287_p7, %p5671_p13 }
  0x75   : > { %4888 = dma.hbm_to_vmem [thread:$0]  (!%p5665_p12), %s6594_s13, 16, %s640_s23, [#allocation7]  }
  0x76   : > { %p5290_p11 = pneg %p5289_p8  ;;  %p5296_p10 = por %p5295_p6, %p5294_p5 }
  0x78   : > { %p5297_p0 = pnand %p5296_p10, %p5290_p11 }
  0x7a   : > { %5300 = shalt.err (!%p5297_p0)
}
  0x7b   : > { %s6595_s4 = smov 8   ;;  %s5312_s2 = scalar_lea.vmem %s699_s22, 1024 }
  0x7c   : > { %4894 = dma.hbm_to_vmem [thread:$0]  (!%p5665_p12), %s6531_s12, 1024, %s673_s25, [#allocation10], %s6592_s0, %s6592_s0, %s6595_s4  }
  0x7d   : > { %p5313_p1 = scmp.ne.s32.totalorder %s699_s22, %s5312_s2  ;;  %p5320_p4 = scmp.lt.s32.totalorder %s699_s22, %s699_s22 }
  0x7e   : > { %p5321_p9 = scmp.lt.s32.totalorder %s5312_s2, %s5312_s2 }
  0x7f   : > { %p5315_p2 = pnand %p5313_p1, %p5671_p13 }
  0x80   : > { %p5322_p7 = por %p5321_p9, %p5320_p4 }
  0x81   : > { %p5316_p3 = pneg %p5315_p2 }
  0x83   : > { %p5323_p8 = pnand %p5322_p7, %p5316_p3 }
  0x85   : > { %5326 = shalt.err (!%p5323_p8)
}
  0x86   : > { %4900 = dma.hbm_to_vmem [thread:$0]  (!%p5665_p12), %s6533_s14, 1024, %s699_s22, [#allocation13], %s6592_s0, %s6592_s0, %s6595_s4  }
  0x87   : > { %s5477_s30 = smov [#allocation17]   ;;  %s5478_s25 = smov [#allocation18]  }
  0x88   : > { %s727_s27 = sshll.u32 %s5477_s30, 4  ;;  %s743_s5 = sshll.u32 %s5478_s25, 4  ;;  %s728_s27 = int_to_ptr.vmem [resolvable:$true] %s727_s27  ;;  %s744_s5 = int_to_ptr.vmem [resolvable:$true] %s743_s5 }
  0x89   : > { %s5338_s13 = scalar_lea.vmem %s728_s27, 9216  ;;  %p5346_p10 = scmp.lt.s32.totalorder %s728_s27, %s728_s27 }
  0x8a   : > { %p5339_p11 = scmp.ne.s32.totalorder %s728_s27, %s5338_s13  ;;  %p5347_p0 = scmp.lt.s32.totalorder %s5338_s13, %s5338_s13 }
  0x8c   : > { %p5341_p5 = pnand %p5339_p11, %p5671_p13  ;;  %p5348_p1 = por %p5347_p0, %p5346_p10 }
  0x8e   : > { %p5342_p6 = pneg %p5341_p5 }
  0x90   : > { %p5349_p2 = pnand %p5348_p1, %p5342_p6 }
  0x92   : > { %5352 = shalt.err (!%p5349_p2)
}
  0x93   : > { %s6596_s23 = smov 4   ;;  %s6597_s0 = smov 64  }
  0x94   : > { %4906 = dma.hbm_to_vmem [thread:$0]  (!%p5665_p12), %s6536_s17, 9216, %s728_s27, [#allocation16], %s6597_s0, %s6597_s0, %s6596_s23  }
  0x95   : > { %s5364_s2 = scalar_lea.vmem %s744_s5, 1024  ;;  %p5372_p7 = scmp.lt.s32.totalorder %s744_s5, %s744_s5 }
  0x96   : > { %p5365_p3 = scmp.ne.s32.totalorder %s744_s5, %s5364_s2  ;;  %p5373_p8 = scmp.lt.s32.totalorder %s5364_s2, %s5364_s2 }
  0x98   : > { %p5367_p4 = pnand %p5365_p3, %p5671_p13  ;;  %p5374_p11 = por %p5373_p8, %p5372_p7 }
  0x9a   : > { %p5368_p9 = pneg %p5367_p4 }
  0x9c   : > { %p5375_p5 = pnand %p5374_p11, %p5368_p9 }
  0x9e   : > { %5378 = shalt.err (!%p5375_p5)
}
  0x9f   : > { %4909 = dma.hbm_to_vmem [thread:$0]  (!%p5665_p12), %s6538_s19, 1024, %s744_s5, [#allocation19], %s6597_s0, %s6597_s0, %s6596_s23  }
  0xa0   : > { %p6598_p6 = scmp.ne.s32.totalorder %s6586_s8, 0 }
  0xa2   : > { %790 = sbr.rel (%p6598_p6) target bundleno = 2585 (0xa19), region = 112 }
  0xa7   : > { %p6599_p13 = scmp.eq.s32.totalorder %s5629_s6, 0 }
  0xa9   : > { %5422 = dma.done.wait (%p6599_p13), [#allocation4], 2048   ;;  %p6600_p10 = pmov %p6599_p13 }
  0xab   : > { %5424 = vsyncadd (%p6600_p10), [#allocation4], 4294965248  ;;  %p6601_p0 = pmov %p6600_p10 }
  0xad   : > { %5426 = dma.done.wait (%p6601_p0), [#allocation7], 32   ;;  %p6602_p1 = pmov %p6601_p0 }
  0xae   : > { %p6603_p2 = pmov %p6601_p0 }
  0xaf   : > { %5428 = vsyncadd (%p6602_p1), [#allocation7], 4294967264 }
  0xb0   : > { %5430 = dma.done.wait (%p6603_p2), [#allocation10], 1040   ;;  %p6604_p12 = pmov %p6601_p0 }
  0xb1   : > { %p6605_p3 = pmov %p6601_p0 }
  0xb2   : > { %5432 = vsyncadd (%p6604_p12), [#allocation10], 4294966256 }
  0xb3   : > { %5434 = dma.done.wait (%p6605_p3), [#allocation13], 2048   ;;  %p6606_p4 = pmov %p6601_p0 }
  0xb4   : > { %p6607_p9 = pmov %p6601_p0 }
  0xb5   : > { %5436 = vsyncadd (%p6606_p4), [#allocation13], 4294965248 }
  0xb6   : > { %5438 = dma.done.wait (%p6607_p9), [#allocation16], 10240   ;;  %p6608_p7 = pmov %p6601_p0 }
  0xb7   : > { %p6609_p8 = pmov %p6601_p0 }
  0xb8   : > { %5440 = vsyncadd (%p6608_p7), [#allocation16], 4294957056 }
  0xb9   : > { %5442 = dma.done.wait (%p6609_p8), [#allocation19], 1024   ;;  %p6610_p11 = pmov %p6601_p0 }
  0xba   : > { %v5479_v0 = vmov 0.0   ;;  %vm5480_vm0 = vmmov 0   ;;  %s6611_s7 = sld [smem:[#allocation54_spill]]  ;;  %v1063_v5 = vld [vmem:[%s6528_s9 + $0x78] sm:$0xff]  ;;  %p904_p5 = scmp.lt.s32.totalorder %s5629_s6, 1  ;;  %v1062_v7 = vld [vmem:[%s6528_s9 + $0x70] sm:$0xff] }
  0xbb   : > { %5444 = vsyncadd (%p6610_p11), [#allocation19], 4294966272  ;;  %4296 = vmatprep.subr.mxu0 %v5479_v0  ;;  %2030 = vst [vmem:[#allocation2] sm:$0xff] %v5479_v0  ;;  %4328 = vmatprep.mubr.msk.f32.mxu0 %vm5480_vm0, %v5479_v0  ;;  %v1061_v8 = vld [vmem:[%s6528_s9 + $0x68] sm:$0xff]  ;;  %v1060_v11 = vld [vmem:[%s6528_s9 + $0x60] sm:$0xff]  ;;  %s6612_s27 = sld [smem:[#allocation48_spill]] }
  0xbc   : > { %2031 = vst [vmem:[#allocation2 + $0x8] sm:$0x3] %v5479_v0  ;;  %2032 = vst [vmem:[#allocation2 + $0x10] sm:$0xff] %v5479_v0  ;;  %4331 = vmatprep.subr.mxu1 %v5479_v0  ;;  %4363 = vmatprep.mubr.msk.f32.mxu1 %vm5480_vm0, %v5479_v0  ;;  %s5865_s4 = scalar_select %p904_p5, %s5629_s6, 1  ;;  %v1059_v13 = vld [vmem:[%s6528_s9 + $0x58] sm:$0xff]  ;;  %v1058_v14 = vld [vmem:[%s6528_s9 + $0x50] sm:$0xff] }
  0xbd   : > { %2033 = vst [vmem:[#allocation2 + $0x18] sm:$0x3] %v5479_v0  ;;  %2034 = vst [vmem:[#allocation2 + $0x20] sm:$0xff] %v5479_v0  ;;  %4332 = vmatpush3.msra.mxu1 %v1063_v5  ;;  %v1057_v16 = vld [vmem:[%s6528_s9 + $0x48] sm:$0xff]  ;;  %v1056_v18 = vld [vmem:[%s6528_s9 + $0x40] sm:$0xff]  ;;  %s6614_s0 = sld [smem:[#allocation47_spill]] }
  0xbe   : > { %2035 = vst [vmem:[#allocation2 + $0x28] sm:$0x3] %v5479_v0  ;;  %2036 = vst [vmem:[#allocation2 + $0x30] sm:$0xff] %v5479_v0  ;;  %4333 = vmatprep.subr.mxu1 %v5479_v0  ;;  %v1055_v20 = vld [vmem:[%s6528_s9 + $0x38] sm:$0xff]  ;;  %v1054_v22 = vld [vmem:[%s6528_s9 + $0x30] sm:$0xff]  ;;  %s4020_s5 = sshll.u32 %s5865_s4, 6 }
  0xbf   : > { %2037 = vst [vmem:[#allocation2 + $0x38] sm:$0x3] %v5479_v0  ;;  %2038 = vst [vmem:[#allocation2 + $0x40] sm:$0xff] %v5479_v0  ;;  %4334 = vmatpush3.msra.mxu1 %v1062_v7  ;;  %v1053_v24 = vld [vmem:[%s6528_s9 + $0x28] sm:$0xff]  ;;  %v1052_v26 = vld [vmem:[%s6528_s9 + $0x20] sm:$0xff]  ;;  %vm1138_vm1 = vcmask 1040384  }
  0xc0   : > { %2039 = vst [vmem:[#allocation2 + $0x48] sm:$0x3] %v5479_v0  ;;  %2040 = vst [vmem:[#allocation2 + $0x50] sm:$0xff] %v5479_v0  ;;  %v975_v1 = vld [vmem:[%s6611_s7 + $0x78] sm:$0xff]  ;;  %v974_v2 = vld [vmem:[%s6611_s7 + $0x70] sm:$0xff]  ;;  %4335 = vmatprep.subr.mxu1 %v5479_v0  ;;  %vm1140_vm2 = vcmask 1041408  }
  0xc1   : > { %2041 = vst [vmem:[#allocation2 + $0x58] sm:$0x3] %v5479_v0  ;;  %2042 = vst [vmem:[#allocation2 + $0x60] sm:$0xff] %v5479_v0  ;;  %4297 = vmatpush3.msra.mxu0 %v975_v1  ;;  %v973_v3 = vld [vmem:[%s6611_s7 + $0x68] sm:$0xff]  ;;  %v972_v4 = vld [vmem:[%s6611_s7 + $0x60] sm:$0xff]  ;;  %4336 = vmatpush3.msra.mxu1 %v1061_v8  ;;  %s911_s25 = scalar_lea.vmem %s6612_s27, %s5865_s4  ;;  %s4021_s1 = sshll.u32 %s5865_s4, 7 }
  0xc2   : > { %2043 = vst [vmem:[#allocation2 + $0x68] sm:$0x3] %v5479_v0  ;;  %2044 = vst [vmem:[#allocation2 + $0x70] sm:$0xff] %v5479_v0  ;;  %4298 = vmatprep.subr.mxu0 %v5479_v0  ;;  %v971_v6 = vld [vmem:[%s6611_s7 + $0x58] sm:$0xff]  ;;  %v970_v9 = vld [vmem:[%s6611_s7 + $0x50] sm:$0xff]  ;;  %4337 = vmatprep.subr.mxu1 %v5479_v0  ;;  %vm1329_vm3 = vcmask 1042432  }
  0xc3   : > { %2045 = vst [vmem:[#allocation2 + $0x78] sm:$0x3] %v5479_v0  ;;  %2046 = vst [vmem:[#allocation2 + $0x80] sm:$0xff] %v5479_v0  ;;  %4299 = vmatpush3.msra.mxu0 %v974_v2  ;;  %v969_v10 = vld [vmem:[%s6611_s7 + $0x48] sm:$0xff]  ;;  %v968_v12 = vld [vmem:[%s6611_s7 + $0x40] sm:$0xff]  ;;  %4338 = vmatpush3.msra.mxu1 %v1060_v11  ;;  %s6033_s22 = scalar_lea.vmem %s6614_s0, %s4020_s5  ;;  %s6615_s0 = sld [smem:[#allocation49_spill]] }
  0xc4   : > { %2047 = vst [vmem:[#allocation2 + $0x88] sm:$0x3] %v5479_v0  ;;  %2048 = vst [vmem:[#allocation2 + $0x90] sm:$0xff] %v5479_v0  ;;  %4300 = vmatprep.subr.mxu0 %v5479_v0  ;;  %v967_v15 = vld [vmem:[%s6611_s7 + $0x38] sm:$0xff]  ;;  %4339 = vmatprep.subr.mxu1 %v5479_v0  ;;  %v966_v17 = vld [vmem:[%s6611_s7 + $0x30] sm:$0xff]  ;;  %vm1527_vm4 = vcmask 261120  }
  0xc5   : > { %2049 = vst [vmem:[#allocation2 + $0x98] sm:$0x3] %v5479_v0  ;;  %4301 = vmatpush3.msra.mxu0 %v973_v3  ;;  %4340 = vmatpush3.msra.mxu1 %v1059_v13  ;;  %v965_v19 = vld [vmem:[%s6611_s7 + $0x28] sm:$0xff]  ;;  %v964_v21 = vld [vmem:[%s6611_s7 + $0x20] sm:$0xff]  ;;  %v963_v23 = vld [vmem:[%s6611_s7 + $0x18] sm:$0xff]  ;;  %s895_s8 = sand.u32 1, %s5455_s26  }
  0xc6   : > { %4302 = vmatprep.subr.mxu0 %v5479_v0  ;;  %4341 = vmatprep.subr.mxu1 %v5479_v0  ;;  %v962_v25 = vld [vmem:[%s6611_s7 + $0x10] sm:$0xff]  ;;  %v961_v27 = vld [vmem:[%s6611_s7 + $0x8] sm:$0xff]  ;;  %v1051_v28 = vld [vmem:[%s6528_s9 + $0x18] sm:$0xff]  ;;  %s6642_s27 = sld [smem:[#allocation57_spill]]  ;;  %s4017_s13 = sshll.u32 %s5629_s6, 4 }
  0xc7   : > { %4303 = vmatpush3.msra.mxu0 %v972_v4  ;;  %4342 = vmatpush3.msra.mxu1 %v1058_v14  ;;  %v960_v29 = vld [vmem:[%s6611_s7] sm:$0xff]  ;;  %v1050_v31 = vld [vmem:[%s6528_s9 + $0x10] sm:$0xff]  ;;  %v1049_v32 = vld [vmem:[%s6528_s9 + $0x8] sm:$0xff]  ;;  %s896_s23 = scalar_lea.vmem [#allocation20], %s895_s8  ;;  %s6643_s29 = sld [smem:[#allocation58_spill]] }
  0xc8   : > { %4304 = vmatprep.subr.mxu0 %v5479_v0  ;;  %4343 = vmatprep.subr.mxu1 %v5479_v0  ;;  %v959_v30 = vld [vmem:[%s911_s25] sm:$0x1]  ;;  %v1157_v34 = vld [vmem:[#allocation3 + $0x78] sm:$0xff]  ;;  %v1156_v35 = vld [vmem:[#allocation3 + $0x70] sm:$0xff]  ;;  %s6613_s25 = sld [smem:[#allocation52_spill]]  ;;  %s3667_s4 = scalar_lea.sflag [#allocation5], %s895_s8 }
  0xc9   : > { %4305 = vmatpush3.msra.mxu0 %v971_v6  ;;  %4344 = vmatpush3.msra.mxu1 %v1057_v16  ;;  %v1048_v33 = vld [vmem:[%s6528_s9] sm:$0xff]  ;;  %v1155_v36 = vld [vmem:[#allocation3 + $0x68] sm:$0xff]  ;;  %v1153_v38 = vld [vmem:[#allocation3 + $0x58] sm:$0xff]  ;;  %s6089_s2 = scalar_lea.vmem %s6615_s0, %s4021_s1  ;;  %s6184_s1 = scalar_lea.vmem %s6543_s24, %s4020_s5 }
  0xca   : > { %4306 = vmatprep.subr.mxu0 %v5479_v0  ;;  %4345 = vmatprep.subr.mxu1 %v5479_v0  ;;  %v1154_v37 = vld [vmem:[#allocation3 + $0x60] sm:$0xff]  ;;  %v1152_v39 = vld [vmem:[#allocation3 + $0x50] sm:$0xff]  ;;  %v1151_v40 = vld [vmem:[#allocation3 + $0x48] sm:$0xff]  ;;  %s3684_s0 = sshll.u32 %s896_s23, 4  ;;  %p6644_p13 = scmp.ne.s32.totalorder %s6583_s3, 0  ;;  %s3685_s0 = int_to_ptr.vmem [resolvable:$true] %s3684_s0 }
  0xcb   : > { %4307 = vmatpush3.msra.mxu0 %v970_v9  ;;  %4346 = vmatpush3.msra.mxu1 %v1056_v18  ;;  %v1150_v41 = vld [vmem:[#allocation3 + $0x40] sm:$0xff]  ;;  %v1149_v42 = vld [vmem:[#allocation3 + $0x38] sm:$0xff]  ;;  %v1148_v43 = vld [vmem:[#allocation3 + $0x30] sm:$0xff]  ;;  %s5379_s5 = scalar_lea.vmem %s3685_s0, 16 }
  0xcc   : > { %4308 = vmatprep.subr.mxu0 %v5479_v0  ;;  %4347 = vmatprep.subr.mxu1 %v5479_v0  ;;  %v1147_v44 = vld [vmem:[#allocation3 + $0x28] sm:$0xff]  ;;  %v1146_v45 = vld [vmem:[#allocation3 + $0x20] sm:$0xff]  ;;  %v1145_v46 = vld [vmem:[#allocation3 + $0x18] sm:$0xff]  ;;  %p5380_p6 = scmp.ne.s32.totalorder %s3685_s0, %s5379_s5 }
  0xcd   : > { %4309 = vmatpush3.msra.mxu0 %v969_v10  ;;  %4348 = vmatpush3.msra.mxu1 %v1055_v20  ;;  %v976_v47 = vld [vmem:[#allocation9] sm:$0x1]  ;;  %v1144_v52 = vld [vmem:[#allocation3 + $0x10] sm:$0xff]  ;;  %v1143_v53 = vld [vmem:[#allocation3 + $0x8] sm:$0xff] }
  0xce   : > { %4310 = vmatprep.subr.mxu0 %v5479_v0  ;;  %4349 = vmatprep.subr.mxu1 %v5479_v0  ;;  %v1142_v54 = vld [vmem:[#allocation3] sm:$0xff]  ;;  %v1251_v55 = vld [vmem:[%s6613_s25 + $0x78] sm:$0xff]  ;;  %v1250_v56 = vld [vmem:[%s6613_s25 + $0x70] sm:$0xff]  ;;  %p5381_p10 = pnand %p5380_p6, %p6644_p13 }
  0xcf   : > { %4311 = vmatpush3.msra.mxu0 %v968_v12  ;;  %4350 = vmatpush3.msra.mxu1 %v1054_v22  ;;  %v1249_v57 = vld [vmem:[%s6613_s25 + $0x68] sm:$0xff]  ;;  %v1248_v58 = vld [vmem:[%s6613_s25 + $0x60] sm:$0xff]  ;;  %v1247_v59 = vld [vmem:[%s6613_s25 + $0x58] sm:$0xff] }
  0xd0   : > { %4312 = vmatprep.subr.mxu0 %v5479_v0  ;;  %4351 = vmatprep.subr.mxu1 %v5479_v0  ;;  %v1246_v60 = vld [vmem:[%s6613_s25 + $0x50] sm:$0xff]  ;;  %v1245_v61 = vld [vmem:[%s6613_s25 + $0x48] sm:$0xff]  ;;  %v1244_v62 = vld [vmem:[%s6613_s25 + $0x40] sm:$0xff]  ;;  %p5382_p0 = pneg %p5381_p10 }
  0xd1   : > { %4313 = vmatpush3.msra.mxu0 %v967_v15  ;;  %4352 = vmatpush3.msra.mxu1 %v1053_v24  ;;  %v1243_v63 = vld [vmem:[%s6613_s25 + $0x38] sm:$0xff]  ;;  %v1242_v1 = vld [vmem:[%s6613_s25 + $0x30] sm:$0xff]  ;;  %v1241_v2 = vld [vmem:[%s6613_s25 + $0x28] sm:$0xff] }
  0xd2   : > { %4314 = vmatprep.subr.mxu0 %v5479_v0  ;;  %4353 = vmatprep.subr.mxu1 %v5479_v0  ;;  %v1240_v3 = vld [vmem:[%s6613_s25 + $0x20] sm:$0xff]  ;;  %v1239_v4 = vld [vmem:[%s6613_s25 + $0x18] sm:$0xff]  ;;  %v6039_v6 = vld [vmem:[%s6033_s22 + $0x8] sm:$0xff] }
  0xd3   : > { %4315 = vmatpush3.msra.mxu0 %v966_v17  ;;  %4354 = vmatpush3.msra.mxu1 %v1052_v26  ;;  %v6036_v5 = vld [vmem:[%s6033_s22] sm:$0xff]  ;;  %v6044_v8 = vld [vmem:[%s6033_s22 + $0x10] sm:$0xff]  ;;  %v6048_v10 = vld [vmem:[%s6033_s22 + $0x18] sm:$0xff] }
  0xd4   : > { %4316 = vmatprep.subr.mxu0 %v5479_v0  ;;  %4355 = vmatprep.subr.mxu1 %v5479_v0  ;;  %v931_v7 = vadd.f32 %v6039_v6, %v6036_v5  ;;  %v6052_v12 = vld [vmem:[%s6033_s22 + $0x20] sm:$0xff]  ;;  %v6056_v14 = vld [vmem:[%s6033_s22 + $0x28] sm:$0xff]  ;;  %v6060_v16 = vld [vmem:[%s6033_s22 + $0x30] sm:$0xff] }
  0xd5   : > { %4317 = vmatpush3.msra.mxu0 %v965_v19  ;;  %4356 = vmatpush3.msra.mxu1 %v1051_v28  ;;  %v6063_v17 = vld [vmem:[%s6033_s22 + $0x38] sm:$0xff]  ;;  %v946_v19 = vmax.f32 %v6036_v5, %v6052_v12  ;;  %v947_v20 = vmax.f32 %v6039_v6, %v6056_v14 }
  0xd6   : > { %4318 = vmatprep.subr.mxu0 %v5479_v0  ;;  %4357 = vmatprep.subr.mxu1 %v5479_v0  ;;  %v932_v9 = vadd.f32 %v931_v7, %v6044_v8  ;;  %v949_v22 = vmax.f32 %v6048_v10, %v6063_v17  ;;  %v1405_v7 = vld [vmem:[%s6530_s11 + $0x18] sm:$0xff] }
  0xd7   : > { %4319 = vmatpush3.msra.mxu0 %v964_v21  ;;  %4358 = vmatpush3.msra.mxu1 %v1050_v31  ;;  %v948_v21 = vmax.f32 %v6044_v8, %v6060_v16  ;;  %v950_v24 = vmax.f32 %v946_v19, %v947_v20 }
  0xd8   : > { %4320 = vmatprep.subr.mxu0 %v5479_v0  ;;  %4359 = vmatprep.subr.mxu1 %v5479_v0  ;;  %v933_v11 = vadd.f32 %v932_v9, %v6048_v10  ;;  %v3916_v9 = vld [vmem:[#allocation6] ss:$0 sm:$0xff] }
  0xd9   : > { %4321 = vmatpush3.msra.mxu0 %v963_v23  ;;  %4360 = vmatpush3.msra.mxu1 %v1049_v32 }
  0xda   : > { %4322 = vmatprep.subr.mxu0 %v5479_v0  ;;  %4361 = vmatprep.subr.mxu1 %v5479_v0  ;;  %v934_v13 = vadd.f32 %v933_v11, %v6052_v12 }
  0xdb   : > { %4323 = vmatpush3.msra.mxu0 %v962_v25  ;;  %4362 = vmatpush3.msra.mxu1 %v1048_v33  ;;  %v951_v25 = vmax.f32 %v948_v21, %v949_v22 }
  0xdc   : > { %4324 = vmatprep.subr.mxu0 %v5479_v0  ;;  %4401 = vmatprep.subr.mxu1 %v5479_v0  ;;  %v935_v15 = vadd.f32 %v934_v13, %v6056_v14 }
  0xdd   : > { %4325 = vmatpush3.msra.mxu0 %v961_v27  ;;  %v952_v27 = vmax.f32 %v950_v24, %v951_v25 }
  0xde   : > { %4326 = vmatprep.subr.mxu0 %v5479_v0  ;;  %v936_v18 = vadd.f32 %v935_v15, %v6060_v16 }
  0xdf   : > { %4327 = vmatpush3.msra.mxu0 %v960_v29  ;;  %v953_v29 = vrot.slane %v952_v27, 4 }
  0xe0   : > { %4329 = vmatmul.mubr.f32.vlgmr.msra.gmra.mxu0 %v959_v30  ;;  %4366 = vmatprep.subr.mxu0 %v5479_v0  ;;  %v937_v23 = vadd.f32 %v936_v18, %v6063_v17 }
  0xe1   : > { %4398 = vmatprep.mubr.msk.f32.mxu0 %vm5480_vm0, %v5479_v0  ;;  %4367 = vmatpush3.msra.mxu0 %v1157_v34  ;;  %v954_v31 = vmax.f32 %v952_v27, %v953_v29  ;;  %v3917_v27 = vld [vmem:[#allocation8] ss:$0 sm:$0xff] }
  0xe2   : > { %4368 = vmatprep.subr.mxu0 %v5479_v0  ;;  %v938_v26 = vrot.slane %v937_v23, 4 }
  0xe3   : > { %4369 = vmatpush3.msra.mxu0 %v1156_v35  ;;  %v955_v33 = vrot.slane %v954_v31, 2 }
  0xe4   : > { %4370 = vmatprep.subr.mxu0 %v5479_v0  ;;  %v939_v28 = vadd.f32 %v938_v26, %v937_v23 }
  0xe5   : > { %4371 = vmatpush3.msra.mxu0 %v1155_v36  ;;  %v956_v35 = vmax.f32 %v954_v31, %v955_v33 }
  0xe6   : > { %4372 = vmatprep.subr.mxu0 %v5479_v0  ;;  %v940_v30 = vrot.slane %v939_v28, 2 }
  0xe7   : > { %4373 = vmatpush3.msra.mxu0 %v1154_v37  ;;  %v957_v37 = vrot.slane %v956_v35, 1 }
  0xe8   : > { %4374 = vmatprep.subr.mxu0 %v5479_v0  ;;  %v941_v32 = vadd.f32 %v940_v30, %v939_v28 }
  0xe9   : > { %4375 = vmatpush3.msra.mxu0 %v1153_v38  ;;  %v1064_v38 = vld [vmem:[%s6529_s10] sm:$0x1] }
  0xea   : > { %4376 = vmatprep.subr.mxu0 %v5479_v0  ;;  %v942_v34 = vrot.slane %v941_v32, 1 }
  0xeb   : > { %4377 = vmatpush3.msra.mxu0 %v1152_v39 }
  0xec   : > { %4378 = vmatprep.subr.mxu0 %v5479_v0  ;;  %v943_v36 = vadd.f32 %v942_v34, %v941_v32 }
  0xed   : > { %4379 = vmatpush3.msra.mxu0 %v1151_v40  ;;  %v958_v40 = vmax.f32 %v956_v35, %v957_v37 }
  0xee   : > { %4380 = vmatprep.subr.mxu0 %v5479_v0  ;;  %v945_v39 = vmul.f32 0.015625, %v943_v36 }
  0xef   : > { %4381 = vmatpush3.msra.mxu0 %v1150_v41 }
  0xf0   : > { %4382 = vmatprep.subr.mxu0 %v5479_v0 }
  0xf1   : > { %4383 = vmatpush3.msra.mxu0 %v1149_v42 }
  0xf2   : > { %4384 = vmatprep.subr.mxu0 %v5479_v0 }
  0xf3   : > { %4385 = vmatpush3.msra.mxu0 %v1148_v43 }
  0xf4   : > { %4386 = vmatprep.subr.mxu0 %v5479_v0 }
  0xf5   : > { %4387 = vmatpush3.msra.mxu0 %v1147_v44  ;;  %v1139_v44 = vsel %vm1138_vm1, %v945_v39, %v958_v40 }
  0xf6   : > { %4388 = vmatprep.subr.mxu0 %v5479_v0 }
  0xf7   : > { %4389 = vmatpush3.msra.mxu0 %v1146_v45 }
  0xf8   : > { %4390 = vmatprep.subr.mxu0 %v5479_v0 }
  0xf9   : > { %4391 = vmatpush3.msra.mxu0 %v1145_v46 }
  0xfa   : > { %4392 = vmatprep.subr.mxu0 %v5479_v0 }
  0xfb   : > { %4393 = vmatpush3.msra.mxu0 %v1144_v52  ;;  %v1419_v52 = vld [vmem:[%s6089_s2 + $0x68] sm:$0xff] }
  0xfc   : > { %4394 = vmatprep.subr.mxu0 %v5479_v0 }
  0xfd   : > { %4395 = vmatpush3.msra.mxu0 %v1143_v53  ;;  %v1418_v53 = vld [vmem:[%s6089_s2 + $0x60] sm:$0xff] }
  0xfe   : > { %4396 = vmatprep.subr.mxu0 %v5479_v0 }
  0xff   : > { %4397 = vmatpush3.msra.mxu0 %v1142_v54  ;;  %v1417_v54 = vld [vmem:[%s6089_s2 + $0x58] sm:$0xff] }
 0x1a0   : > { %v1043_v48 = vpop.f32.mrf.mxu0 }
 0x1a1   : > { %v1044_v49 = vadd.f32 %v1043_v48, %v976_v47  ;;  %v1238_v47 = vld [vmem:[%s6613_s25 + $0x10] sm:$0xff]  ;;  %v1237_v48 = vld [vmem:[%s6613_s25 + $0x8] sm:$0xff] }
 0x1a2   : > { %v4330_v50 = vpop.f32.mrf.mxu0 }
 0x1a3   : > { %v1047_v51 = vmax.f32 %v1044_v49, 0.0  ;;  %v1236_v49 = vld [vmem:[%s6613_s25] sm:$0xff]  ;;  %v1421_v50 = vld [vmem:[%s6089_s2 + $0x78] sm:$0xff] }
 0x1a4   : > { %4436 = vmatprep.subr.mxu0 %v1421_v50 }
 0x1a5   : > { %4364 = vmatmul.mubr.f32.vlgmr.msra.gmra.mxu1 %v1047_v51  ;;  %v1420_v51 = vld [vmem:[%s6089_s2 + $0x70] sm:$0xff] }
 0x1a6   : > { %4433 = vmatprep.mubr.msk.f32.mxu1 %vm5480_vm0, %v5479_v0  ;;  %4402 = vmatpush3.msra.mxu1 %v1251_v55  ;;  %v1416_v55 = vld [vmem:[%s6089_s2 + $0x50] sm:$0xff] }
 0x1a7   : > { %4403 = vmatprep.subr.mxu1 %v5479_v0 }
 0x1a8   : > { %4404 = vmatpush3.msra.mxu1 %v1250_v56  ;;  %v1415_v56 = vld [vmem:[%s6089_s2 + $0x48] sm:$0xff] }
 0x1a9   : > { %4405 = vmatprep.subr.mxu1 %v5479_v0 }
 0x1aa   : > { %4406 = vmatpush3.msra.mxu1 %v1249_v57  ;;  %v1414_v57 = vld [vmem:[%s6089_s2 + $0x40] sm:$0xff] }
 0x1ab   : > { %4407 = vmatprep.subr.mxu1 %v5479_v0 }
 0x1ac   : > { %4408 = vmatpush3.msra.mxu1 %v1248_v58  ;;  %v1413_v58 = vld [vmem:[%s6089_s2 + $0x38] sm:$0xff] }
 0x1ad   : > { %4409 = vmatprep.subr.mxu1 %v5479_v0 }
 0x1ae   : > { %4410 = vmatpush3.msra.mxu1 %v1247_v59  ;;  %v1412_v59 = vld [vmem:[%s6089_s2 + $0x30] sm:$0xff] }
 0x1af   : > { %4411 = vmatprep.subr.mxu1 %v5479_v0 }
 0x1b0   : > { %4412 = vmatpush3.msra.mxu1 %v1246_v60  ;;  %v1411_v60 = vld [vmem:[%s6089_s2 + $0x28] sm:$0xff] }
 0x1b1   : > { %4413 = vmatprep.subr.mxu1 %v5479_v0 }
 0x1b2   : > { %4414 = vmatpush3.msra.mxu1 %v1245_v61  ;;  %v1410_v61 = vld [vmem:[%s6089_s2 + $0x20] sm:$0xff] }
 0x1b3   : > { %4415 = vmatprep.subr.mxu1 %v5479_v0 }
 0x1b4   : > { %4416 = vmatpush3.msra.mxu1 %v1244_v62  ;;  %v1409_v62 = vld [vmem:[%s6089_s2 + $0x18] sm:$0xff] }
 0x1b5   : > { %4417 = vmatprep.subr.mxu1 %v5479_v0 }
 0x1b6   : > { %4418 = vmatpush3.msra.mxu1 %v1243_v63  ;;  %v1408_v63 = vld [vmem:[%s6089_s2 + $0x10] sm:$0xff] }
 0x1b7   : > { %4419 = vmatprep.subr.mxu1 %v5479_v0 }
 0x1b8   : > { %4420 = vmatpush3.msra.mxu1 %v1242_v1  ;;  %v1407_v1 = vld [vmem:[%s6089_s2 + $0x8] sm:$0xff] }
 0x1b9   : > { %4421 = vmatprep.subr.mxu1 %v5479_v0 }
 0x1ba   : > { %4422 = vmatpush3.msra.mxu1 %v1241_v2  ;;  %v1406_v2 = vld [vmem:[%s6089_s2] sm:$0xff] }
 0x1bb   : > { %4423 = vmatprep.subr.mxu1 %v5479_v0 }
 0x1bc   : > { %4424 = vmatpush3.msra.mxu1 %v1240_v3  ;;  %v1403_v3 = vld [vmem:[%s6530_s11 + $0x8] sm:$0xff] }
 0x1bd   : > { %4425 = vmatprep.subr.mxu1 %v5479_v0 }
 0x1be   : > { %4426 = vmatpush3.msra.mxu1 %v1239_v4  ;;  %v1404_v4 = vld [vmem:[%s6530_s11 + $0x10] sm:$0xff] }
 0x1bf   : > { %4427 = vmatprep.subr.mxu1 %v5479_v0 }
 0x1c0   : > { %4428 = vmatpush3.msra.mxu1 %v1238_v47  ;;  %v1351_v47 = vlaneseq }
 0x1c1   : > { %4429 = vmatprep.subr.mxu1 %v5479_v0 }
 0x1c2   : > { %4430 = vmatpush3.msra.mxu1 %v1237_v48 }
 0x1c3   : > { %4431 = vmatprep.subr.mxu1 %v5479_v0  ;;  %v1402_v0 = vld [vmem:[%s6530_s11] sm:$0xff] }
 0x1c4   : > { %4432 = vmatpush3.msra.mxu1 %v1236_v49  ;;  %v1519_v49 = vld [vmem:[#allocation12] sm:$0xff] }
 0x265   : > { %v1131_v41 = vpop.f32.mrf.mxu1 }
 0x266   : > { %v1132_v42 = vadd.f32 %v1131_v41, %v1064_v38 }
 0x267   : > { %v4365_v43 = vpop.f32.mrf.mxu1 }
 0x268   : > { %v1136_v45 = vrot.slane %v1132_v42, 6 }
 0x26a   : > { %v1141_v46 = vsel %vm1140_vm2, %v1139_v44, %v1136_v45 }
 0x26b   : > { %4399 = vmatmul.mubr.f32.vlgmr.msra.gmra.mxu0 %v1141_v46 }
 0x26c   : > { %4437 = vmatpush3.msra.mxu0 %v1421_v50  ;;  %4468 = vmatprep.mubr.f32.mxu0 %v1402_v0 }
 0x26d   : > { %4438 = vmatprep.subr.mxu0 %v1420_v51 }
 0x26e   : > { %4439 = vmatpush3.msra.mxu0 %v1420_v51 }
 0x26f   : > { %4440 = vmatprep.subr.mxu0 %v1419_v52 }
 0x270   : > { %4441 = vmatpush3.msra.mxu0 %v1419_v52 }
 0x271   : > { %4442 = vmatprep.subr.mxu0 %v1418_v53 }
 0x272   : > { %4443 = vmatpush3.msra.mxu0 %v1418_v53 }
 0x273   : > { %4444 = vmatprep.subr.mxu0 %v1417_v54 }
 0x274   : > { %4445 = vmatpush3.msra.mxu0 %v1417_v54  ;;  %v1521_v54 = vld [vmem:[#allocation12 + $0x10] sm:$0xff] }
 0x275   : > { %4446 = vmatprep.subr.mxu0 %v1416_v55 }
 0x276   : > { %4447 = vmatpush3.msra.mxu0 %v1416_v55  ;;  %v1522_v55 = vld [vmem:[#allocation12 + $0x18] sm:$0xff] }
 0x277   : > { %4448 = vmatprep.subr.mxu0 %v1415_v56 }
 0x278   : > { %4449 = vmatpush3.msra.mxu0 %v1415_v56  ;;  %v1523_v56 = vld [vmem:[#allocation12 + $0x20] sm:$0xff] }
 0x279   : > { %4450 = vmatprep.subr.mxu0 %v1414_v57 }
 0x27a   : > { %4451 = vmatpush3.msra.mxu0 %v1414_v57  ;;  %v1524_v57 = vld [vmem:[#allocation12 + $0x28] sm:$0xff] }
 0x27b   : > { %4452 = vmatprep.subr.mxu0 %v1413_v58 }
 0x27c   : > { %4453 = vmatpush3.msra.mxu0 %v1413_v58  ;;  %v1525_v58 = vld [vmem:[#allocation12 + $0x30] sm:$0xff] }
 0x27d   : > { %4454 = vmatprep.subr.mxu0 %v1412_v59 }
 0x27e   : > { %4455 = vmatpush3.msra.mxu0 %v1412_v59  ;;  %v1526_v59 = vld [vmem:[#allocation12 + $0x38] sm:$0xff] }
 0x27f   : > { %4456 = vmatprep.subr.mxu0 %v1411_v60 }
 0x280   : > { %4457 = vmatpush3.msra.mxu0 %v1411_v60  ;;  %v1511_v60 = vld [vmem:[#allocation11] sm:$0xff] }
 0x281   : > { %4458 = vmatprep.subr.mxu0 %v1410_v61 }
 0x282   : > { %4459 = vmatpush3.msra.mxu0 %v1410_v61 }
 0x283   : > { %4460 = vmatprep.subr.mxu0 %v1409_v62 }
 0x284   : > { %4461 = vmatpush3.msra.mxu0 %v1409_v62 }
 0x285   : > { %4462 = vmatprep.subr.mxu0 %v1408_v63 }
 0x286   : > { %4463 = vmatpush3.msra.mxu0 %v1408_v63 }
 0x287   : > { %4464 = vmatprep.subr.mxu0 %v1407_v1 }
 0x288   : > { %4465 = vmatpush3.msra.mxu0 %v1407_v1 }
 0x289   : > { %4466 = vmatprep.subr.mxu0 %v1406_v2 }
 0x28a   : > { %4467 = vmatpush3.msra.mxu0 %v1406_v2 }
 0x28b   : > { %4469 = vmatmul.mubr.f32.vlgmr.msra.gmra.mxu0 %v1403_v3 }
 0x28c   : > { %4471 = vmatprep.mubr.f32.mxu0 %v1404_v4 }
 0x28f   : > { %4472 = vmatmul.mubr.f32.gmra.mxu0 %v1405_v7 }
 0x32b   : > { %v1231_v11 = vpop.f32.mrf.mxu0 }
 0x32c   : > { %v1232_v13 = vadd.f32 %v3916_v9, %v1231_v11 }
 0x32d   : > { %v4400_v15 = vpop.f32.mrf.mxu0 }
 0x32e   : > { %v1235_v18 = vmax.f32 %v1232_v13, 0.0 }
 0x330   : > { %4434 = vmatmul.mubr.f32.vlgmr.msra.gmra.mxu1 %v1235_v18 }
 0x331   : > { %4482 = vmatprep.mubr.msk.f32.mxu1 %vm1527_vm4, %v1519_v49 }
 0x34b   : > { %v4470_v19 = vpop.f32.mrf.mxu0 }
 0x34c   : > { %v1508_v24 = vmax.f32 %v4470_v19, 0.0 }
 0x34d   : > { %v1488_v20 = vpop.f32.mrf.mxu0 }
 0x34e   : > { %v1507_v26 = vmax.f32 %v1488_v20, 0.0 }
 0x34f   : > { %v4473_v21 = vpop.f32.mrf.mxu0 }
 0x350   : > { %v1510_v22 = vmax.f32 %v4473_v21, 0.0 }
 0x351   : > { %v1498_v23 = vpop.f32.mrf.mxu0 }
 0x352   : > { %v1509_v25 = vmax.f32 %v1498_v23, 0.0  ;;  %4474 = vmatprep.subr.mxu1 %v1510_v22 }
 0x353   : > { %4475 = vmatpush3.msra.mxu1 %v1510_v22 }
 0x354   : > { %4476 = vmatprep.subr.mxu1 %v1509_v25 }
 0x355   : > { %4477 = vmatpush3.msra.mxu1 %v1509_v25 }
 0x356   : > { %4478 = vmatprep.subr.mxu1 %v1508_v24 }
 0x357   : > { %4479 = vmatpush3.msra.mxu1 %v1508_v24 }
 0x358   : > { %4480 = vmatprep.subr.mxu1 %v1507_v26 }
 0x359   : > { %4481 = vmatpush3.msra.mxu1 %v1507_v26 }
 0x3f0   : > { %v1325_v28 = vpop.f32.mrf.mxu1 }
 0x3f1   : > { %v1326_v29 = vadd.f32 %v3917_v27, %v1325_v28 }
 0x3f2   : > { %v4435_v30 = vpop.f32.mrf.mxu1 }
 0x3f3   : > { %v1330_v31 = vsel %vm1329_vm3, %v1326_v29, 0.0  ;;  %v1512_v30 = vld [vmem:[#allocation11 + $0x8] sm:$0xff] }
 0x3f4   : > { %v1331_v32 = vrot.slane %v1330_v31, 4 }
 0x3f6   : > { %v1332_v33 = vadd.f32 %v1331_v32, %v1330_v31  ;;  %v1513_v31 = vld [vmem:[#allocation11 + $0x10] sm:$0xff]  ;;  %v1514_v32 = vld [vmem:[#allocation11 + $0x18] sm:$0xff] }
 0x3f8   : > { %v1333_v34 = vrot.slane %v1332_v33, 2 }
 0x3fa   : > { %v1334_v35 = vadd.f32 %v1333_v34, %v1332_v33  ;;  %v1515_v33 = vld [vmem:[#allocation11 + $0x20] sm:$0xff]  ;;  %v1516_v34 = vld [vmem:[#allocation11 + $0x28] sm:$0xff] }
 0x3fc   : > { %v1335_v36 = vrot.slane %v1334_v35, 1 }
 0x3fe   : > { %v1336_v37 = vadd.f32 %v1335_v36, %v1334_v35  ;;  %v1517_v35 = vld [vmem:[#allocation11 + $0x30] sm:$0xff]  ;;  %v1518_v36 = vld [vmem:[#allocation11 + $0x38] sm:$0xff] }
 0x400   : > { %v1337_v38 = vsub.f32 0.0, %v1336_v37  ;;  %v5481_v37 = vmov 0  }
 0x401   : > { %4985 = vset.pattern.permute.xlu1 %v5481_v37  ;;  %4984 = vset.pattern.permute.xlu0 %v5481_v37 }
 0x402   : > { %v1338_v39 = vmul.f32 1.442695, %v1337_v38  ;;  %v4986_v38 = vld [vmem:[#allocation15 + $0x38] sm:$0xff]  }
 0x403   : > { %4538 = vmatprep.subr.bf16.mxu0 %v4986_v38 }
 0x404   : > { %5074 = vpow2.f32 %v1338_v39  ;;  %v4987_v39 = vld [vmem:[#allocation15 + $0x30] sm:$0xff]   ;;  %4539 = vmatpush3.bf16.msra.mxu0 %v4986_v38 }
 0x405   : > { %4540 = vmatprep.subr.bf16.mxu0 %v4987_v39 }
 0x408   : > { %4541 = vmatpush3.bf16.msra.mxu0 %v4987_v39 }
 0x411   : > { %v5075_v40 = vpop.eup %5074 }
 0x412   : > { %v1340_v41 = vadd.f32 1.0, %v5075_v40  ;;  %v4988_v40 = vld [vmem:[#allocation15 + $0x28] sm:$0xff]  }
 0x413   : > { %4542 = vmatprep.subr.bf16.mxu0 %v4988_v40 }
 0x414   : > { %5076 = vrcp.f32 %v1340_v41  ;;  %v4989_v41 = vld [vmem:[#allocation15 + $0x20] sm:$0xff]   ;;  %4543 = vmatpush3.bf16.msra.mxu0 %v4988_v40 }
 0x415   : > { %4544 = vmatprep.subr.bf16.mxu0 %v4989_v41 }
 0x418   : > { %4545 = vmatpush3.bf16.msra.mxu0 %v4989_v41 }
 0x421   : > { %v5077_v42 = vpop.eup %5076 }
 0x422   : > { %v6124_v43 = vmul.f32 %v5077_v42, %v6063_v17  ;;  %v6127_v44 = vmul.f32 %v5077_v42, %v6056_v14  ;;  %v6132_v45 = vmul.f32 %v5077_v42, %v6060_v16  ;;  %v6135_v46 = vmul.f32 %v5077_v42, %v6052_v12 }
 0x423   : > { %v6140_v17 = vmul.f32 %v5077_v42, %v6048_v10  ;;  %v6143_v14 = vmul.f32 %v5077_v42, %v6044_v8  ;;  %v1352_v16 = vand.u32 127, %v1351_v47  ;;  %v6148_v48 = vmul.f32 %v5077_v42, %v6039_v6  ;;  %v1520_v8 = vld [vmem:[#allocation12 + $0x8] sm:$0xff] }
 0x424   : > { %1392 = vadd.xlane.f32.xlu0 %v6124_v43  ;;  %1388 = vadd.xlane.f32.xlu1 %v6127_v44  ;;  %v6151_v12 = vmul.f32 %v5077_v42, %v6036_v5  ;;  %v4990_v42 = vld [vmem:[#allocation15 + $0x18] sm:$0xff]  }
 0x425   : > { %vm1353_vm5 = vcmp.lt.s32.totalorder %v1352_v16, 32  ;;  %4483 = vmatmul.mubr.msk.f32.vlgmr.msra.gmra.mxu1 %vm1527_vm4, %v1520_v8  ;;  %4546 = vmatprep.subr.bf16.mxu0 %v4990_v42 }
 0x426   : > { %v1361_v10 = vsel %vm1353_vm5, %v6124_v43, -1e+30  ;;  %v1360_v6 = vsel %vm1353_vm5, %v6132_v45, -1e+30  ;;  %v1359_v5 = vsel %vm1353_vm5, %v6127_v44, -1e+30  ;;  %4485 = vmatprep.mubr.msk.f32.mxu1 %vm1527_vm4, %v1521_v54  ;;  %4547 = vmatpush3.bf16.msra.mxu0 %v4990_v42 }
 0x427   : > { %v1358_v50 = vsel %vm1353_vm5, %v6135_v46, -1e+30  ;;  %v1357_v51 = vsel %vm1353_vm5, %v6140_v17, -1e+30  ;;  %v1356_v52 = vsel %vm1353_vm5, %v6143_v14, -1e+30 }
 0x428   : > { %1390 = vadd.xlane.f32.xlu0 %v6132_v45  ;;  %1386 = vadd.xlane.f32.xlu1 %v6135_v46  ;;  %v1355_v53 = vsel %vm1353_vm5, %v6148_v48, -1e+30  ;;  %v1354_v0 = vsel %vm1353_vm5, %v6151_v12, -1e+30  ;;  %v1762_v54 = vld [vmem:[#allocation14] sm:$0xff] }
 0x429   : > { %4486 = vmatmul.mubr.msk.f32.gmra.mxu1 %vm1527_vm4, %v1522_v55 }
 0x42a   : > { %4488 = vmatprep.mubr.msk.f32.mxu1 %vm1527_vm4, %v1523_v56 }
 0x42c   : > { %1384 = vadd.xlane.f32.xlu0 %v6140_v17  ;;  %1382 = vadd.xlane.f32.xlu1 %v6143_v14 }
 0x42d   : > { %4489 = vmatmul.mubr.msk.f32.gmra.mxu1 %vm1527_vm4, %v1524_v57 }
 0x42e   : > { %4491 = vmatprep.mubr.msk.f32.mxu1 %vm1527_vm4, %v1525_v58  ;;  %v1765_v58 = vld [vmem:[#allocation14 + $0x18] sm:$0xff] }
 0x430   : > { %1380 = vadd.xlane.f32.xlu0 %v6148_v48  ;;  %1378 = vadd.xlane.f32.xlu1 %v6151_v12 }
 0x431   : > { %4492 = vmatmul.mubr.msk.f32.gmra.mxu1 %vm1527_vm4, %v1526_v59 }
 0x432   : > { %4526 = vmatprep.mubr.f32.mxu1 %v1511_v60 }
 0x434   : > { %1376 = vmax.xlane.f32.xlu0 %v1361_v10  ;;  %1374 = vmax.xlane.f32.xlu1 %v1360_v6 }
 0x438   : > { %1372 = vmax.xlane.f32.xlu0 %v1359_v5  ;;  %1370 = vmax.xlane.f32.xlu1 %v1358_v50 }
 0x43c   : > { %1368 = vmax.xlane.f32.xlu0 %v1357_v51  ;;  %1366 = vmax.xlane.f32.xlu1 %v1356_v52  ;;  %v1763_v52 = vld [vmem:[#allocation14 + $0x8] sm:$0xff] }
 0x440   : > { %1364 = vmax.xlane.f32.xlu0 %v1355_v53  ;;  %1362 = vmax.xlane.f32.xlu1 %v1354_v0 }
 0x4ad   : > { %v1393_v61 = vpop.xlane.xlu0 %1392  ;;  %v1389_v62 = vpop.xlane.xlu1 %1388 }
 0x4ae   : > { %v1401_v63 = vmul.f32 0.03125, %v1393_v61  ;;  %v1399_v4 = vmul.f32 0.03125, %v1389_v62 }
 0x4b0   : > { %4494 = vmatprep.subr.mxu1 %v1401_v63 }
 0x4b1   : > { %v1391_v1 = vpop.xlane.xlu0 %1390  ;;  %v1387_v2 = vpop.xlane.xlu1 %1386  ;;  %4495 = vmatpush3.msra.mxu1 %v1401_v63  ;;  %v1764_v63 = vld [vmem:[#allocation14 + $0x10] sm:$0xff] }
 0x4b2   : > { %v1400_v3 = vmul.f32 0.03125, %v1391_v1  ;;  %v1398_v11 = vmul.f32 0.03125, %v1387_v2 }
 0x4b4   : > { %4496 = vmatprep.subr.mxu1 %v1400_v3 }
 0x4b5   : > { %v1385_v7 = vpop.xlane.xlu0 %1384  ;;  %v1383_v9 = vpop.xlane.xlu1 %1382  ;;  %4497 = vmatpush3.msra.mxu1 %v1400_v3 }
 0x4b6   : > { %4498 = vmatprep.subr.mxu1 %v1399_v4  ;;  %v1397_v13 = vmul.f32 0.03125, %v1385_v7  ;;  %v1396_v19 = vmul.f32 0.03125, %v1383_v9 }
 0x4b7   : > { %4499 = vmatpush3.msra.mxu1 %v1399_v4 }
 0x4b8   : > { %4500 = vmatprep.subr.mxu1 %v1398_v11 }
 0x4b9   : > { %v1381_v15 = vpop.xlane.xlu0 %1380  ;;  %v1379_v18 = vpop.xlane.xlu1 %1378  ;;  %4501 = vmatpush3.msra.mxu1 %v1398_v11 }
 0x4ba   : > { %4502 = vmatprep.subr.mxu1 %v1397_v13  ;;  %v1395_v20 = vmul.f32 0.03125, %v1381_v15  ;;  %v1394_v23 = vmul.f32 0.03125, %v1379_v18  ;;  %v1767_v15 = vld [vmem:[#allocation14 + $0x28] sm:$0xff] }
 0x4bb   : > { %4503 = vmatpush3.msra.mxu1 %v1397_v13 }
 0x4bc   : > { %4504 = vmatprep.subr.mxu1 %v1396_v19 }
 0x4bd   : > { %v1377_v21 = vpop.xlane.xlu0 %1376  ;;  %v1375_v22 = vpop.xlane.xlu1 %1374  ;;  %4505 = vmatpush3.msra.mxu1 %v1396_v19 }
 0x4be   : > { %4506 = vmatprep.subr.mxu1 %v1395_v20 }
 0x4bf   : > { %4507 = vmatpush3.msra.mxu1 %v1395_v20  ;;  %v1766_v20 = vld [vmem:[#allocation14 + $0x20] sm:$0xff] }
 0x4c0   : > { %4508 = vmatprep.subr.mxu1 %v1394_v23 }
 0x4c1   : > { %v1373_v24 = vpop.xlane.xlu0 %1372  ;;  %4509 = vmatpush3.msra.mxu1 %v1394_v23  ;;  %v1371_v25 = vpop.xlane.xlu1 %1370 }
 0x4c2   : > { %4510 = vmatprep.subr.mxu1 %v1377_v21 }
 0x4c3   : > { %4511 = vmatpush3.msra.mxu1 %v1377_v21 }
 0x4c4   : > { %4512 = vmatprep.subr.mxu1 %v1375_v22 }
 0x4c5   : > { %4513 = vmatpush3.msra.mxu1 %v1375_v22  ;;  %v1369_v26 = vpop.xlane.xlu0 %1368  ;;  %v1367_v27 = vpop.xlane.xlu1 %1366 }
 0x4c6   : > { %4514 = vmatprep.subr.mxu1 %v1373_v24 }
 0x4c7   : > { %4515 = vmatpush3.msra.mxu1 %v1373_v24 }
 0x4c8   : > { %4516 = vmatprep.subr.mxu1 %v1371_v25 }
 0x4c9   : > { %4517 = vmatpush3.msra.mxu1 %v1371_v25  ;;  %v1365_v28 = vpop.xlane.xlu0 %1364  ;;  %v1363_v29 = vpop.xlane.xlu1 %1362 }
 0x4ca   : > { %4518 = vmatprep.subr.mxu1 %v1369_v26 }
 0x4cb   : > { %4519 = vmatpush3.msra.mxu1 %v1369_v26 }
 0x4cc   : > { %4520 = vmatprep.subr.mxu1 %v1367_v27 }
 0x4cd   : > { %4521 = vmatpush3.msra.mxu1 %v1367_v27 }
 0x4ce   : > { %4522 = vmatprep.subr.mxu1 %v1365_v28 }
 0x4cf   : > { %4523 = vmatpush3.msra.mxu1 %v1365_v28 }
 0x4d0   : > { %4524 = vmatprep.subr.mxu1 %v1363_v29 }
 0x4d1   : > { %4525 = vmatpush3.msra.mxu1 %v1363_v29 }
 0x4d2   : > { %4527 = vmatmul.mubr.f32.vlgmr.msra.gmra.mxu1 %v1512_v30 }
 0x4d3   : > { %4529 = vmatprep.mubr.f32.mxu1 %v1513_v31  ;;  %v1768_v31 = vld [vmem:[#allocation14 + $0x30] sm:$0xff] }
 0x4d6   : > { %4530 = vmatmul.mubr.f32.gmra.mxu1 %v1514_v32 }
 0x4d7   : > { %4532 = vmatprep.mubr.f32.mxu1 %v1515_v33  ;;  %v1769_v33 = vld [vmem:[#allocation14 + $0x38] sm:$0xff] }
 0x4da   : > { %4533 = vmatmul.mubr.f32.gmra.mxu1 %v1516_v34 }
 0x4db   : > { %4535 = vmatprep.mubr.f32.mxu1 %v1517_v35 }
 0x4de   : > { %4536 = vmatmul.mubr.f32.gmra.mxu1 %v1518_v36 }
 0x4e5   : > { %v4484_v47 = vpop.f32.mrf.mxu1 }
 0x4e7   : > { %v1618_v16 = vpop.f32.mrf.mxu1 }
 0x4e9   : > { %v4487_v49 = vpop.f32.mrf.mxu1 }
 0x4eb   : > { %v1628_v8 = vpop.f32.mrf.mxu1 }
 0x4ed   : > { %v4490_v10 = vpop.f32.mrf.mxu1 }
 0x4ef   : > { %v1638_v6 = vpop.f32.mrf.mxu1 }
 0x4f1   : > { %v4493_v5 = vpop.f32.mrf.mxu1 }
 0x4f3   : > { %v1648_v50 = vpop.f32.mrf.mxu1 }
 0x592   : > { %v4528_v51 = vpop.f32.mrf.mxu1 }
 0x593   : > { %v1729_v53 = vadd.f32 %v4528_v51, %v4484_v47 }
 0x594   : > { %v1723_v0 = vpop.f32.mrf.mxu1 }
 0x595   : > { %v1771_v55 = vadd.f32 %v1763_v52, %v1729_v53  ;;  %v1724_v56 = vadd.f32 %v1723_v0, %v1618_v16  ;;  %v4991_v0 = vld [vmem:[#allocation15 + $0x10] sm:$0xff]  }
 0x596   : > { %v4531_v57 = vpop.f32.mrf.mxu1  ;;  %4548 = vmatprep.subr.bf16.mxu0 %v4991_v0 }
 0x597   : > { %v1779_v59 = vsub.f32 0.0, %v1771_v55  ;;  %v1770_v60 = vadd.f32 %v1762_v54, %v1724_v56  ;;  %v1739_v61 = vadd.f32 %v4531_v57, %v4487_v49  ;;  %4549 = vmatpush3.bf16.msra.mxu0 %v4991_v0 }
 0x598   : > { %v1733_v62 = vpop.f32.mrf.mxu1 }
 0x599   : > { %v1788_v1 = vmul.f32 1.442695, %v1779_v59  ;;  %v1778_v2 = vsub.f32 0.0, %v1770_v60  ;;  %v1773_v3 = vadd.f32 %v1765_v58, %v1739_v61  ;;  %v1734_v4 = vadd.f32 %v1733_v62, %v1628_v8  ;;  %v4992_v58 = vld [vmem:[#allocation15 + $0x8] sm:$0xff]   ;;  %v4993_v62 = vld [vmem:[#allocation15] sm:$0xff]  }
 0x59a   : > { %v4534_v7 = vpop.f32.mrf.mxu1  ;;  %4550 = vmatprep.subr.bf16.mxu0 %v4992_v58 }
 0x59b   : > { %5078 = vpow2.f32 %v1788_v1  ;;  %v1786_v9 = vmul.f32 1.442695, %v1778_v2  ;;  %v1781_v11 = vsub.f32 0.0, %v1773_v3  ;;  %v1772_v13 = vadd.f32 %v1764_v63, %v1734_v4  ;;  %4551 = vmatpush3.bf16.msra.mxu0 %v4992_v58 }
 0x59c   : > { %v1749_v18 = vadd.f32 %v4534_v7, %v4490_v10  ;;  %v1743_v19 = vpop.f32.mrf.mxu1  ;;  %4552 = vmatprep.subr.bf16.mxu0 %v4993_v62 }
 0x59d   : > { %5080 = vpow2.f32 %v1786_v9  ;;  %v1792_v21 = vmul.f32 1.442695, %v1781_v11  ;;  %v1780_v22 = vsub.f32 0.0, %v1772_v13  ;;  %v1744_v23 = vadd.f32 %v1743_v19, %v1638_v6  ;;  %v4994_v9 = vld [vmem:[#allocation17 + $0x78] sm:$0xff]   ;;  %v4996_v13 = vld [vmem:[#allocation17 + $0x70] sm:$0xff]  }
 0x59e   : > { %v1775_v24 = vadd.f32 %v1767_v15, %v1749_v18  ;;  %v4537_v25 = vpop.f32.mrf.mxu1  ;;  %v4995_v11 = vld [vmem:[#allocation17 + $0x38] sm:$0xff]   ;;  %4562 = vmatprep.subr.bf16.mxu1 %v4994_v9  ;;  %v4998_v15 = vld [vmem:[#allocation17 + $0x68] sm:$0xff]  }
 0x59f   : > { %v1790_v26 = vmul.f32 1.442695, %v1780_v22  ;;  %v1774_v27 = vadd.f32 %v1766_v20, %v1744_v23  ;;  %5082 = vpow2.f32 %v1792_v21  ;;  %v1759_v29 = vadd.f32 %v4537_v25, %v4493_v5  ;;  %4553 = vmatpush3.bf16.msra.mxu0 %v4993_v62  ;;  %4563 = vmatpush3.bf16.msra.mxu1 %v4994_v9  ;;  %v6227_v62 = vld [vmem:[#allocation2] sm:$0xff] }
 0x5a0   : > { %v1783_v28 = vsub.f32 0.0, %v1775_v24  ;;  %v1753_v30 = vpop.f32.mrf.mxu1  ;;  %4586 = vmatprep.subr.bf16.mxu0 %v4995_v11  ;;  %4564 = vmatprep.subr.bf16.mxu1 %v4996_v13  ;;  %6616 = vst [vmem:[#allocation34_spill] sm:$0xff] %v6227_v62 }
 0x5a1   : > { %5084 = vpow2.f32 %v1790_v26  ;;  %v1782_v32 = vsub.f32 0.0, %v1774_v27  ;;  %v1754_v34 = vadd.f32 %v1753_v30, %v1648_v50  ;;  %v1777_v37 = vadd.f32 %v1769_v33, %v1759_v29 }
 0x5a2   : > { %v1796_v35 = vmul.f32 1.442695, %v1783_v28  ;;  %v4997_v28 = vld [vmem:[#allocation17 + $0x30] sm:$0xff]  }
 0x5a3   : > { %v1776_v36 = vadd.f32 %v1768_v31, %v1754_v34  ;;  %v1794_v38 = vmul.f32 1.442695, %v1782_v32  ;;  %v1785_v41 = vsub.f32 0.0, %v1777_v37  ;;  %4565 = vmatpush3.bf16.msra.mxu1 %v4996_v13  ;;  %v5004_v37 = vld [vmem:[#allocation17 + $0x50] sm:$0xff]  }
 0x5a4   : > { %5086 = vpow2.f32 %v1796_v35  ;;  %4566 = vmatprep.subr.bf16.mxu1 %v4998_v15  ;;  %v5000_v35 = vld [vmem:[#allocation17 + $0x60] sm:$0xff]  }
 0x5a5   : > { %v1784_v39 = vsub.f32 0.0, %v1776_v36  ;;  %5088 = vpow2.f32 %v1794_v38  ;;  %v1800_v8 = vmul.f32 1.442695, %v1785_v41  ;;  %v5001_v36 = vld [vmem:[#allocation17 + $0x20] sm:$0xff]   ;;  %v5006_v38 = vld [vmem:[#allocation17 + $0x48] sm:$0xff]   ;;  %v5010_v41 = vld [vmem:[#allocation17 + $0xb8] sm:$0xff]  }
 0x5a7   : > { %v1798_v42 = vmul.f32 1.442695, %v1784_v39  ;;  %4567 = vmatpush3.bf16.msra.mxu1 %v4998_v15  ;;  %v5008_v39 = vld [vmem:[#allocation17 + $0x40] sm:$0xff]  }
 0x5a8   : > { %v5079_v40 = vpop.eup %5078  ;;  %4568 = vmatprep.subr.bf16.mxu1 %v5000_v35 }
 0x5a9   : > { %v1803_v47 = vadd.f32 1.0, %v5079_v40  ;;  %v5007_v40 = vld [vmem:[#allocation17 + $0x8] sm:$0xff]  }
 0x5aa   : > { %v5081_v16 = vpop.eup %5080 }
 0x5ab   : > { %5090 = vrcp.f32 %v1803_v47  ;;  %v1802_v49 = vadd.f32 1.0, %v5081_v16  ;;  %4569 = vmatpush3.bf16.msra.mxu1 %v5000_v35  ;;  %v5011_v47 = vld [vmem:[#allocation17 + $0xf8] sm:$0xff]   ;;  %v5022_v35 = vld [vmem:[#allocation17 + $0x88] sm:$0xff]  }
 0x5ac   : > { %5092 = vpow2.f32 %v1798_v42  ;;  %v5083_v10 = vpop.eup %5082  ;;  %v5009_v42 = vld [vmem:[#allocation17] sm:$0xff]   ;;  %v3926_v16 = vld [vmem:[%s6535_s16] ss:$0 sm:$0xff] }
 0x5ad   : > { %5094 = vrcp.f32 %v1802_v49  ;;  %v1805_v50 = vadd.f32 1.0, %v5083_v10 }
 0x5ae   : > { %v5085_v6 = vpop.eup %5084  ;;  %5096 = vpow2.f32 %v1800_v8 }
 0x5af   : > { %v1804_v5 = vadd.f32 1.0, %v5085_v6 }
 0x5b1   : > { %5098 = vrcp.f32 %v1804_v5  ;;  %v5087_v51 = vpop.eup %5086 }
 0x5b2   : > { %5100 = vrcp.f32 %v1805_v50  ;;  %v1807_v52 = vadd.f32 1.0, %v5087_v51  ;;  %v5089_v53 = vpop.eup %5088  ;;  %v2087_v51 = vld [vmem:[#allocation2 + $0x1] sm:$0xff] }
 0x5b3   : > { %v1806_v56 = vadd.f32 1.0, %v5089_v53 }
 0x5b4   : > { %5102 = vrcp.f32 %v1807_v52 }
 0x5b5   : > { %5104 = vrcp.f32 %v1806_v56 }
 0x5b8   : > { %v5091_v54 = vpop.eup %5090 }
 0x5b9   : > { %v5093_v55 = vpop.eup %5092  ;;  %1833 = vperm.xlu1 %4985, %v5091_v54  }
 0x5ba   : > { %v5095_v57 = vpop.eup %5094  ;;  %v1808_v60 = vadd.f32 1.0, %v5093_v55 }
 0x5bb   : > { %1828 = vperm.xlu0 %4984, %v5095_v57   ;;  %v5097_v59 = vpop.eup %5096 }
 0x5bc   : > { %v1809_v63 = vadd.f32 1.0, %v5097_v59  ;;  %5106 = vrcp.f32 %v1808_v60  ;;  %v5012_v60 = vld [vmem:[#allocation17 + $0xb0] sm:$0xff]  }
 0x5be   : > { %v5099_v61 = vpop.eup %5098  ;;  %5108 = vrcp.f32 %v1809_v63 }
 0x5bf   : > { %1838 = vperm.xlu1 %4985, %v5099_v61   ;;  %v5101_v1 = vpop.eup %5100 }
 0x5c1   : > { %v5103_v2 = vpop.eup %5102 }
 0x5c2   : > { %v5105_v3 = vpop.eup %5104 }
 0x5c3   : > { %1843 = vperm.xlu1 %4985, %v5101_v1   ;;  %v5014_v1 = vld [vmem:[#allocation17 + $0xa8] sm:$0xff]  }
 0x5c7   : > { %1853 = vperm.xlu1 %4985, %v5103_v2  }
 0x5c9   : > { %v5107_v4 = vpop.eup %5106 }
 0x5cb   : > { %1848 = vperm.xlu1 %4985, %v5105_v3   ;;  %v5109_v7 = vpop.eup %5108 }
 0x5cf   : > { %1858 = vperm.xlu1 %4985, %v5107_v4  }
 0x5d3   : > { %1863 = vperm.xlu1 %4985, %v5109_v7  }
 0x634   : > { %v1834_v18 = vpop.permute.xlu1 %1833 }
 0x635   : > { %v1867_v19 = vmul.f32 %v1834_v18, %v6148_v48  ;;  %v5013_v18 = vld [vmem:[#allocation17 + $0xf0] sm:$0xff]  }
 0x636   : > { %v1829_v20 = vpop.permute.xlu0 %1828 }
 0x637   : > { %1875 = vst [vmem:[%s6184_s1 + $0x8] sm:$0xff] %v1867_v19  ;;  %v1866_v21 = vmul.f32 %v1829_v20, %v6151_v12  ;;  %v4999_v12 = vld [vmem:[#allocation17 + $0x28] sm:$0xff]  }
 0x639   : > { %1874 = vst [vmem:[%s6184_s1] sm:$0xff] %v1866_v21  ;;  %v1882_v22 = vpack.c.bf16 %v1867_v19, %v1866_v21  ;;  %v5016_v19 = vld [vmem:[#allocation17 + $0xa0] sm:$0xff]  }
 0x63a   : > { %v1839_v23 = vpop.permute.xlu1 %1838 }
 0x63b   : > { %v1868_v24 = vmul.f32 %v1839_v23, %v6143_v14  ;;  %4554 = vmatprep.mubr.bf16.mxu0 %v1882_v22 }
 0x63d   : > { %1876 = vst [vmem:[%s6184_s1 + $0x10] sm:$0xff] %v1868_v24 }
 0x63e   : > { %v1844_v25 = vpop.permute.xlu1 %1843 }
 0x63f   : > { %v1869_v26 = vmul.f32 %v1844_v25, %v6140_v17 }
 0x641   : > { %1877 = vst [vmem:[%s6184_s1 + $0x18] sm:$0xff] %v1869_v26  ;;  %v1883_v27 = vpack.c.bf16 %v1869_v26, %v1868_v24  ;;  %v5015_v26 = vld [vmem:[#allocation17 + $0xe8] sm:$0xff]  }
 0x642   : > { %v1854_v48 = vpop.permute.xlu1 %1853 }
 0x643   : > { %v1871_v29 = vmul.f32 %v1854_v48, %v6127_v44  ;;  %4555 = vmatmul.mubr.bf16.vlgmr.msra.gmra.mxu0 %v1883_v27 }
 0x644   : > { %4587 = vmatpush3.bf16.msra.mxu0 %v4995_v11 }
 0x645   : > { %1879 = vst [vmem:[%s6184_s1 + $0x28] sm:$0xff] %v1871_v29  ;;  %4588 = vmatprep.subr.bf16.mxu0 %v4997_v28 }
 0x646   : > { %v1849_v14 = vpop.permute.xlu1 %1848 }
 0x647   : > { %v1870_v30 = vmul.f32 %v1849_v14, %v6135_v46  ;;  %v5002_v46 = vld [vmem:[#allocation17 + $0x58] sm:$0xff]   ;;  %v5017_v14 = vld [vmem:[#allocation17 + $0xe0] sm:$0xff]  }
 0x648   : > { %4589 = vmatpush3.bf16.msra.mxu0 %v4997_v28  ;;  %4570 = vmatprep.subr.bf16.mxu1 %v5002_v46  ;;  %v5018_v28 = vld [vmem:[#allocation17 + $0x98] sm:$0xff]  }
 0x649   : > { %1878 = vst [vmem:[%s6184_s1 + $0x20] sm:$0xff] %v1870_v30  ;;  %v1884_v31 = vpack.c.bf16 %v1871_v29, %v1870_v30  ;;  %4590 = vmatprep.subr.bf16.mxu0 %v4999_v12  ;;  %4571 = vmatpush3.bf16.msra.mxu1 %v5002_v46  ;;  %v2342_v29 = vld [vmem:[#allocation2 + $0x2] sm:$0xff] }
 0x64a   : > { %v1859_v17 = vpop.permute.xlu1 %1858  ;;  %4572 = vmatprep.subr.bf16.mxu1 %v5004_v37 }
 0x64b   : > { %v1872_v32 = vmul.f32 %v1859_v17, %v6132_v45  ;;  %4558 = vmatprep.mubr.bf16.mxu0 %v1884_v31  ;;  %v5003_v45 = vld [vmem:[#allocation17 + $0x18] sm:$0xff]   ;;  %v5020_v31 = vld [vmem:[#allocation17 + $0x90] sm:$0xff]  }
 0x64c   : > { %4591 = vmatpush3.bf16.msra.mxu0 %v4999_v12 }
 0x64d   : > { %1880 = vst [vmem:[%s6184_s1 + $0x30] sm:$0xff] %v1872_v32  ;;  %4592 = vmatprep.subr.bf16.mxu0 %v5001_v36  ;;  %4573 = vmatpush3.bf16.msra.mxu1 %v5004_v37 }
 0x64e   : > { %v1864_v44 = vpop.permute.xlu1 %1863  ;;  %4574 = vmatprep.subr.bf16.mxu1 %v5006_v38 }
 0x64f   : > { %v1873_v33 = vmul.f32 %v1864_v44, %v6124_v43  ;;  %v5005_v43 = vld [vmem:[#allocation17 + $0x10] sm:$0xff]  }
 0x650   : > { %4593 = vmatpush3.bf16.msra.mxu0 %v5001_v36 }
 0x651   : > { %1881 = vst [vmem:[%s6184_s1 + $0x38] sm:$0xff] %v1873_v33  ;;  %v1885_v34 = vpack.c.bf16 %v1873_v33, %v1872_v32  ;;  %4594 = vmatprep.subr.bf16.mxu0 %v5003_v45  ;;  %4575 = vmatpush3.bf16.msra.mxu1 %v5006_v38  ;;  %s6484_s1 = scalar_lea.hbm %s6643_s29, %s4017_s13 }
 0x652   : > { %4576 = vmatprep.subr.bf16.mxu1 %v5008_v39 }
 0x653   : > { %4559 = vmatmul.mubr.bf16.gmra.mxu0 %v1885_v34  ;;  %v5019_v34 = vld [vmem:[#allocation17 + $0xd8] sm:$0xff]  }
 0x654   : > { %4595 = vmatpush3.bf16.msra.mxu0 %v5003_v45  ;;  %v5021_v45 = vld [vmem:[#allocation17 + $0xd0] sm:$0xff]  }
 0x655   : > { %4596 = vmatprep.subr.bf16.mxu0 %v5005_v43  ;;  %4577 = vmatpush3.bf16.msra.mxu1 %v5008_v39  ;;  %v5023_v39 = vld [vmem:[#allocation17 + $0xc8] sm:$0xff]  }
 0x656   : > { %4610 = vmatprep.subr.bf16.mxu1 %v5010_v41 }
 0x658   : > { %4597 = vmatpush3.bf16.msra.mxu0 %v5005_v43  ;;  %v5024_v43 = vld [vmem:[#allocation17 + $0x80] sm:$0xff]  }
 0x659   : > { %4598 = vmatprep.subr.bf16.mxu0 %v5007_v40 }
 0x65c   : > { %4599 = vmatpush3.bf16.msra.mxu0 %v5007_v40  ;;  %v5026_v40 = vld [vmem:[#allocation17 + $0x138] sm:$0xff]  }
 0x65d   : > { %4600 = vmatprep.subr.bf16.mxu0 %v5009_v42 }
 0x660   : > { %4601 = vmatpush3.bf16.msra.mxu0 %v5009_v42 }
 0x661   : > { %4634 = vmatprep.subr.bf16.mxu0 %v5011_v47 }
 0x703   : > { %v4556_v49 = vpop.f32.mrf.mxu0 }
 0x704   : > { %v2000_v8 = vadd.f32 %v4556_v49, %v3926_v16 }
 0x705   : > { %v1991_v10 = vpop.f32.mrf.mxu0 }
 0x706   : > { %v6205_v6 = vmax.f32 %v2000_v8, 0.0  ;;  %v1992_v5 = vadd.f32 %v3926_v16, %v1991_v10 }
 0x707   : > { %v4557_v50 = vpop.f32.mrf.mxu0 }
 0x708   : > { %2053 = vst [vmem:[#allocation2 + $0x31] sm:$0xff] %v6205_v6  ;;  %v6208_v52 = vmax.f32 %v1992_v5, 0.0  ;;  %v2003_v53 = vadd.f32 %v4557_v50, %v3926_v16  ;;  %v5028_v5 = vld [vmem:[#allocation17 + $0x130] sm:$0xff]   ;;  %v5027_v50 = vld [vmem:[#allocation17 + $0x178] sm:$0xff]  }
 0x709   : > { %v1994_v0 = vpop.f32.mrf.mxu0 }
 0x70a   : > { %2051 = vst [vmem:[#allocation2 + $0x11] sm:$0xff] %v6208_v52  ;;  %v6211_v54 = vmax.f32 %v2003_v53, 0.0  ;;  %v1995_v55 = vadd.f32 %v3926_v16, %v1994_v0  ;;  %v2095_v56 = vpack.c.bf16 %v6208_v52, %v2087_v51  ;;  %v5030_v51 = vld [vmem:[#allocation17 + $0x128] sm:$0xff]  }
 0x70c   : > { %2054 = vst [vmem:[#allocation2 + $0x41] sm:$0xff] %v6211_v54  ;;  %v6215_v57 = vmax.f32 %v1995_v55, 0.0  ;;  %4578 = vmatprep.mubr.bf16.mxu1 %v2095_v56  ;;  %v2651_v58 = vpack.c.bf16 %v6211_v54, %v6205_v6  ;;  %v5029_v55 = vld [vmem:[#allocation17 + $0x170] sm:$0xff]  }
 0x70e   : > { %2052 = vst [vmem:[#allocation2 + $0x21] sm:$0xff] %v6215_v57  ;;  %v6222_v59 = vpack.c.bf16 %v6205_v6, %v6215_v57 }
 0x70f   : > { %v6233_v9 = vld [vmem:[#allocation2 + $0x30] sm:$0xff] }
 0x710   : > { %4579 = vmatmul.mubr.bf16.vlgmr.msra.gmra.mxu1 %v6222_v59 }
 0x711   : > { %v6225_v61 = vld [vmem:[#allocation2 + $0x10] sm:$0xff]  ;;  %4611 = vmatpush3.bf16.msra.mxu1 %v5010_v41 }
 0x712   : > { %v2067_v63 = vpack.c.bf16 %v6225_v61, %v6227_v62  ;;  %4612 = vmatprep.subr.bf16.mxu1 %v5012_v60  ;;  %v6256_v12 = vld [vmem:[#allocation2 + $0x12] sm:$0xff] }
 0x713   : > { %v4560_v2 = vpop.f32.mrf.mxu0  ;;  %v2350_v17 = vpack.c.bf16 %v6256_v12, %v2342_v29  ;;  %v2063_v32 = vld [vmem:[#allocation2 + $0x40] sm:$0xff] }
 0x714   : > { %v2016_v3 = vadd.f32 %v4560_v2, %v3926_v16  ;;  %4602 = vmatprep.mubr.bf16.mxu0 %v2067_v63  ;;  %v6283_v8 = vld [vmem:[#allocation2 + $0x42] sm:$0xff]  ;;  %v2501_v0 = vpack.c.bf16 %v2063_v32, %v6233_v9  ;;  %v5031_v2 = vld [vmem:[#allocation17 + $0x168] sm:$0xff]  }
 0x715   : > { %v2007_v4 = vpop.f32.mrf.mxu0  ;;  %v6231_v7 = vld [vmem:[#allocation2 + $0x20] sm:$0xff]  ;;  %4613 = vmatpush3.bf16.msra.mxu1 %v5012_v60 }
 0x716   : > { %v6235_v11 = vmax.f32 %v2016_v3, 0.0  ;;  %v2008_v13 = vadd.f32 %v3926_v16, %v2007_v4  ;;  %v6239_v15 = vpack.c.bf16 %v6233_v9, %v6231_v7  ;;  %4614 = vmatprep.subr.bf16.mxu1 %v5014_v1  ;;  %v2500_v38 = vpack.c.bf16 %v6231_v7, %v6225_v61  ;;  %v2344_v41 = vld [vmem:[#allocation2 + $0x22] sm:$0xff] }
 0x717   : > { %v4561_v20 = vpop.f32.mrf.mxu0  ;;  %v5032_v63 = vld [vmem:[#allocation17 + $0x120] sm:$0xff]   ;;  %v5034_v4 = vld [vmem:[#allocation17 + $0x118] sm:$0xff]  }
 0x718   : > { %2057 = vst [vmem:[#allocation2 + $0x71] sm:$0xff] %v6235_v11  ;;  %v6242_v21 = vmax.f32 %v2008_v13, 0.0  ;;  %v2019_v22 = vadd.f32 %v4561_v20, %v3926_v16  ;;  %4603 = vmatmul.mubr.bf16.vlgmr.msra.gmra.mxu0 %v6239_v15  ;;  %v5033_v9 = vld [vmem:[#allocation17 + $0x160] sm:$0xff]   ;;  %v2800_v13 = vpack.c.bf16 %v2344_v41, %v6256_v12  ;;  %v5043_v29 = vld [vmem:[#allocation17 + $0x1f8] sm:$0xff]   ;;  %v5046_v12 = vld [vmem:[#allocation17 + $0x1a8] sm:$0xff]  }
 0x719   : > { %4635 = vmatpush3.bf16.msra.mxu0 %v5011_v47  ;;  %v2010_v23 = vpop.f32.mrf.mxu0  ;;  %4615 = vmatpush3.bf16.msra.mxu1 %v5014_v1  ;;  %v5025_v47 = vld [vmem:[#allocation17 + $0xc0] sm:$0xff]   ;;  %v2650_v1 = vpack.c.bf16 %v6215_v57, %v6208_v52  ;;  %v5036_v52 = vld [vmem:[#allocation17 + $0x110] sm:$0xff]   ;;  %v5035_v57 = vld [vmem:[#allocation17 + $0x158] sm:$0xff]  }
 0x71a   : > { %2055 = vst [vmem:[#allocation2 + $0x51] sm:$0xff] %v6242_v21  ;;  %v6246_v24 = vmax.f32 %v2019_v22, 0.0  ;;  %v2011_v25 = vadd.f32 %v3926_v16, %v2010_v23  ;;  %4636 = vmatprep.subr.bf16.mxu0 %v5013_v18  ;;  %4616 = vmatprep.subr.bf16.mxu1 %v5016_v19  ;;  %v6250_v27 = vpack.c.bf16 %v6242_v21, %v6211_v54  ;;  %v6278_v16 = vld [vmem:[#allocation2 + $0x32] sm:$0xff]  ;;  %v5040_v20 = vld [vmem:[#allocation17 + $0x100] sm:$0xff]   ;;  %v5042_v23 = vld [vmem:[#allocation17 + $0x1b8] sm:$0xff]  }
 0x71b   : > { %v6281_v49 = vpack.c.bf16 %v6278_v16, %v2344_v41  ;;  %v5039_v22 = vld [vmem:[#allocation17 + $0x148] sm:$0xff]   ;;  %v5048_v54 = vld [vmem:[#allocation17 + $0x1a0] sm:$0xff]  }
 0x71c   : > { %2058 = vst [vmem:[#allocation2 + $0x81] sm:$0xff] %v6246_v24  ;;  %v6253_v48 = vmax.f32 %v2011_v25, 0.0  ;;  %4582 = vmatprep.mubr.bf16.mxu1 %v6250_v27  ;;  %v5041_v25 = vld [vmem:[#allocation17 + $0x140] sm:$0xff]   ;;  %v2653_v6 = vpack.c.bf16 %v6246_v24, %v6235_v11  ;;  %v3100_v41 = vld [vmem:[#allocation2 + $0x91] sm:$0xff] }
 0x71d   : > { %4637 = vmatpush3.bf16.msra.mxu0 %v5013_v18  ;;  %4617 = vmatpush3.bf16.msra.mxu1 %v5016_v19  ;;  %v5038_v18 = vld [vmem:[#allocation17 + $0x108] sm:$0xff]   ;;  %v5037_v19 = vld [vmem:[#allocation17 + $0x150] sm:$0xff]  }
 0x71e   : > { %2056 = vst [vmem:[#allocation2 + $0x61] sm:$0xff] %v6253_v48  ;;  %4638 = vmatprep.subr.bf16.mxu0 %v5015_v26  ;;  %4618 = vmatprep.subr.bf16.mxu1 %v5018_v28  ;;  %v6261_v30 = vpack.c.bf16 %v6235_v11, %v6253_v48  ;;  %v5049_v11 = vld [vmem:[#allocation17 + $0x1e0] sm:$0xff]  }
 0x71f   : > { %v6268_v36 = vld [vmem:[#allocation2 + $0x70] sm:$0xff] }
 0x720   : > { %4583 = vmatmul.mubr.bf16.gmra.mxu1 %v6261_v30  ;;  %v6294_v60 = vld [vmem:[#allocation2 + $0x72] sm:$0xff] }
 0x721   : > { %4639 = vmatpush3.bf16.msra.mxu0 %v5015_v26  ;;  %v2064_v44 = vld [vmem:[#allocation2 + $0x50] sm:$0xff]  ;;  %4619 = vmatpush3.bf16.msra.mxu1 %v5018_v28  ;;  %v2652_v28 = vpack.c.bf16 %v6253_v48, %v6242_v21  ;;  %v5050_v48 = vld [vmem:[#allocation17 + $0x198] sm:$0xff]  }
 0x722   : > { %4640 = vmatprep.subr.bf16.mxu0 %v5017_v14  ;;  %v6265_v33 = vpack.c.bf16 %v2064_v44, %v2063_v32  ;;  %4626 = vmatprep.mubr.bf16.mxu1 %v2350_v17  ;;  %v6276_v42 = vld [vmem:[#allocation2 + $0x52] sm:$0xff] }
 0x723   : > { %4620 = vmatprep.subr.bf16.mxu1 %v5020_v31  ;;  %v6287_v10 = vpack.c.bf16 %v6276_v42, %v6283_v8  ;;  %v6303_v3 = vld [vmem:[#allocation2 + $0x80] sm:$0xff]  ;;  %v5044_v26 = vld [vmem:[#allocation17 + $0x1b0] sm:$0xff]  }
 0x724   : > { %4606 = vmatprep.mubr.bf16.mxu0 %v6265_v33  ;;  %v2503_v7 = vpack.c.bf16 %v6303_v3, %v6268_v36  ;;  %v6319_v21 = vld [vmem:[#allocation2 + $0x82] sm:$0xff] }
 0x725   : > { %4641 = vmatpush3.bf16.msra.mxu0 %v5017_v14  ;;  %v2065_v46 = vld [vmem:[#allocation2 + $0x60] sm:$0xff]  ;;  %4621 = vmatpush3.bf16.msra.mxu1 %v5020_v31  ;;  %v2801_v14 = vpack.c.bf16 %v6283_v8, %v6278_v16  ;;  %v5045_v31 = vld [vmem:[#allocation17 + $0x1f0] sm:$0xff]   ;;  %v2803_v32 = vpack.c.bf16 %v6319_v21, %v6294_v60  ;;  %v5068_v8 = vld [vmem:[#allocation18 + $0x28] sm:$0xff]  }
 0x726   : > { %4642 = vmatprep.subr.bf16.mxu0 %v5019_v34  ;;  %v6271_v37 = vpack.c.bf16 %v6268_v36, %v2065_v46  ;;  %4622 = vmatprep.subr.bf16.mxu1 %v5022_v35  ;;  %v6291_v53 = vld [vmem:[#allocation2 + $0x62] sm:$0xff]  ;;  %v2502_v56 = vpack.c.bf16 %v2065_v46, %v2064_v44  ;;  %v5052_v44 = vld [vmem:[#allocation17 + $0x190] sm:$0xff]   ;;  %v5055_v36 = vld [vmem:[#allocation17 + $0x1c8] sm:$0xff]  }
 0x727   : > { %v6298_v61 = vpack.c.bf16 %v6294_v60, %v6291_v53  ;;  %v2802_v17 = vpack.c.bf16 %v6291_v53, %v6276_v42  ;;  %v5056_v46 = vld [vmem:[#allocation17 + $0x180] sm:$0xff]   ;;  %v5064_v42 = vld [vmem:[#allocation17 + $0x208] sm:$0xff]   ;;  %v5066_v16 = vld [vmem:[#allocation18 + $0x38] sm:$0xff]  }
 0x728   : > { %4607 = vmatmul.mubr.bf16.gmra.mxu0 %v6271_v37  ;;  %v5073_v53 = vld [vmem:[#allocation18] sm:$0xff]  }
 0x729   : > { %4643 = vmatpush3.bf16.msra.mxu0 %v5019_v34  ;;  %4650 = vmatprep.mubr.bf16.mxu0 %v2500_v38  ;;  %v5051_v34 = vld [vmem:[#allocation17 + $0x1d8] sm:$0xff]   ;;  %v5059_v38 = vld [vmem:[#allocation17 + $0x230] sm:$0xff]  }
 0x72a   : > { %4644 = vmatprep.subr.bf16.mxu0 %v5021_v45  ;;  %4623 = vmatpush3.bf16.msra.mxu1 %v5022_v35  ;;  %v5053_v35 = vld [vmem:[#allocation17 + $0x1d0] sm:$0xff]  }
 0x72b   : > { %4624 = vmatprep.subr.bf16.mxu1 %v5024_v43 }
 0x72d   : > { %4645 = vmatpush3.bf16.msra.mxu0 %v5021_v45  ;;  %v5058_v45 = vld [vmem:[#allocation17 + $0x238] sm:$0xff]  }
 0x72e   : > { %4646 = vmatprep.subr.bf16.mxu0 %v5023_v39  ;;  %4625 = vmatpush3.bf16.msra.mxu1 %v5024_v43  ;;  %v5060_v43 = vld [vmem:[#allocation17 + $0x228] sm:$0xff]  }
 0x72f   : > { %4658 = vmatprep.subr.bf16.mxu1 %v5026_v40 }
 0x731   : > { %4647 = vmatpush3.bf16.msra.mxu0 %v5023_v39  ;;  %4627 = vmatmul.mubr.bf16.vlgmr.msra.gmra.mxu1 %v6281_v49  ;;  %v2954_v39 = vpack.c.bf16 %v6227_v62, %v6303_v3 }
 0x732   : > { %4648 = vmatprep.subr.bf16.mxu0 %v5025_v47  ;;  %4630 = vmatprep.mubr.bf16.mxu1 %v6287_v10 }
 0x733   : > { %4659 = vmatpush3.bf16.msra.mxu1 %v5026_v40  ;;  %v5061_v40 = vld [vmem:[#allocation17 + $0x220] sm:$0xff]  }
 0x734   : > { %4660 = vmatprep.subr.bf16.mxu1 %v5028_v5 }
 0x735   : > { %4649 = vmatpush3.bf16.msra.mxu0 %v5025_v47  ;;  %v5065_v47 = vld [vmem:[#allocation17 + $0x200] sm:$0xff]  }
 0x736   : > { %4682 = vmatprep.subr.bf16.mxu0 %v5027_v50 }
 0x737   : > { %4661 = vmatpush3.bf16.msra.mxu1 %v5028_v5  ;;  %v5069_v5 = vld [vmem:[#allocation18 + $0x20] sm:$0xff]  }
 0x738   : > { %4651 = vmatmul.mubr.bf16.vlgmr.msra.gmra.mxu0 %v2501_v0  ;;  %4662 = vmatprep.subr.bf16.mxu1 %v5030_v51 }
 0x739   : > { %4654 = vmatprep.mubr.bf16.mxu0 %v2502_v56  ;;  %4683 = vmatpush3.bf16.msra.mxu0 %v5027_v50  ;;  %v5071_v50 = vld [vmem:[#allocation18 + $0x10] sm:$0xff]  }
 0x73a   : > { %4684 = vmatprep.subr.bf16.mxu0 %v5029_v55  ;;  %4631 = vmatmul.mubr.bf16.gmra.mxu1 %v6298_v61 }
 0x73b   : > { %4663 = vmatpush3.bf16.msra.mxu1 %v5030_v51  ;;  %4674 = vmatprep.mubr.bf16.mxu1 %v2650_v1  ;;  %v5072_v51 = vld [vmem:[#allocation18 + $0x8] sm:$0xff]  }
 0x73c   : > { %4664 = vmatprep.subr.bf16.mxu1 %v5032_v63 }
 0x73d   : > { %4685 = vmatpush3.bf16.msra.mxu0 %v5029_v55 }
 0x73e   : > { %4686 = vmatprep.subr.bf16.mxu0 %v5031_v2 }
 0x73f   : > { %4665 = vmatpush3.bf16.msra.mxu1 %v5032_v63 }
 0x740   : > { %4655 = vmatmul.mubr.bf16.gmra.mxu0 %v2503_v7  ;;  %4666 = vmatprep.subr.bf16.mxu1 %v5034_v4 }
 0x741   : > { %4687 = vmatpush3.bf16.msra.mxu0 %v5031_v2  ;;  %4698 = vmatprep.mubr.bf16.mxu0 %v2800_v13 }
 0x742   : > { %4688 = vmatprep.subr.bf16.mxu0 %v5033_v9 }
 0x743   : > { %4667 = vmatpush3.bf16.msra.mxu1 %v5034_v4 }
 0x744   : > { %4668 = vmatprep.subr.bf16.mxu1 %v5036_v52 }
 0x745   : > { %4689 = vmatpush3.bf16.msra.mxu0 %v5033_v9 }
 0x746   : > { %4690 = vmatprep.subr.bf16.mxu0 %v5035_v57 }
 0x747   : > { %4669 = vmatpush3.bf16.msra.mxu1 %v5036_v52 }
 0x748   : > { %4670 = vmatprep.subr.bf16.mxu1 %v5038_v18 }
 0x749   : > { %4691 = vmatpush3.bf16.msra.mxu0 %v5035_v57 }
 0x74a   : > { %4692 = vmatprep.subr.bf16.mxu0 %v5037_v19 }
 0x74b   : > { %4671 = vmatpush3.bf16.msra.mxu1 %v5038_v18 }
 0x74c   : > { %4672 = vmatprep.subr.bf16.mxu1 %v5040_v20 }
 0x74d   : > { %4693 = vmatpush3.bf16.msra.mxu0 %v5037_v19 }
 0x74e   : > { %4694 = vmatprep.subr.bf16.mxu0 %v5039_v22 }
 0x74f   : > { %4673 = vmatpush3.bf16.msra.mxu1 %v5040_v20 }
 0x750   : > { %4706 = vmatprep.subr.bf16.mxu1 %v5042_v23 }
 0x751   : > { %4695 = vmatpush3.bf16.msra.mxu0 %v5039_v22 }
 0x752   : > { %4696 = vmatprep.subr.bf16.mxu0 %v5041_v25  ;;  %4675 = vmatmul.mubr.bf16.vlgmr.msra.gmra.mxu1 %v2651_v58  ;;  %v5047_v58 = vld [vmem:[#allocation17 + $0x1e8] sm:$0xff]  }
 0x753   : > { %4678 = vmatprep.mubr.bf16.mxu1 %v2652_v28  ;;  %4707 = vmatpush3.bf16.msra.mxu1 %v5042_v23 }
 0x754   : > { %4708 = vmatprep.subr.bf16.mxu1 %v5044_v26 }
 0x755   : > { %4697 = vmatpush3.bf16.msra.mxu0 %v5041_v25 }
 0x756   : > { %4730 = vmatprep.subr.bf16.mxu0 %v5043_v29 }
 0x757   : > { %4709 = vmatpush3.bf16.msra.mxu1 %v5044_v26 }
 0x758   : > { %4699 = vmatmul.mubr.bf16.vlgmr.msra.gmra.mxu0 %v2801_v14  ;;  %4710 = vmatprep.subr.bf16.mxu1 %v5046_v12 }
 0x759   : > { %4702 = vmatprep.mubr.bf16.mxu0 %v2802_v17  ;;  %4731 = vmatpush3.bf16.msra.mxu0 %v5043_v29 }
 0x75a   : > { %4732 = vmatprep.subr.bf16.mxu0 %v5045_v31  ;;  %4679 = vmatmul.mubr.bf16.gmra.mxu1 %v2653_v6 }
 0x75b   : > { %4711 = vmatpush3.bf16.msra.mxu1 %v5046_v12  ;;  %4722 = vmatprep.mubr.bf16.mxu1 %v6239_v15  ;;  %v5054_v15 = vld [vmem:[#allocation17 + $0x188] sm:$0xff]  }
 0x75c   : > { %4712 = vmatprep.subr.bf16.mxu1 %v5048_v54 }
 0x75d   : > { %4733 = vmatpush3.bf16.msra.mxu0 %v5045_v31 }
 0x75e   : > { %4734 = vmatprep.subr.bf16.mxu0 %v5047_v58 }
 0x75f   : > { %4713 = vmatpush3.bf16.msra.mxu1 %v5048_v54 }
 0x760   : > { %4703 = vmatmul.mubr.bf16.gmra.mxu0 %v2803_v32  ;;  %4714 = vmatprep.subr.bf16.mxu1 %v5050_v48 }
 0x761   : > { %4735 = vmatpush3.bf16.msra.mxu0 %v5047_v58  ;;  %4746 = vmatprep.mubr.bf16.mxu0 %v6222_v59  ;;  %v5057_v59 = vld [vmem:[#allocation17 + $0x1c0] sm:$0xff]  }
 0x762   : > { %4736 = vmatprep.subr.bf16.mxu0 %v5049_v11 }
 0x763   : > { %4715 = vmatpush3.bf16.msra.mxu1 %v5050_v48 }
 0x764   : > { %4716 = vmatprep.subr.bf16.mxu1 %v5052_v44 }
 0x765   : > { %4737 = vmatpush3.bf16.msra.mxu0 %v5049_v11 }
 0x766   : > { %4738 = vmatprep.subr.bf16.mxu0 %v5051_v34 }
 0x767   : > { %4717 = vmatpush3.bf16.msra.mxu1 %v5052_v44 }
 0x768   : > { %4718 = vmatprep.subr.bf16.mxu1 %v5054_v15 }
 0x769   : > { %4739 = vmatpush3.bf16.msra.mxu0 %v5051_v34 }
 0x76a   : > { %4740 = vmatprep.subr.bf16.mxu0 %v5053_v35 }
 0x76b   : > { %4719 = vmatpush3.bf16.msra.mxu1 %v5054_v15 }
 0x76c   : > { %4720 = vmatprep.subr.bf16.mxu1 %v5056_v46 }
 0x76d   : > { %4741 = vmatpush3.bf16.msra.mxu0 %v5053_v35 }
 0x76e   : > { %4742 = vmatprep.subr.bf16.mxu0 %v5055_v36 }
 0x76f   : > { %4721 = vmatpush3.bf16.msra.mxu1 %v5056_v46 }
 0x770   : > { %4754 = vmatprep.subr.bf16.mxu1 %v5058_v45 }
 0x771   : > { %4743 = vmatpush3.bf16.msra.mxu0 %v5055_v36 }
 0x772   : > { %4744 = vmatprep.subr.bf16.mxu0 %v5057_v59  ;;  %4723 = vmatmul.mubr.bf16.vlgmr.msra.gmra.mxu1 %v6265_v33  ;;  %v5062_v33 = vld [vmem:[#allocation17 + $0x218] sm:$0xff]  }
 0x773   : > { %4726 = vmatprep.mubr.bf16.mxu1 %v6271_v37  ;;  %4755 = vmatpush3.bf16.msra.mxu1 %v5058_v45  ;;  %v3104_v37 = vpack.c.bf16 %v3100_v41, %v6246_v24  ;;  %v3250_v24 = vld [vmem:[#allocation2 + $0x92] sm:$0xff] }
 0x774   : > { %4756 = vmatprep.subr.bf16.mxu1 %v5059_v38 }
 0x775   : > { %4745 = vmatpush3.bf16.msra.mxu0 %v5057_v59 }
 0x776   : > { %4778 = vmatprep.subr.bf16.mxu0 %v5066_v16 }
 0x777   : > { %4757 = vmatpush3.bf16.msra.mxu1 %v5059_v38 }
 0x778   : > { %4747 = vmatmul.mubr.bf16.vlgmr.msra.gmra.mxu0 %v6250_v27  ;;  %4758 = vmatprep.subr.bf16.mxu1 %v5060_v43  ;;  %v5063_v27 = vld [vmem:[#allocation17 + $0x210] sm:$0xff]  }
 0x779   : > { %4750 = vmatprep.mubr.bf16.mxu0 %v6261_v30  ;;  %v3254_v30 = vpack.c.bf16 %v3250_v24, %v6319_v21  ;;  %4779 = vmatpush3.bf16.msra.mxu0 %v5066_v16 }
 0x77a   : > { %4727 = vmatmul.mubr.bf16.gmra.mxu1 %v2954_v39 }
 0x77b   : > { %4759 = vmatpush3.bf16.msra.mxu1 %v5060_v43  ;;  %4770 = vmatprep.mubr.bf16.mxu1 %v6281_v49  ;;  %v5067_v49 = vld [vmem:[#allocation18 + $0x30] sm:$0xff]  }
 0x77c   : > { %4760 = vmatprep.subr.bf16.mxu1 %v5061_v40  ;;  %4780 = vmatprep.subr.bf16.mxu0 %v5067_v49 }
 0x77d   : > { %4781 = vmatpush3.bf16.msra.mxu0 %v5067_v49 }
 0x77e   : > { %4782 = vmatprep.subr.bf16.mxu0 %v5068_v8 }
 0x77f   : > { %4761 = vmatpush3.bf16.msra.mxu1 %v5061_v40 }
 0x780   : > { %4751 = vmatmul.mubr.bf16.gmra.mxu0 %v3104_v37  ;;  %4762 = vmatprep.subr.bf16.mxu1 %v5062_v33 }
 0x781   : > { %4783 = vmatpush3.bf16.msra.mxu0 %v5068_v8 }
 0x782   : > { %4784 = vmatprep.subr.bf16.mxu0 %v5069_v5 }
 0x783   : > { %4763 = vmatpush3.bf16.msra.mxu1 %v5062_v33 }
 0x784   : > { %4764 = vmatprep.subr.bf16.mxu1 %v5063_v27 }
 0x785   : > { %4785 = vmatpush3.bf16.msra.mxu0 %v5069_v5 }
 0x787   : > { %4765 = vmatpush3.bf16.msra.mxu1 %v5063_v27 }
 0x788   : > { %4766 = vmatprep.subr.bf16.mxu1 %v5064_v42 }
 0x78b   : > { %4767 = vmatpush3.bf16.msra.mxu1 %v5064_v42 }
 0x78c   : > { %4768 = vmatprep.subr.bf16.mxu1 %v5065_v47 }
 0x78f   : > { %4769 = vmatpush3.bf16.msra.mxu1 %v5065_v47 }
 0x790   : > { %4802 = vmatprep.subr.mxu1 %v6227_v62 }
 0x792   : > { %4771 = vmatmul.mubr.bf16.vlgmr.msra.gmra.mxu1 %v6287_v10  ;;  %v5070_v10 = vld [vmem:[#allocation18 + $0x18] sm:$0xff]  }
 0x793   : > { %4774 = vmatprep.mubr.bf16.mxu1 %v6298_v61  ;;  %4786 = vmatprep.subr.bf16.mxu0 %v5070_v10 }
 0x794   : > { %4787 = vmatpush3.bf16.msra.mxu0 %v5070_v10 }
 0x795   : > { %4788 = vmatprep.subr.bf16.mxu0 %v5071_v50 }
 0x798   : > { %4789 = vmatpush3.bf16.msra.mxu0 %v5071_v50 }
 0x799   : > { %4790 = vmatprep.subr.bf16.mxu0 %v5072_v51 }
 0x79a   : > { %4775 = vmatmul.mubr.bf16.gmra.mxu1 %v3254_v30 }
 0x79b   : > { %4834 = vmatprep.mubr.msk.f32.mxu1 %vm5480_vm0, %v6227_v62 }
 0x79c   : > { %4791 = vmatpush3.bf16.msra.mxu0 %v5072_v51 }
 0x79d   : > { %4792 = vmatprep.subr.bf16.mxu0 %v5073_v53 }
 0x7a0   : > { %4793 = vmatpush3.bf16.msra.mxu0 %v5073_v53 }
 0x7d0   : > { %v4580_v0 = vpop.f32.mrf.mxu1 }
 0x7d2   : > { %v2198_v55 = vpop.f32.mrf.mxu1 }
 0x7d4   : > { %v4581_v56 = vpop.f32.mrf.mxu1 }
 0x7d6   : > { %v2201_v61 = vpop.f32.mrf.mxu1 }
 0x7d8   : > { %v4604_v60 = vpop.f32.mrf.mxu0 }
 0x7d9   : > { %v2320_v10 = vadd.f32 %v4604_v60, %v4580_v0 }
 0x7da   : > { %v2311_v1 = vpop.f32.mrf.mxu0 }
 0x7db   : > { %v2312_v8 = vadd.f32 %v2311_v1, %v2198_v55 }
 0x7dc   : > { %v4605_v3 = vpop.f32.mrf.mxu0 }
 0x7dd   : > { %v2323_v5 = vadd.f32 %v4605_v3, %v4581_v56 }
 0x7de   : > { %v2314_v7 = vpop.f32.mrf.mxu0 }
 0x7df   : > { %v2315_v50 = vadd.f32 %v2314_v7, %v2201_v61 }
 0x7e0   : > { %v6339_v63 = vpop.f32.mrf.mxu1 }
 0x7e2   : > { %v6341_v2 = vpop.f32.mrf.mxu1 }
 0x7e4   : > { %v6343_v4 = vpop.f32.mrf.mxu1 }
 0x7e6   : > { %v6347_v13 = vpop.f32.mrf.mxu1 }
 0x7e8   : > { %v6345_v9 = vpop.f32.mrf.mxu0 }
 0x7e9   : > { %v2336_v1 = vadd.f32 %v6345_v9, %v6339_v63 }
 0x7ea   : > { %v2327_v57 = vpop.f32.mrf.mxu0 }
 0x7ec   : > { %v4609_v19 = vpop.f32.mrf.mxu0 }
 0x7ed   : > { %v2339_v0 = vadd.f32 %v4609_v19, %v6343_v4 }
 0x7ee   : > { %v6349_v22 = vpop.f32.mrf.mxu0 }
 0x7ef   : > { %v2331_v3 = vadd.f32 %v6349_v22, %v6347_v13 }
 0x7f1   : > { %v4628_v52 = vpop.f32.mrf.mxu1 }
 0x7f2   : > { %v2486_v62 = vadd.f32 %v4628_v52, %v2320_v10 }
 0x7f3   : > { %v2453_v18 = vpop.f32.mrf.mxu1 }
 0x7f4   : > { %v2484_v51 = vadd.f32 %v2453_v18, %v2312_v8 }
 0x7f5   : > { %v4629_v20 = vpop.f32.mrf.mxu1 }
 0x7f6   : > { %v2487_v53 = vadd.f32 %v4629_v20, %v2323_v5 }
 0x7f7   : > { %v2456_v25 = vpop.f32.mrf.mxu1 }
 0x7f8   : > { %v4652_v23 = vpop.f32.mrf.mxu0 }
 0x7fa   : > { %v2603_v26 = vpop.f32.mrf.mxu0  ;;  %v6351_v28 = vpop.f32.mrf.mxu1 }
 0x7fc   : > { %v4653_v29 = vpop.f32.mrf.mxu0  ;;  %v2469_v12 = vpop.f32.mrf.mxu1 }
 0x7fe   : > { %v2606_v14 = vpop.f32.mrf.mxu0  ;;  %v4633_v31 = vpop.f32.mrf.mxu1 }
 0x7ff   : > { %v2491_v18 = vadd.f32 %v4633_v31, %v2339_v0 }
 0x800   : > { %v6353_v17 = vpop.f32.mrf.mxu0  ;;  %v6355_v6 = vpop.f32.mrf.mxu1 }
 0x801   : > { %6617 = vst [vmem:[#allocation35_spill] sm:$0xff] %v6353_v17  ;;  %v2489_v4 = vadd.f32 %v6355_v6, %v2331_v3 }
 0x802   : > { %v2619_v58 = vpop.f32.mrf.mxu0 }
 0x804   : > { %v6357_v48 = vpop.f32.mrf.mxu0 }
 0x805   : > { %6618 = vst [vmem:[#allocation36_spill] sm:$0xff] %v6357_v48 }
 0x806   : > { %v6359_v11 = vpop.f32.mrf.mxu0 }
 0x807   : > { %6619 = vst [vmem:[#allocation37_spill] sm:$0xff] %v6359_v11 }
 0x808   : > { %v6630_v22 = vld [vmem:[#allocation35_spill] sm:$0xff] }
 0x812   : > { %v4676_v54 = vpop.f32.mrf.mxu1 }
 0x814   : > { %v2753_v21 = vpop.f32.mrf.mxu1 }
 0x816   : > { %v4677_v32 = vpop.f32.mrf.mxu1 }
 0x818   : > { %v4700_v44 = vpop.f32.mrf.mxu0  ;;  %v2756_v34 = vpop.f32.mrf.mxu1 }
 0x81a   : > { %v2903_v15 = vpop.f32.mrf.mxu0  ;;  %v6361_v35 = vpop.f32.mrf.mxu1 }
 0x81b   : > { %6620 = vst [vmem:[#allocation38_spill] sm:$0xff] %v6361_v35  ;;  %v2636_v35 = vadd.f32 %v4652_v23, %v2486_v62  ;;  %v2490_v23 = vadd.f32 %v6351_v28, %v2336_v1 }
 0x81c   : > { %v4701_v46 = vpop.f32.mrf.mxu0  ;;  %v2769_v36 = vpop.f32.mrf.mxu1 }
 0x81d   : > { %v2786_v48 = vadd.f32 %v4676_v54, %v2636_v35  ;;  %v6631_v54 = vld [vmem:[#allocation37_spill] sm:$0xff] }
 0x81e   : > { %v2906_v45 = vpop.f32.mrf.mxu0  ;;  %v6363_v59 = vpop.f32.mrf.mxu1  ;;  %v2639_v31 = vadd.f32 %v6631_v54, %v2489_v4  ;;  %v3588_v54 = vld [vmem:[%s6540_s21 + $0x50] sm:$0xff] }
 0x81f   : > { %6621 = vst [vmem:[#allocation39_spill] sm:$0xff] %v6363_v59  ;;  %v2936_v7 = vadd.f32 %v4700_v44, %v2786_v48 }
 0x820   : > { %v6365_v38 = vpop.f32.mrf.mxu0  ;;  %v6367_v43 = vpop.f32.mrf.mxu1 }
 0x821   : > { %6622 = vst [vmem:[#allocation40_spill] sm:$0xff] %v6365_v38  ;;  %6623 = vst [vmem:[#allocation41_spill] sm:$0xff] %v6367_v43  ;;  %v2637_v43 = vadd.f32 %v4653_v29, %v2487_v53 }
 0x822   : > { %v6369_v40 = vpop.f32.mrf.mxu0 }
 0x823   : > { %6624 = vst [vmem:[#allocation42_spill] sm:$0xff] %v6369_v40  ;;  %v2634_v40 = vadd.f32 %v2603_v26, %v2484_v51  ;;  %v2787_v17 = vadd.f32 %v4677_v32, %v2637_v43 }
 0x824   : > { %v6371_v33 = vpop.f32.mrf.mxu0 }
 0x825   : > { %6625 = vst [vmem:[#allocation43_spill] sm:$0xff] %v6371_v33  ;;  %v2784_v11 = vadd.f32 %v2753_v21, %v2634_v40  ;;  %v2937_v60 = vadd.f32 %v4701_v46, %v2787_v17 }
 0x826   : > { %v6373_v27 = vpop.f32.mrf.mxu0 }
 0x827   : > { %6626 = vst [vmem:[#allocation44_spill] sm:$0xff] %v6373_v27  ;;  %v2485_v27 = vadd.f32 %v2456_v25, %v2315_v50  ;;  %v2934_v56 = vadd.f32 %v2903_v15, %v2784_v11  ;;  %v6632_v11 = vld [vmem:[#allocation39_spill] sm:$0xff] }
 0x828   : > { %v6634_v35 = vld [vmem:[#allocation41_spill] sm:$0xff] }
 0x829   : > { %v2635_v59 = vadd.f32 %v2606_v14, %v2485_v27  ;;  %v6629_v14 = vld [vmem:[#allocation36_spill] sm:$0xff]  ;;  %v2789_v46 = vadd.f32 %v6634_v35, %v2639_v31  ;;  %v3587_v31 = vld [vmem:[%s6540_s21 + $0x48] sm:$0xff]  ;;  %v4008_v35 = vld [vmem:[%s6539_s20] ss:$0 sm:$0xff] }
 0x82a   : > { %v2641_v63 = vadd.f32 %v6629_v14, %v2491_v18 }
 0x82b   : > { %v2785_v61 = vadd.f32 %v2756_v34, %v2635_v59  ;;  %v6633_v34 = vld [vmem:[#allocation38_spill] sm:$0xff] }
 0x82c   : > { %v2791_v28 = vadd.f32 %v6632_v11, %v2641_v63  ;;  %v3583_v11 = vld [vmem:[%s6540_s21 + $0x28] sm:$0xff] }
 0x82d   : > { %v2935_v20 = vadd.f32 %v2906_v45, %v2785_v61 }
 0x832   : > { %v4724_v39 = vpop.f32.mrf.mxu1 }
 0x833   : > { %v3087_v19 = vadd.f32 %v4724_v39, %v2936_v7  ;;  %v6635_v39 = vld [vmem:[#allocation42_spill] sm:$0xff] }
 0x834   : > { %v3054_v41 = vpop.f32.mrf.mxu1 }
 0x836   : > { %v4725_v37 = vpop.f32.mrf.mxu1 }
 0x838   : > { %v4748_v42 = vpop.f32.mrf.mxu0  ;;  %v3057_v47 = vpop.f32.mrf.mxu1 }
 0x839   : > { %v3086_v13 = vadd.f32 %v3057_v47, %v2935_v20  ;;  %v3237_v48 = vadd.f32 %v4748_v42, %v3087_v19  ;;  %v6637_v42 = vld [vmem:[#allocation40_spill] sm:$0xff] }
 0x83a   : > { %v3204_v24 = vpop.f32.mrf.mxu0  ;;  %v6375_v30 = vpop.f32.mrf.mxu1  ;;  %v6638_v47 = vld [vmem:[#allocation44_spill] sm:$0xff] }
 0x83b   : > { %6627 = vst [vmem:[#allocation45_spill] sm:$0xff] %v6375_v30  ;;  %v2328_v30 = vadd.f32 %v2327_v57, %v6341_v2  ;;  %v3085_v2 = vadd.f32 %v3054_v41, %v2934_v56  ;;  %v3088_v57 = vadd.f32 %v4725_v37, %v2937_v60  ;;  %v6636_v41 = vld [vmem:[#allocation43_spill] sm:$0xff] }
 0x83c   : > { %v4749_v16 = vpop.f32.mrf.mxu0  ;;  %v6377_v49 = vpop.f32.mrf.mxu1  ;;  %v2941_v37 = vadd.f32 %v6636_v41, %v2791_v28  ;;  %v3582_v28 = vld [vmem:[%s6540_s21 + $0x20] sm:$0xff] }
 0x83d   : > { %6628 = vst [vmem:[#allocation46_spill] sm:$0xff] %v6377_v49  ;;  %v2488_v62 = vadd.f32 %v2469_v12, %v2328_v30  ;;  %v3235_v9 = vadd.f32 %v3204_v24, %v3085_v2  ;;  %v3238_v17 = vadd.f32 %v4749_v16, %v3088_v57  ;;  %v2640_v12 = vadd.f32 %v6630_v22, %v2490_v23  ;;  %v3590_v22 = vld [vmem:[%s6540_s21 + $0x60] sm:$0xff] }
 0x83e   : > { %v3207_v38 = vpop.f32.mrf.mxu0  ;;  %v4729_v33 = vpop.f32.mrf.mxu1  ;;  %v2939_v24 = vadd.f32 %v6638_v47, %v2789_v46  ;;  %v5113_v47 = vld [vmem:[%s6033_s22 + $0x8] sm:$0xff] }
 0x83f   : > { %v2638_v25 = vadd.f32 %v2619_v58, %v2488_v62  ;;  %v3236_v58 = vadd.f32 %v3207_v38, %v3086_v13  ;;  %v2790_v15 = vadd.f32 %v6633_v34, %v2640_v12  ;;  %v3092_v10 = vadd.f32 %v4729_v33, %v2941_v37  ;;  %v3591_v13 = vld [vmem:[%s6540_s21 + $0x68] sm:$0xff]  ;;  %v3589_v12 = vld [vmem:[%s6540_s21 + $0x58] sm:$0xff]  ;;  %v3578_v34 = vld [vmem:[%s6540_s21] sm:$0xff] }
 0x840   : > { %v4752_v49 = vpop.f32.mrf.mxu0  ;;  %v3073_v55 = vpop.f32.mrf.mxu1 }
 0x841   : > { %v2788_v21 = vadd.f32 %v2769_v36, %v2638_v25  ;;  %v4007_v36 = vld [vmem:[%s6537_s18] ss:$0 sm:$0xff]  ;;  %v2940_v38 = vadd.f32 %v6637_v42, %v2790_v15  ;;  %v3090_v62 = vadd.f32 %v3073_v55, %v2939_v24  ;;  %v6641_v55 = vld [vmem:[#allocation34_spill] sm:$0xff]  ;;  %v5112_v42 = vld [vmem:[%s6033_s22 + $0x10] sm:$0xff] }
 0x842   : > { %v3220_v26 = vpop.f32.mrf.mxu0  ;;  %v6640_v53 = vld [vmem:[#allocation45_spill] sm:$0xff] }
 0x843   : > { %v2938_v40 = vadd.f32 %v6635_v39, %v2788_v21  ;;  %v3091_v0 = vadd.f32 %v6640_v53, %v2940_v38  ;;  %v3586_v21 = vld [vmem:[%s6540_s21 + $0x40] sm:$0xff] }
 0x844   : > { %v4753_v45 = vpop.f32.mrf.mxu0  ;;  %v6639_v8 = vld [vmem:[#allocation46_spill] sm:$0xff] }
 0x845   : > { %v3089_v5 = vadd.f32 %v6639_v8, %v2938_v40  ;;  %v3242_v3 = vadd.f32 %v4753_v45, %v3092_v10  ;;  %v5111_v40 = vld [vmem:[%s6033_s22] sm:$0xff]  ;;  %v5114_v8 = vld [vmem:[%s6033_s22 + $0x18] sm:$0xff] }
 0x846   : > { %v3223_v56 = vpop.f32.mrf.mxu0 }
 0x847   : > { %v3239_v1 = vadd.f32 %v3220_v26, %v3089_v5  ;;  %v3240_v2 = vadd.f32 %v3223_v56, %v3090_v62 }
 0x852   : > { %v4772_v52 = vpop.f32.mrf.mxu1 }
 0x853   : > { %v3387_v59 = vadd.f32 %v4772_v52, %v3237_v48  ;;  %v3241_v52 = vadd.f32 %v4752_v49, %v3091_v0  ;;  %v3593_v49 = vld [vmem:[%s6540_s21 + $0x78] sm:$0xff] }
 0x854   : > { %v3354_v29 = vpop.f32.mrf.mxu1  ;;  %4803 = vmatpush3.msra.mxu1 %v3593_v49  ;;  %v3585_v48 = vld [vmem:[%s6540_s21 + $0x38] sm:$0xff] }
 0x855   : > { %v3385_v44 = vadd.f32 %v3354_v29, %v3235_v9  ;;  %v3402_v60 = vadd.f32 %v4007_v36, %v3387_v59  ;;  %4804 = vmatprep.subr.mxu1 %v6641_v55 }
 0x856   : > { %v4773_v32 = vpop.f32.mrf.mxu1 }
 0x857   : > { %v3388_v6 = vadd.f32 %v4773_v32, %v3238_v17  ;;  %v3400_v50 = vadd.f32 %v4007_v36, %v3385_v44  ;;  %v3592_v17 = vld [vmem:[%s6540_s21 + $0x70] sm:$0xff] }
 0x858   : > { %v3357_v43 = vpop.f32.mrf.mxu1  ;;  %4805 = vmatpush3.msra.mxu1 %v3592_v17  ;;  %v3584_v32 = vld [vmem:[%s6540_s21 + $0x30] sm:$0xff] }
 0x859   : > { %v3386_v27 = vadd.f32 %v3357_v43, %v3236_v58  ;;  %v3403_v30 = vadd.f32 %v4007_v36, %v3388_v6  ;;  %4806 = vmatprep.subr.mxu1 %v6641_v55  ;;  %v3581_v58 = vld [vmem:[%s6540_s21 + $0x18] sm:$0xff]  ;;  %v3580_v44 = vld [vmem:[%s6540_s21 + $0x10] sm:$0xff]  ;;  %v3579_v6 = vld [vmem:[%s6540_s21 + $0x8] sm:$0xff] }
 0x85a   : > { %v4776_v16 = vpop.f32.mrf.mxu1  ;;  %4807 = vmatpush3.msra.mxu1 %v3591_v13 }
 0x85b   : > { %v3401_v51 = vadd.f32 %v4007_v36, %v3386_v27  ;;  %v3409_v18 = vpack.c.bf16 %v3403_v30, %v3402_v60  ;;  %v3391_v25 = vadd.f32 %v4776_v16, %v3241_v52  ;;  %4808 = vmatprep.subr.mxu1 %v6641_v55  ;;  %v5115_v60 = vld [vmem:[%s6033_s22 + $0x20] sm:$0xff] }
 0x85c   : > { %v3370_v61 = vpop.f32.mrf.mxu1  ;;  %4809 = vmatpush3.msra.mxu1 %v3590_v22 }
 0x85d   : > { %v3408_v7 = vpack.c.bf16 %v3401_v51, %v3400_v50  ;;  %v3389_v57 = vadd.f32 %v3370_v61, %v3239_v1  ;;  %v3406_v63 = vadd.f32 %v4007_v36, %v3391_v25  ;;  %4810 = vmatprep.subr.mxu1 %v6641_v55 }
 0x85e   : > { %v4777_v20 = vpop.f32.mrf.mxu1  ;;  %4811 = vmatpush3.msra.mxu1 %v3589_v12 }
 0x85f   : > { %v3392_v23 = vadd.f32 %v4777_v20, %v3242_v3  ;;  %4794 = vmatprep.mubr.bf16.mxu0 %v3408_v7  ;;  %v3404_v29 = vadd.f32 %v4007_v36, %v3389_v57  ;;  %4812 = vmatprep.subr.mxu1 %v6641_v55 }
 0x860   : > { %v3373_v33 = vpop.f32.mrf.mxu1  ;;  %4795 = vmatmul.mubr.bf16.vlgmr.msra.gmra.mxu0 %v3409_v18  ;;  %4813 = vmatpush3.msra.mxu1 %v3588_v54  ;;  %v5116_v18 = vld [vmem:[%s6033_s22 + $0x30] sm:$0xff] }
 0x861   : > { %v3390_v4 = vadd.f32 %v3373_v33, %v3240_v2  ;;  %v3407_v19 = vadd.f32 %v4007_v36, %v3392_v23  ;;  %4814 = vmatprep.subr.mxu1 %v6641_v55  ;;  %v5117_v23 = vld [vmem:[%s6033_s22 + $0x28] sm:$0xff] }
 0x862   : > { %4815 = vmatpush3.msra.mxu1 %v3587_v31 }
 0x863   : > { %v3405_v14 = vadd.f32 %v4007_v36, %v3390_v4  ;;  %v3411_v26 = vpack.c.bf16 %v3407_v19, %v3406_v63  ;;  %4816 = vmatprep.subr.mxu1 %v6641_v55  ;;  %v5118_v4 = vld [vmem:[%s6033_s22 + $0x38] sm:$0xff]  ;;  %s5482_s22 = smov [#allocation20]  }
 0x864   : > { %4817 = vmatpush3.msra.mxu1 %v3586_v21  ;;  %v3594_v21 = vld [vmem:[%s6642_s27] sm:$0x1]  ;;  %s5383_s6 = sshll.u32 %s5482_s22, 4  ;;  %s5384_s6 = int_to_ptr.vmem [resolvable:$false] %s5383_s6 }
 0x865   : > { %v3410_v9 = vpack.c.bf16 %v3405_v14, %v3404_v29  ;;  %4818 = vmatprep.subr.mxu1 %v6641_v55  ;;  %s5385_s30 = scalar_lea.vmem %s5384_s6, 32  ;;  %p5386_p1 = scmp.lt.s32.totalorder %s3685_s0, %s5384_s6 }
 0x866   : > { %4819 = vmatpush3.msra.mxu1 %v3585_v48  ;;  %p5387_p2 = scmp.lt.s32.totalorder %s5385_s30, %s5379_s5 }
 0x867   : > { %4798 = vmatprep.mubr.bf16.mxu0 %v3410_v9  ;;  %4820 = vmatprep.subr.mxu1 %v6641_v55 }
 0x868   : > { %4799 = vmatmul.mubr.bf16.gmra.mxu0 %v3411_v26  ;;  %4821 = vmatpush3.msra.mxu1 %v3584_v32  ;;  %p5388_p12 = por %p5387_p2, %p5386_p1 }
 0x869   : > { %4822 = vmatprep.subr.mxu1 %v6641_v55 }
 0x86a   : > { %4823 = vmatpush3.msra.mxu1 %v3583_v11  ;;  %p5389_p3 = pnand %p5388_p12, %p5382_p0 }
 0x86b   : > { %4824 = vmatprep.subr.mxu1 %v6641_v55 }
 0x86c   : > { %4825 = vmatpush3.msra.mxu1 %v3582_v28 }
 0x86d   : > { %4826 = vmatprep.subr.mxu1 %v6641_v55 }
 0x86e   : > { %4827 = vmatpush3.msra.mxu1 %v3581_v58 }
 0x86f   : > { %4828 = vmatprep.subr.mxu1 %v6641_v55 }
 0x870   : > { %4829 = vmatpush3.msra.mxu1 %v3580_v44 }
 0x871   : > { %4830 = vmatprep.subr.mxu1 %v6641_v55 }
 0x872   : > { %4831 = vmatpush3.msra.mxu1 %v3579_v6 }
 0x873   : > { %4832 = vmatprep.subr.mxu1 %v6641_v55 }
 0x874   : > { %4833 = vmatpush3.msra.mxu1 %v3578_v34 }
 0x920   : > { %v4796_v15 = vpop.f32.mrf.mxu0 }
 0x921   : > { %v3526_v43 = vadd.f32 %v4796_v15, %v4008_v35 }
 0x922   : > { %v3517_v46 = vpop.f32.mrf.mxu0 }
 0x923   : > { %v3518_v45 = vadd.f32 %v4008_v35, %v3517_v46  ;;  %v3550_v38 = vadd.f32 %v5112_v42, %v3526_v43 }
 0x924   : > { %v4797_v59 = vpop.f32.mrf.mxu0 }
 0x925   : > { %v3548_v41 = vadd.f32 %v5111_v40, %v3518_v45  ;;  %v3529_v37 = vadd.f32 %v4797_v59, %v4008_v35  ;;  %v3558_v53 = vmax.f32 %v3550_v38, 0.0 }
 0x926   : > { %v3520_v39 = vpop.f32.mrf.mxu0 }
 0x927   : > { %v3521_v36 = vadd.f32 %v4008_v35, %v3520_v39  ;;  %v3556_v16 = vmax.f32 %v3548_v41, 0.0  ;;  %v3551_v5 = vadd.f32 %v5114_v8, %v3529_v37 }
 0x928   : > { %v4800_v27 = vpop.f32.mrf.mxu0 }
 0x929   : > { %v3549_v24 = vadd.f32 %v5113_v47, %v3521_v36  ;;  %v3542_v56 = vadd.f32 %v4800_v27, %v4008_v35  ;;  %v3559_v3 = vmax.f32 %v3551_v5, 0.0 }
 0x92a   : > { %v3533_v30 = vpop.f32.mrf.mxu0 }
 0x92b   : > { %v3557_v10 = vmax.f32 %v3549_v24, 0.0  ;;  %v3534_v50 = vadd.f32 %v4008_v35, %v3533_v30  ;;  %v3554_v20 = vadd.f32 %v5116_v18, %v3542_v56 }
 0x92c   : > { %v4801_v51 = vpop.f32.mrf.mxu0 }
 0x92d   : > { %v3564_v0 = vadd.f32 %v3557_v10, %v3556_v16  ;;  %v3552_v61 = vadd.f32 %v5115_v60, %v3534_v50  ;;  %v3545_v7 = vadd.f32 %v4801_v51, %v4008_v35  ;;  %v3562_v14 = vmax.f32 %v3554_v20, 0.0 }
 0x92e   : > { %v3536_v1 = vpop.f32.mrf.mxu0 }
 0x92f   : > { %v3565_v62 = vadd.f32 %v3564_v0, %v3558_v53  ;;  %v3537_v52 = vadd.f32 %v4008_v35, %v3536_v1  ;;  %v3560_v2 = vmax.f32 %v3552_v61, 0.0  ;;  %v3555_v19 = vadd.f32 %v5118_v4, %v3545_v7 }
 0x931   : > { %v3566_v57 = vadd.f32 %v3565_v62, %v3559_v3  ;;  %v3553_v25 = vadd.f32 %v5117_v23, %v3537_v52  ;;  %v3563_v9 = vmax.f32 %v3555_v19, 0.0 }
 0x933   : > { %v3567_v33 = vadd.f32 %v3566_v57, %v3560_v2  ;;  %v3561_v29 = vmax.f32 %v3553_v25, 0.0 }
 0x935   : > { %v3568_v63 = vadd.f32 %v3567_v33, %v3561_v29 }
 0x937   : > { %v3569_v26 = vadd.f32 %v3568_v63, %v3562_v14 }
 0x939   : > { %v3570_v49 = vadd.f32 %v3569_v26, %v3563_v9 }
 0x93b   : > { %v3571_v55 = vrot.slane %v3570_v49, 4 }
 0x93d   : > { %v3572_v17 = vadd.f32 %v3571_v55, %v3570_v49 }
 0x93f   : > { %v3573_v13 = vrot.slane %v3572_v17, 2 }
 0x941   : > { %v3574_v22 = vadd.f32 %v3573_v13, %v3572_v17 }
 0x943   : > { %v3575_v12 = vrot.slane %v3574_v22, 1 }
 0x945   : > { %v3576_v54 = vadd.f32 %v3575_v12, %v3574_v22 }
 0x947   : > { %v3577_v31 = vmul.f32 0.015625, %v3576_v54 }
 0x949   : > { %4835 = vmatmul.mubr.f32.vlgmr.msra.gmra.mxu1 %v3577_v31 }
 0xa09   : > { %v3661_v48 = vpop.f32.mrf.mxu1 }
 0xa0a   : > { %v3662_v32 = vadd.f32 %v3661_v48, %v3594_v21 }
 0xa0b   : > { %v4836_v11 = vpop.f32.mrf.mxu1 }
 0xa0c   : > { %3665 = vst [vmem:[%s896_s23] sm:$0x1] %v3662_v32 }
 0xa0d   : > { %5392 = shalt.err (!%p5389_p3)
}
 0xa0e   : > { %s5393_s27 = scalar_lea.hbm %s6484_s1, 16  ;;  %s5397_s23 = scalar_lea.hbm %s6643_s29, 32 }
 0xa0f   : > { %p5394_p4 = scmp.ne.s32.totalorder %s6484_s1, %s5393_s27  ;;  %p5398_p8 = scmp.lt.s32.totalorder %s6484_s1, %s6643_s29 }
 0xa10   : > { %p5399_p11 = scmp.lt.s32.totalorder %s5397_s23, %s5393_s27 }
 0xa11   : > { %p5395_p9 = pnand %p5394_p4, %p6644_p13 }
 0xa12   : > { %p5400_p5 = por %p5399_p11, %p5398_p8 }
 0xa13   : > { %p5396_p7 = pneg %p5395_p9 }
 0xa15   : > { %p5401_p6 = pnand %p5400_p5, %p5396_p7 }
 0xa17   : > { %5404 = shalt.err (!%p5401_p6)
}
 0xa18   : > { %4877 = dma.vmem_to_hbm [thread:$0]  (%p6644_p13), %s3685_s0, 16, %s6484_s1, %s3667_s4  }
 0xa19 PF: > { %s6645_s5 = sld [smem:[#allocation30_spill]] }
 0xa1a   : > { %s6646_s22 = sld [smem:[#allocation28_spill]] }
 0xa1b   : > { %s6647_s6 = sld [smem:[#allocation33_spill]] }
 0xa1f   : > { %p4934_p10 = scmp.ge.s32.totalorder %s6645_s5, 2 }
 0xa20   : > { %s3699_s30 = sand.u32 1, %s6646_s22  }
 0xa21   : > { %p6648_p0 = scmp.ne.s32.totalorder %s6647_s6, 0  ;;  %s3700_s8 = scalar_lea.sflag [#allocation5], %s3699_s30 }
 0xa23   : > { %p4911_p1 = pnand %p4934_p10, %p6648_p0 }
 0xa25   : > { %p4912_p2 = pneg %p4911_p1 }
 0xa27   : > { %5446 = dma.done.wait (%p4912_p2), %s3700_s8, 16  }
 0xa28   : > { %5448 = vsyncadd (%p4912_p2), %s3700_s8, 4294967280  ;;  %s6649_s28 = sld [smem:[#allocation31_spill]]  ;;  %s6652_s5 = smov %s5455_s26 }
 0xa29   : > { %s6650_s27 = sld [smem:[#allocation29_spill]] }
 0xa2a   : > { %s6651_s13 = sld [smem:[#allocation32_spill]] }
 0xa2e   : > { %p41_p12 = scmp.ge.s32.totalorder %s6649_s28, 4  }
 0xa2f   : > { %s6653_s26 = smov %s6650_s27 }
 0xa30   : > { %s6654_s27 = smov %s6651_s13  ;;  %43 = sbr.rel (!%p41_p12) target bundleno = 22 (0x16), region = 216 }
 0xa35   :  { %3712 = vsyncpa [#allocation4], 1 }
 0xa36   :  { %3714 = vsyncpa [#allocation4 + $0x1], 1 }
 0xa37   :  { %3715 = vsyncpa [#allocation7], 1 }
 0xa38   :  { %3716 = vsyncpa [#allocation10], 1 }
 0xa39   :  { %3717 = vsyncpa [#allocation13], 1 }
 0xa3a   :  { %3718 = vsyncpa [#allocation16], 1 }
 0xa3b   :  { %3719 = vsyncpa [#allocation19], 1 }
 0xa3c   :  { %3720 = vsyncpa [#allocation5], 1 }
 0xa3d   :  { %3722 = vsyncpa [#allocation5 + $0x1], 1 }

</bundles_post_ra>
